<compile_context>
chip_gen: v5e
topology: v5e:2x2
jax: 0.10.0
libtpu: 0.0.40
codegen_flags: <defaults>
</compile_context>

<pallas_src>
import functools

import jax
import jax.numpy as jnp
from jax import lax
from jax.experimental import pallas as pl
from jax.experimental.pallas import tpu as pltpu


def _unet_double_conv_kernel(x_ref, w1_ref, b1_ref, w2_ref, b2_ref, o_ref,
                             xpad_ref, mid_ref):
    """One (batch, row-tile) step of (conv3x3 s1 p1 + ReLU) x 2, NHWC.

    x_ref   : (1, H, W, Cin)     full image for this batch element (re-DMA'd
                                 only when the batch index changes)
    w1_ref  : (9, Cin, Cmid)     conv1 taps, tap index = ky*3+kx (compute dtype)
    b1_ref  : (1, Cmid)          conv1 bias (f32)
    w2_ref  : (9, Cmid, Cout)    conv2 taps (compute dtype)
    b2_ref  : (1, Cout)          conv2 bias (f32)
    o_ref   : (1, TH, W, Cout)   output row tile
    xpad_ref: (TH+4, W+2, Cin)   VMEM: zero-bordered conv1 input window
    mid_ref : (TH+2, W+2, Cmid)  VMEM: zero-bordered conv1 output (conv2 input)
    """
    H = x_ref.shape[1]
    W = x_ref.shape[2]
    Cin = x_ref.shape[3]
    TH = o_ref.shape[1]
    Cout = o_ref.shape[3]
    Cmid = mid_ref.shape[2]
    nt = H // TH                       # number of row tiles (static)
    cdt = xpad_ref.dtype               # matmul / scratch compute dtype

    t = pl.program_id(1)
    row0 = pl.multiple_of(t * TH, TH)  # first output row of this tile

    # ---- stage conv1 input window: TH body rows + 2-row halos, 1-col border -
    # Body rows (the TH output rows) are always inside the image.
    xpad_ref[2:TH + 2, 1:W + 1, :] = x_ref[0, pl.ds(row0, TH), :, :].astype(cdt)
    # Column zero-borders: tiny strips, rewritten every step.
    xpad_ref[:, 0:1, :] = jnp.zeros((TH + 4, 1, Cin), cdt)
    xpad_ref[:, W + 1:W + 2, :] = jnp.zeros((TH + 4, 1, Cin), cdt)

    # 2-row top halo: image rows when they exist, zeros at the image edge.
    @pl.when(t > 0)
    def _():
        xpad_ref[0:2, 1:W + 1, :] = (
            x_ref[0, pl.ds(row0 - 2, 2), :, :].astype(cdt))

    @pl.when(t == 0)
    def _():
        xpad_ref[0:2, :, :] = jnp.zeros((2, W + 2, Cin), cdt)

    # 2-row bottom halo.
    @pl.when(t < nt - 1)
    def _():
        xpad_ref[TH + 2:TH + 4, 1:W + 1, :] = (
            x_ref[0, pl.ds(row0 + TH, 2), :, :].astype(cdt))

    @pl.when(t == nt - 1)
    def _():
        xpad_ref[TH + 2:TH + 4, :, :] = jnp.zeros((2, W + 2, Cin), cdt)

    # ---- conv1: 9 tap-accumulating MXU matmuls, f32 acc, bias+ReLU in f32 ---
    rows1 = (TH + 2) * W
    acc1 = jnp.broadcast_to(b1_ref[...].astype(jnp.float32), (rows1, Cmid))
    for ky in range(3):
        for kx in range(3):
            tap = xpad_ref[ky:ky + TH + 2, kx:kx + W, :].reshape(rows1, Cin)
            acc1 = acc1 + jnp.dot(tap, w1_ref[ky * 3 + kx],
                                  preferred_element_type=jnp.float32)
    h1 = jnp.maximum(acc1, 0.0)

    # ---- stage conv2 input (mid) with its own zero border -------------------
    mid_ref[0:TH + 2, 1:W + 1, :] = h1.reshape(TH + 2, W, Cmid).astype(cdt)
    mid_ref[:, 0:1, :] = jnp.zeros((TH + 2, 1, Cmid), cdt)
    mid_ref[:, W + 1:W + 2, :] = jnp.zeros((TH + 2, 1, Cmid), cdt)
    # Mid rows that fall outside the image are conv2 zero-padding, not conv1
    # outputs: overwrite them with zeros at the image edges (the wasted conv1
    # row of compute there is negligible and overwritten here).
    @pl.when(t == 0)
    def _():
        mid_ref[0:1, :, :] = jnp.zeros((1, W + 2, Cmid), cdt)

    @pl.when(t == nt - 1)
    def _():
        mid_ref[TH + 1:TH + 2, :, :] = jnp.zeros((1, W + 2, Cmid), cdt)

    # ---- conv2: 9 tap-accumulating MXU matmuls -------------------------------
    rows2 = TH * W
    acc2 = jnp.broadcast_to(b2_ref[...].astype(jnp.float32), (rows2, Cout))
    for ky in range(3):
        for kx in range(3):
            tap = mid_ref[ky:ky + TH, kx:kx + W, :].reshape(rows2, Cmid)
            acc2 = acc2 + jnp.dot(tap, w2_ref[ky * 3 + kx],
                                  preferred_element_type=jnp.float32)
    h2 = jnp.maximum(acc2, 0.0)

    o_ref[...] = h2.reshape(1, TH, W, Cout).astype(o_ref.dtype)


def prepare_unet_conv_params(w1, b1, w2, b2, compute_dtype=jnp.bfloat16):
    """One-time re-layout of PyTorch OIHW conv weights into kernel layout.

    Hoisted out of the per-call path (weights are static between calls).
    Returns (w1 taps (9,Cin,Cout), b1 (1,Cout) f32, w2 taps (9,Cout,Cout),
             b2 (1,Cout) f32).
    """
    Cout, Cin = w1.shape[0], w1.shape[1]
    w1t = jnp.transpose(w1, (2, 3, 1, 0)).reshape(9, Cin, Cout).astype(compute_dtype)
    w2t = jnp.transpose(w2, (2, 3, 1, 0)).reshape(9, Cout, Cout).astype(compute_dtype)
    b1t = b1.reshape(1, Cout).astype(jnp.float32)
    b2t = b2.reshape(1, Cout).astype(jnp.float32)
    return (w1t, b1t, w2t, b2t)


def _pick_row_tile(H):
    """Largest divisor of H with 2 <= TH <= min(64, H//2).

    >=2 row tiles keeps both v7x TensorCores busy even at N=1 and gives the
    pipeline something to overlap; TH<=64 bounds per-tile VMEM for real image
    sizes.  Falls back to a single whole-image tile when no such divisor
    exists (then the halo branches all resolve to zero-fills, still correct).
    """
    best = None
    for th in range(2, min(64, H // 2) + 1):
        if H % th == 0:
            best = th
    return best if best is not None else H


def unet_conv_forward_nhwc(x, params, compute_dtype=jnp.bfloat16):
    """Core fused double-conv forward.  x: (N, H, W, Cin) NHWC -> (N, H, W, Cout)."""
    w1t, b1t, w2t, b2t = params
    N, H, W, Cin = x.shape
    Cmid = w1t.shape[2]
    Cout = w2t.shape[2]
    TH = _pick_row_tile(H)
    nt = H // TH

    grid_spec = pltpu.PrefetchScalarGridSpec(
        num_scalar_prefetch=0,
        grid=(N, nt),
        in_specs=[
            # Full image per batch element; the block index is constant across
            # the row-tile axis so it is only DMA'd once per batch element.
            pl.BlockSpec((1, H, W, Cin), lambda n, t: (n, 0, 0, 0)),
            pl.BlockSpec((9, Cin, Cmid), lambda n, t: (0, 0, 0)),
            pl.BlockSpec((1, Cmid), lambda n, t: (0, 0)),
            pl.BlockSpec((9, Cmid, Cout), lambda n, t: (0, 0, 0)),
            pl.BlockSpec((1, Cout), lambda n, t: (0, 0)),
        ],
        out_specs=pl.BlockSpec((1, TH, W, Cout), lambda n, t: (n, t, 0, 0)),
        scratch_shapes=[
            pltpu.VMEM((TH + 4, W + 2, Cin), compute_dtype),   # conv1 input window
            pltpu.VMEM((TH + 2, W + 2, Cmid), compute_dtype),  # conv1->conv2 mid
        ],
    )
    return pl.pallas_call(
        _unet_double_conv_kernel,
        out_shape=jax.ShapeDtypeStruct((N, H, W, Cout), x.dtype),
        grid_spec=grid_spec,
        compiler_params=pltpu.CompilerParams(
            dimension_semantics=("parallel", "parallel"),
            # Explicit scoped-VMEM budget: above v5e's 16 MiB default, inside
            # v7x's 64 MiB physical VMEM.
            vmem_limit_bytes=48 * 1024 * 1024),
    )(x, w1t, b1t, w2t, b2t)


def unet_conv_forward_nchw(x_nchw, params, compute_dtype=jnp.bfloat16):
    """PyTorch-layout adapter: transposes only at the network edge.

    Inside a full U-Net, chain unet_conv_forward_nhwc directly (NHWC
    end-to-end) and skip these two layout passes entirely.
    """
    x = jnp.transpose(x_nchw, (0, 2, 3, 1))
    y = unet_conv_forward_nhwc(x, params, compute_dtype)
    return jnp.transpose(y, (0, 3, 1, 2))


def _reference_forward(x_nchw, w1, b1, w2, b2, compute_dtype=jnp.float32):
    """Plain-JAX reference (PyTorch Conv2d + ReLU semantics), with the same
    operand-quantization points as the kernel when compute_dtype=bf16."""
    def conv(x, w, b):
        y = lax.conv_general_dilated(
            x.astype(compute_dtype), w.astype(compute_dtype),
            window_strides=(1, 1), padding=((1, 1), (1, 1)),
            dimension_numbers=('NCHW', 'OIHW', 'NCHW'),
            preferred_element_type=jnp.float32)
        return jnp.maximum(y + b[None, :, None, None].astype(jnp.float32), 0.0)
    return conv(conv(x_nchw, w1, b1), w2, b2)


if __name__ == "__main__":
    key = jax.random.PRNGKey(0)
    k_x, k_w1, k_b1, k_w2, k_b2 = jax.random.split(key, 5)

    N, Cin, Cout, H, W = 2, 4, 8, 16, 16

    x = jax.random.normal(k_x, (N, Cin, H, W), dtype=jnp.float32)
    # Deterministic parameter init (synthetic, not a checkpoint load).
    w1 = jax.random.normal(k_w1, (Cout, Cin, 3, 3), dtype=jnp.float32) * 0.1
    b1 = jax.random.normal(k_b1, (Cout,), dtype=jnp.float32) * 0.1
    w2 = jax.random.normal(k_w2, (Cout, Cout, 3, 3), dtype=jnp.float32) * 0.1
    b2 = jax.random.normal(k_b2, (Cout,), dtype=jnp.float32) * 0.1

    # ---- exact-semantics path (f32 MXU operands) ----------------------------
    params_f32 = prepare_unet_conv_params(w1, b1, w2, b2,
                                          compute_dtype=jnp.float32)
    fwd_f32 = jax.jit(functools.partial(unet_conv_forward_nchw,
                                        compute_dtype=jnp.float32))
    out_f32 = jax.block_until_ready(fwd_f32(x, params_f32))
    ref_f32 = _reference_forward(x, w1, b1, w2, b2, jnp.float32)
    assert out_f32.shape == (N, Cout, H, W), out_f32.shape
    assert jnp.allclose(out_f32, ref_f32, atol=1e-4, rtol=1e-4), (
        float(jnp.max(jnp.abs(out_f32 - ref_f32))))

    # ---- performance path (bf16 MXU operands, f32 accumulation) -------------
    params_bf16 = prepare_unet_conv_params(w1, b1, w2, b2,
                                           compute_dtype=jnp.bfloat16)
    fwd_bf16 = jax.jit(functools.partial(unet_conv_forward_nchw,
                                         compute_dtype=jnp.bfloat16))
    out_bf16 = jax.block_until_ready(fwd_bf16(x, params_bf16))
    ref_bf16 = _reference_forward(x, w1, b1, w2, b2, jnp.bfloat16)
    assert out_bf16.shape == (N, Cout, H, W), out_bf16.shape
    assert jnp.allclose(out_bf16, ref_bf16, atol=2e-2, rtol=2e-2), (
        float(jnp.max(jnp.abs(out_bf16 - ref_bf16))))

    print("KERNEL_OK")
</pallas_src>

<mosaic_0001>
module attributes {stable_mosaic.version = 11 : i64} {
  func.func @_unet_double_conv_kernel(%arg0: i32, %arg1: i32, %arg2: memref<1x16x16x4xf32, #tpu.memory_space<vmem>>, %arg3: memref<9x4x8xf32, #tpu.memory_space<vmem>>, %arg4: memref<1x8xf32, #tpu.memory_space<vmem>>, %arg5: memref<9x8x8xf32, #tpu.memory_space<vmem>>, %arg6: memref<1x8xf32, #tpu.memory_space<vmem>>, %arg7: memref<1x8x16x8xf32, #tpu.memory_space<vmem>>, %arg8: memref<12x18x4xf32, #tpu.memory_space<vmem>>, %arg9: memref<10x18x8xf32, #tpu.memory_space<vmem>>) attributes {dimension_semantics = [#tpu.dimension_semantics<parallel>, #tpu.dimension_semantics<parallel>], iteration_bounds = array<i64: 2, 2>, scalar_prefetch = 0 : i64, scratch_operands = 2 : i64, tpu.core_type = #tpu.core_type<tc>, window_params = [{transform_indices = @transform_0, window_bounds = array<i64: 1, 16, 16, 4>}, {pipeline_mode = #tpu.pipeline_mode<synchronous>, transform_indices = @transform_1, window_bounds = array<i64: 9, 4, 8>}, {pipeline_mode = #tpu.pipeline_mode<synchronous>, transform_indices = @transform_2, window_bounds = array<i64: 1, 8>}, {pipeline_mode = #tpu.pipeline_mode<synchronous>, transform_indices = @transform_3, window_bounds = array<i64: 9, 8, 8>}, {pipeline_mode = #tpu.pipeline_mode<synchronous>, transform_indices = @transform_4, window_bounds = array<i64: 1, 8>}, {transform_indices = @transform_5, window_bounds = array<i64: 1, 8, 16, 8>}]} {
    %c8_i32 = arith.constant 8 : i32
    %0 = arith.muli %arg1, %c8_i32 : i32
    %1 = tpu.assume_multiple %0, 8 : i32
    %c0 = arith.constant 0 : index
    %2 = arith.index_cast %1 : i32 to index
    %c0_0 = arith.constant 0 : index
    %c0_1 = arith.constant 0 : index
    %3 = vector.load %arg2[%c0, %2, %c0_0, %c0_1] : memref<1x16x16x4xf32, #tpu.memory_space<vmem>>, vector<1x8x16x4xf32>
    %4 = vector.shape_cast %3 : vector<1x8x16x4xf32> to vector<8x16x4xf32>
    %c2 = arith.constant 2 : index
    %c1 = arith.constant 1 : index
    %c0_2 = arith.constant 0 : index
    %5 = vector.load %arg8[%c2, %c1, %c0_2] : memref<12x18x4xf32, #tpu.memory_space<vmem>>, vector<8x16x4xf32>
    tpu.vector_store %arg8[%c2, %c1, %c0_2], %4 {strides = array<i32>} : memref<12x18x4xf32, #tpu.memory_space<vmem>>, vector<8x16x4xf32>,
    %cst = arith.constant 0.000000e+00 : f32
    %6 = vector.broadcast %cst : f32 to vector<12x1x4xf32>
    %c0_3 = arith.constant 0 : index
    %c0_4 = arith.constant 0 : index
    %c0_5 = arith.constant 0 : index
    %7 = vector.load %arg8[%c0_3, %c0_4, %c0_5] : memref<12x18x4xf32, #tpu.memory_space<vmem>>, vector<12x1x4xf32>
    tpu.vector_store %arg8[%c0_3, %c0_4, %c0_5], %6 {strides = array<i32>} : memref<12x18x4xf32, #tpu.memory_space<vmem>>, vector<12x1x4xf32>,
    %cst_6 = arith.constant 0.000000e+00 : f32
    %8 = vector.broadcast %cst_6 : f32 to vector<12x1x4xf32>
    %c0_7 = arith.constant 0 : index
    %c17 = arith.constant 17 : index
    %c0_8 = arith.constant 0 : index
    %9 = vector.load %arg8[%c0_7, %c17, %c0_8] : memref<12x18x4xf32, #tpu.memory_space<vmem>>, vector<12x1x4xf32>
    tpu.vector_store %arg8[%c0_7, %c17, %c0_8], %8 {strides = array<i32>} : memref<12x18x4xf32, #tpu.memory_space<vmem>>, vector<12x1x4xf32>,
    %c0_i32 = arith.constant 0 : i32
    %10 = arith.cmpi sgt, %arg1, %c0_i32 : i32
    %11 = arith.extui %10 : i1 to i32
    %c0_i32_9 = arith.constant 0 : i32
    %12 = arith.cmpi ne, %11, %c0_i32_9 : i32
    scf.if %12 {
      %c2_i32 = arith.constant 2 : i32
      %154 = arith.subi %1, %c2_i32 : i32
      %c0_160 = arith.constant 0 : index
      %155 = arith.index_cast %154 : i32 to index
      %c0_161 = arith.constant 0 : index
      %c0_162 = arith.constant 0 : index
      %156 = vector.load %arg2[%c0_160, %155, %c0_161, %c0_162] : memref<1x16x16x4xf32, #tpu.memory_space<vmem>>, vector<1x2x16x4xf32>
      %157 = vector.shape_cast %156 : vector<1x2x16x4xf32> to vector<2x16x4xf32>
      %c0_163 = arith.constant 0 : index
      %c1_164 = arith.constant 1 : index
      %c0_165 = arith.constant 0 : index
      %158 = vector.load %arg8[%c0_163, %c1_164, %c0_165] : memref<12x18x4xf32, #tpu.memory_space<vmem>>, vector<2x16x4xf32>
      tpu.vector_store %arg8[%c0_163, %c1_164, %c0_165], %157 {strides = array<i32>} : memref<12x18x4xf32, #tpu.memory_space<vmem>>, vector<2x16x4xf32>,
    } else {
    }
    %c0_i32_10 = arith.constant 0 : i32
    %13 = arith.cmpi eq, %arg1, %c0_i32_10 : i32
    %14 = arith.extui %13 : i1 to i32
    %c0_i32_11 = arith.constant 0 : i32
    %15 = arith.cmpi ne, %14, %c0_i32_11 : i32
    scf.if %15 {
      %cst_160 = arith.constant 0.000000e+00 : f32
      %154 = vector.broadcast %cst_160 : f32 to vector<2x18x4xf32>
      %c0_161 = arith.constant 0 : index
      %c0_162 = arith.constant 0 : index
      %c0_163 = arith.constant 0 : index
      %155 = vector.load %arg8[%c0_161, %c0_162, %c0_163] : memref<12x18x4xf32, #tpu.memory_space<vmem>>, vector<2x18x4xf32>
      tpu.vector_store %arg8[%c0_161, %c0_162, %c0_163], %154 {strides = array<i32>} : memref<12x18x4xf32, #tpu.memory_space<vmem>>, vector<2x18x4xf32>,
    } else {
    }
    %c1_i32 = arith.constant 1 : i32
    %16 = arith.cmpi slt, %arg1, %c1_i32 : i32
    %17 = arith.extui %16 : i1 to i32
    %c0_i32_12 = arith.constant 0 : i32
    %18 = arith.cmpi ne, %17, %c0_i32_12 : i32
    scf.if %18 {
      %c8_i32_160 = arith.constant 8 : i32
      %154 = arith.addi %1, %c8_i32_160 : i32
      %c0_161 = arith.constant 0 : index
      %155 = arith.index_cast %154 : i32 to index
      %c0_162 = arith.constant 0 : index
      %c0_163 = arith.constant 0 : index
      %156 = vector.load %arg2[%c0_161, %155, %c0_162, %c0_163] : memref<1x16x16x4xf32, #tpu.memory_space<vmem>>, vector<1x2x16x4xf32>
      %157 = vector.shape_cast %156 : vector<1x2x16x4xf32> to vector<2x16x4xf32>
      %c10 = arith.constant 10 : index
      %c1_164 = arith.constant 1 : index
      %c0_165 = arith.constant 0 : index
      %158 = vector.load %arg8[%c10, %c1_164, %c0_165] : memref<12x18x4xf32, #tpu.memory_space<vmem>>, vector<2x16x4xf32>
      tpu.vector_store %arg8[%c10, %c1_164, %c0_165], %157 {strides = array<i32>} : memref<12x18x4xf32, #tpu.memory_space<vmem>>, vector<2x16x4xf32>,
    } else {
    }
    %c1_i32_13 = arith.constant 1 : i32
    %19 = arith.cmpi eq, %arg1, %c1_i32_13 : i32
    %20 = arith.extui %19 : i1 to i32
    %c0_i32_14 = arith.constant 0 : i32
    %21 = arith.cmpi ne, %20, %c0_i32_14 : i32
    scf.if %21 {
      %cst_160 = arith.constant 0.000000e+00 : f32
      %154 = vector.broadcast %cst_160 : f32 to vector<2x18x4xf32>
      %c10 = arith.constant 10 : index
      %c0_161 = arith.constant 0 : index
      %c0_162 = arith.constant 0 : index
      %155 = vector.load %arg8[%c10, %c0_161, %c0_162] : memref<12x18x4xf32, #tpu.memory_space<vmem>>, vector<2x18x4xf32>
      tpu.vector_store %arg8[%c10, %c0_161, %c0_162], %154 {strides = array<i32>} : memref<12x18x4xf32, #tpu.memory_space<vmem>>, vector<2x18x4xf32>,
    } else {
    }
    %c0_15 = arith.constant 0 : index
    %c0_16 = arith.constant 0 : index
    %22 = vector.load %arg4[%c0_15, %c0_16] : memref<1x8xf32, #tpu.memory_space<vmem>>, vector<1x8xf32>
    %23 = vector.shape_cast %22 : vector<1x8xf32> to vector<1x8xf32>
    %24 = vector.broadcast %23 : vector<1x8xf32> to vector<160x8xf32>
    %c0_17 = arith.constant 0 : index
    %c0_18 = arith.constant 0 : index
    %c0_19 = arith.constant 0 : index
    %25 = vector.load %arg8[%c0_17, %c0_18, %c0_19] : memref<12x18x4xf32, #tpu.memory_space<vmem>>, vector<10x16x4xf32>
    %26 = vector.shape_cast %25 : vector<10x16x4xf32> to vector<160x4xf32>
    %c0_20 = arith.constant 0 : index
    %c0_21 = arith.constant 0 : index
    %c0_22 = arith.constant 0 : index
    %27 = vector.load %arg3[%c0_20, %c0_21, %c0_22] : memref<9x4x8xf32, #tpu.memory_space<vmem>>, vector<1x4x8xf32>
    %28 = vector.shape_cast %27 : vector<1x4x8xf32> to vector<4x8xf32>
    %cst_23 = arith.constant dense<0.000000e+00> : vector<160x8xf32>
    %29 = tpu.matmul %26, %28, %cst_23 {dimension_numbers = #tpu.dot_dimension_numbers<[1], [0], [0], [1], [0, 0, 1, 1], [], []>} : vector<160x4xf32>, vector<4x8xf32>, vector<160x8xf32> -> vector<160x8xf32>
    %30 = arith.addf %24, %29 : vector<160x8xf32>
    %c0_24 = arith.constant 0 : index
    %c1_25 = arith.constant 1 : index
    %c0_26 = arith.constant 0 : index
    %31 = vector.load %arg8[%c0_24, %c1_25, %c0_26] : memref<12x18x4xf32, #tpu.memory_space<vmem>>, vector<10x16x4xf32>
    %32 = vector.shape_cast %31 : vector<10x16x4xf32> to vector<160x4xf32>
    %c1_27 = arith.constant 1 : index
    %c0_28 = arith.constant 0 : index
    %c0_29 = arith.constant 0 : index
    %33 = vector.load %arg3[%c1_27, %c0_28, %c0_29] : memref<9x4x8xf32, #tpu.memory_space<vmem>>, vector<1x4x8xf32>
    %34 = vector.shape_cast %33 : vector<1x4x8xf32> to vector<4x8xf32>
    %cst_30 = arith.constant dense<0.000000e+00> : vector<160x8xf32>
    %35 = tpu.matmul %32, %34, %cst_30 {dimension_numbers = #tpu.dot_dimension_numbers<[1], [0], [0], [1], [0, 0, 1, 1], [], []>} : vector<160x4xf32>, vector<4x8xf32>, vector<160x8xf32> -> vector<160x8xf32>
    %36 = arith.addf %30, %35 : vector<160x8xf32>
    %c0_31 = arith.constant 0 : index
    %c2_32 = arith.constant 2 : index
    %c0_33 = arith.constant 0 : index
    %37 = vector.load %arg8[%c0_31, %c2_32, %c0_33] : memref<12x18x4xf32, #tpu.memory_space<vmem>>, vector<10x16x4xf32>
    %38 = vector.shape_cast %37 : vector<10x16x4xf32> to vector<160x4xf32>
    %c2_34 = arith.constant 2 : index
    %c0_35 = arith.constant 0 : index
    %c0_36 = arith.constant 0 : index
    %39 = vector.load %arg3[%c2_34, %c0_35, %c0_36] : memref<9x4x8xf32, #tpu.memory_space<vmem>>, vector<1x4x8xf32>
    %40 = vector.shape_cast %39 : vector<1x4x8xf32> to vector<4x8xf32>
    %cst_37 = arith.constant dense<0.000000e+00> : vector<160x8xf32>
    %41 = tpu.matmul %38, %40, %cst_37 {dimension_numbers = #tpu.dot_dimension_numbers<[1], [0], [0], [1], [0, 0, 1, 1], [], []>} : vector<160x4xf32>, vector<4x8xf32>, vector<160x8xf32> -> vector<160x8xf32>
    %42 = arith.addf %36, %41 : vector<160x8xf32>
    %c1_38 = arith.constant 1 : index
    %c0_39 = arith.constant 0 : index
    %c0_40 = arith.constant 0 : index
    %43 = vector.load %arg8[%c1_38, %c0_39, %c0_40] : memref<12x18x4xf32, #tpu.memory_space<vmem>>, vector<10x16x4xf32>
    %44 = vector.shape_cast %43 : vector<10x16x4xf32> to vector<160x4xf32>
    %c3 = arith.constant 3 : index
    %c0_41 = arith.constant 0 : index
    %c0_42 = arith.constant 0 : index
    %45 = vector.load %arg3[%c3, %c0_41, %c0_42] : memref<9x4x8xf32, #tpu.memory_space<vmem>>, vector<1x4x8xf32>
    %46 = vector.shape_cast %45 : vector<1x4x8xf32> to vector<4x8xf32>
    %cst_43 = arith.constant dense<0.000000e+00> : vector<160x8xf32>
    %47 = tpu.matmul %44, %46, %cst_43 {dimension_numbers = #tpu.dot_dimension_numbers<[1], [0], [0], [1], [0, 0, 1, 1], [], []>} : vector<160x4xf32>, vector<4x8xf32>, vector<160x8xf32> -> vector<160x8xf32>
    %48 = arith.addf %42, %47 : vector<160x8xf32>
    %c1_44 = arith.constant 1 : index
    %c1_45 = arith.constant 1 : index
    %c0_46 = arith.constant 0 : index
    %49 = vector.load %arg8[%c1_44, %c1_45, %c0_46] : memref<12x18x4xf32, #tpu.memory_space<vmem>>, vector<10x16x4xf32>
    %50 = vector.shape_cast %49 : vector<10x16x4xf32> to vector<160x4xf32>
    %c4 = arith.constant 4 : index
    %c0_47 = arith.constant 0 : index
    %c0_48 = arith.constant 0 : index
    %51 = vector.load %arg3[%c4, %c0_47, %c0_48] : memref<9x4x8xf32, #tpu.memory_space<vmem>>, vector<1x4x8xf32>
    %52 = vector.shape_cast %51 : vector<1x4x8xf32> to vector<4x8xf32>
    %cst_49 = arith.constant dense<0.000000e+00> : vector<160x8xf32>
    %53 = tpu.matmul %50, %52, %cst_49 {dimension_numbers = #tpu.dot_dimension_numbers<[1], [0], [0], [1], [0, 0, 1, 1], [], []>} : vector<160x4xf32>, vector<4x8xf32>, vector<160x8xf32> -> vector<160x8xf32>
    %54 = arith.addf %48, %53 : vector<160x8xf32>
    %c1_50 = arith.constant 1 : index
    %c2_51 = arith.constant 2 : index
    %c0_52 = arith.constant 0 : index
    %55 = vector.load %arg8[%c1_50, %c2_51, %c0_52] : memref<12x18x4xf32, #tpu.memory_space<vmem>>, vector<10x16x4xf32>
    %56 = vector.shape_cast %55 : vector<10x16x4xf32> to vector<160x4xf32>
    %c5 = arith.constant 5 : index
    %c0_53 = arith.constant 0 : index
    %c0_54 = arith.constant 0 : index
    %57 = vector.load %arg3[%c5, %c0_53, %c0_54] : memref<9x4x8xf32, #tpu.memory_space<vmem>>, vector<1x4x8xf32>
    %58 = vector.shape_cast %57 : vector<1x4x8xf32> to vector<4x8xf32>
    %cst_55 = arith.constant dense<0.000000e+00> : vector<160x8xf32>
    %59 = tpu.matmul %56, %58, %cst_55 {dimension_numbers = #tpu.dot_dimension_numbers<[1], [0], [0], [1], [0, 0, 1, 1], [], []>} : vector<160x4xf32>, vector<4x8xf32>, vector<160x8xf32> -> vector<160x8xf32>
    %60 = arith.addf %54, %59 : vector<160x8xf32>
    %c2_56 = arith.constant 2 : index
    %c0_57 = arith.constant 0 : index
    %c0_58 = arith.constant 0 : index
    %61 = vector.load %arg8[%c2_56, %c0_57, %c0_58] : memref<12x18x4xf32, #tpu.memory_space<vmem>>, vector<10x16x4xf32>
    %62 = vector.shape_cast %61 : vector<10x16x4xf32> to vector<160x4xf32>
    %c6 = arith.constant 6 : index
    %c0_59 = arith.constant 0 : index
    %c0_60 = arith.constant 0 : index
    %63 = vector.load %arg3[%c6, %c0_59, %c0_60] : memref<9x4x8xf32, #tpu.memory_space<vmem>>, vector<1x4x8xf32>
    %64 = vector.shape_cast %63 : vector<1x4x8xf32> to vector<4x8xf32>
    %cst_61 = arith.constant dense<0.000000e+00> : vector<160x8xf32>
    %65 = tpu.matmul %62, %64, %cst_61 {dimension_numbers = #tpu.dot_dimension_numbers<[1], [0], [0], [1], [0, 0, 1, 1], [], []>} : vector<160x4xf32>, vector<4x8xf32>, vector<160x8xf32> -> vector<160x8xf32>
    %66 = arith.addf %60, %65 : vector<160x8xf32>
    %c2_62 = arith.constant 2 : index
    %c1_63 = arith.constant 1 : index
    %c0_64 = arith.constant 0 : index
    %67 = vector.load %arg8[%c2_62, %c1_63, %c0_64] : memref<12x18x4xf32, #tpu.memory_space<vmem>>, vector<10x16x4xf32>
    %68 = vector.shape_cast %67 : vector<10x16x4xf32> to vector<160x4xf32>
    %c7 = arith.constant 7 : index
    %c0_65 = arith.constant 0 : index
    %c0_66 = arith.constant 0 : index
    %69 = vector.load %arg3[%c7, %c0_65, %c0_66] : memref<9x4x8xf32, #tpu.memory_space<vmem>>, vector<1x4x8xf32>
    %70 = vector.shape_cast %69 : vector<1x4x8xf32> to vector<4x8xf32>
    %cst_67 = arith.constant dense<0.000000e+00> : vector<160x8xf32>
    %71 = tpu.matmul %68, %70, %cst_67 {dimension_numbers = #tpu.dot_dimension_numbers<[1], [0], [0], [1], [0, 0, 1, 1], [], []>} : vector<160x4xf32>, vector<4x8xf32>, vector<160x8xf32> -> vector<160x8xf32>
    %72 = arith.addf %66, %71 : vector<160x8xf32>
    %c2_68 = arith.constant 2 : index
    %c2_69 = arith.constant 2 : index
    %c0_70 = arith.constant 0 : index
    %73 = vector.load %arg8[%c2_68, %c2_69, %c0_70] : memref<12x18x4xf32, #tpu.memory_space<vmem>>, vector<10x16x4xf32>
    %74 = vector.shape_cast %73 : vector<10x16x4xf32> to vector<160x4xf32>
    %c8 = arith.constant 8 : index
    %c0_71 = arith.constant 0 : index
    %c0_72 = arith.constant 0 : index
    %75 = vector.load %arg3[%c8, %c0_71, %c0_72] : memref<9x4x8xf32, #tpu.memory_space<vmem>>, vector<1x4x8xf32>
    %76 = vector.shape_cast %75 : vector<1x4x8xf32> to vector<4x8xf32>
    %cst_73 = arith.constant dense<0.000000e+00> : vector<160x8xf32>
    %77 = tpu.matmul %74, %76, %cst_73 {dimension_numbers = #tpu.dot_dimension_numbers<[1], [0], [0], [1], [0, 0, 1, 1], [], []>} : vector<160x4xf32>, vector<4x8xf32>, vector<160x8xf32> -> vector<160x8xf32>
    %78 = arith.addf %72, %77 : vector<160x8xf32>
    %cst_74 = arith.constant 0.000000e+00 : f32
    %79 = vector.broadcast %cst_74 : f32 to vector<160x8xf32>
    %80 = arith.maximumf %78, %79 : vector<160x8xf32>
    %81 = vector.shape_cast %80 : vector<160x8xf32> to vector<10x16x8xf32>
    %c0_75 = arith.constant 0 : index
    %c1_76 = arith.constant 1 : index
    %c0_77 = arith.constant 0 : index
    %82 = vector.load %arg9[%c0_75, %c1_76, %c0_77] : memref<10x18x8xf32, #tpu.memory_space<vmem>>, vector<10x16x8xf32>
    tpu.vector_store %arg9[%c0_75, %c1_76, %c0_77], %81 {strides = array<i32>} : memref<10x18x8xf32, #tpu.memory_space<vmem>>, vector<10x16x8xf32>,
    %cst_78 = arith.constant 0.000000e+00 : f32
    %83 = vector.broadcast %cst_78 : f32 to vector<10x1x8xf32>
    %c0_79 = arith.constant 0 : index
    %c0_80 = arith.constant 0 : index
    %c0_81 = arith.constant 0 : index
    %84 = vector.load %arg9[%c0_79, %c0_80, %c0_81] : memref<10x18x8xf32, #tpu.memory_space<vmem>>, vector<10x1x8xf32>
    tpu.vector_store %arg9[%c0_79, %c0_80, %c0_81], %83 {strides = array<i32>} : memref<10x18x8xf32, #tpu.memory_space<vmem>>, vector<10x1x8xf32>,
    %cst_82 = arith.constant 0.000000e+00 : f32
    %85 = vector.broadcast %cst_82 : f32 to vector<10x1x8xf32>
    %c0_83 = arith.constant 0 : index
    %c17_84 = arith.constant 17 : index
    %c0_85 = arith.constant 0 : index
    %86 = vector.load %arg9[%c0_83, %c17_84, %c0_85] : memref<10x18x8xf32, #tpu.memory_space<vmem>>, vector<10x1x8xf32>
    tpu.vector_store %arg9[%c0_83, %c17_84, %c0_85], %85 {strides = array<i32>} : memref<10x18x8xf32, #tpu.memory_space<vmem>>, vector<10x1x8xf32>,
    %c0_i32_86 = arith.constant 0 : i32
    %87 = arith.cmpi eq, %arg1, %c0_i32_86 : i32
    %88 = arith.extui %87 : i1 to i32
    %c0_i32_87 = arith.constant 0 : i32
    %89 = arith.cmpi ne, %88, %c0_i32_87 : i32
    scf.if %89 {
      %cst_160 = arith.constant 0.000000e+00 : f32
      %154 = vector.broadcast %cst_160 : f32 to vector<1x18x8xf32>
      %c0_161 = arith.constant 0 : index
      %c0_162 = arith.constant 0 : index
      %c0_163 = arith.constant 0 : index
      %155 = vector.load %arg9[%c0_161, %c0_162, %c0_163] : memref<10x18x8xf32, #tpu.memory_space<vmem>>, vector<1x18x8xf32>
      tpu.vector_store %arg9[%c0_161, %c0_162, %c0_163], %154 {strides = array<i32>} : memref<10x18x8xf32, #tpu.memory_space<vmem>>, vector<1x18x8xf32>,
    } else {
    }
    %c1_i32_88 = arith.constant 1 : i32
    %90 = arith.cmpi eq, %arg1, %c1_i32_88 : i32
    %91 = arith.extui %90 : i1 to i32
    %c0_i32_89 = arith.constant 0 : i32
    %92 = arith.cmpi ne, %91, %c0_i32_89 : i32
    scf.if %92 {
      %cst_160 = arith.constant 0.000000e+00 : f32
      %154 = vector.broadcast %cst_160 : f32 to vector<1x18x8xf32>
      %c9 = arith.constant 9 : index
      %c0_161 = arith.constant 0 : index
      %c0_162 = arith.constant 0 : index
      %155 = vector.load %arg9[%c9, %c0_161, %c0_162] : memref<10x18x8xf32, #tpu.memory_space<vmem>>, vector<1x18x8xf32>
      tpu.vector_store %arg9[%c9, %c0_161, %c0_162], %154 {strides = array<i32>} : memref<10x18x8xf32, #tpu.memory_space<vmem>>, vector<1x18x8xf32>,
    } else {
    }
    %c0_90 = arith.constant 0 : index
    %c0_91 = arith.constant 0 : index
    %93 = vector.load %arg6[%c0_90, %c0_91] : memref<1x8xf32, #tpu.memory_space<vmem>>, vector<1x8xf32>
    %94 = vector.shape_cast %93 : vector<1x8xf32> to vector<1x8xf32>
    %95 = vector.broadcast %94 : vector<1x8xf32> to vector<128x8xf32>
    %c0_92 = arith.constant 0 : index
    %c0_93 = arith.constant 0 : index
    %c0_94 = arith.constant 0 : index
    %96 = vector.load %arg9[%c0_92, %c0_93, %c0_94] : memref<10x18x8xf32, #tpu.memory_space<vmem>>, vector<8x16x8xf32>
    %97 = vector.shape_cast %96 : vector<8x16x8xf32> to vector<128x8xf32>
    %c0_95 = arith.constant 0 : index
    %c0_96 = arith.constant 0 : index
    %c0_97 = arith.constant 0 : index
    %98 = vector.load %arg5[%c0_95, %c0_96, %c0_97] : memref<9x8x8xf32, #tpu.memory_space<vmem>>, vector<1x8x8xf32>
    %99 = vector.shape_cast %98 : vector<1x8x8xf32> to vector<8x8xf32>
    %cst_98 = arith.constant dense<0.000000e+00> : vector<128x8xf32>
    %100 = tpu.matmul %97, %99, %cst_98 {dimension_numbers = #tpu.dot_dimension_numbers<[1], [0], [0], [1], [0, 0, 1, 1], [], []>} : vector<128x8xf32>, vector<8x8xf32>, vector<128x8xf32> -> vector<128x8xf32>
    %101 = arith.addf %95, %100 : vector<128x8xf32>
    %c0_99 = arith.constant 0 : index
    %c1_100 = arith.constant 1 : index
    %c0_101 = arith.constant 0 : index
    %102 = vector.load %arg9[%c0_99, %c1_100, %c0_101] : memref<10x18x8xf32, #tpu.memory_space<vmem>>, vector<8x16x8xf32>
    %103 = vector.shape_cast %102 : vector<8x16x8xf32> to vector<128x8xf32>
    %c1_102 = arith.constant 1 : index
    %c0_103 = arith.constant 0 : index
    %c0_104 = arith.constant 0 : index
    %104 = vector.load %arg5[%c1_102, %c0_103, %c0_104] : memref<9x8x8xf32, #tpu.memory_space<vmem>>, vector<1x8x8xf32>
    %105 = vector.shape_cast %104 : vector<1x8x8xf32> to vector<8x8xf32>
    %cst_105 = arith.constant dense<0.000000e+00> : vector<128x8xf32>
    %106 = tpu.matmul %103, %105, %cst_105 {dimension_numbers = #tpu.dot_dimension_numbers<[1], [0], [0], [1], [0, 0, 1, 1], [], []>} : vector<128x8xf32>, vector<8x8xf32>, vector<128x8xf32> -> vector<128x8xf32>
    %107 = arith.addf %101, %106 : vector<128x8xf32>
    %c0_106 = arith.constant 0 : index
    %c2_107 = arith.constant 2 : index
    %c0_108 = arith.constant 0 : index
    %108 = vector.load %arg9[%c0_106, %c2_107, %c0_108] : memref<10x18x8xf32, #tpu.memory_space<vmem>>, vector<8x16x8xf32>
    %109 = vector.shape_cast %108 : vector<8x16x8xf32> to vector<128x8xf32>
    %c2_109 = arith.constant 2 : index
    %c0_110 = arith.constant 0 : index
    %c0_111 = arith.constant 0 : index
    %110 = vector.load %arg5[%c2_109, %c0_110, %c0_111] : memref<9x8x8xf32, #tpu.memory_space<vmem>>, vector<1x8x8xf32>
    %111 = vector.shape_cast %110 : vector<1x8x8xf32> to vector<8x8xf32>
    %cst_112 = arith.constant dense<0.000000e+00> : vector<128x8xf32>
    %112 = tpu.matmul %109, %111, %cst_112 {dimension_numbers = #tpu.dot_dimension_numbers<[1], [0], [0], [1], [0, 0, 1, 1], [], []>} : vector<128x8xf32>, vector<8x8xf32>, vector<128x8xf32> -> vector<128x8xf32>
    %113 = arith.addf %107, %112 : vector<128x8xf32>
    %c1_113 = arith.constant 1 : index
    %c0_114 = arith.constant 0 : index
    %c0_115 = arith.constant 0 : index
    %114 = vector.load %arg9[%c1_113, %c0_114, %c0_115] : memref<10x18x8xf32, #tpu.memory_space<vmem>>, vector<8x16x8xf32>
    %115 = vector.shape_cast %114 : vector<8x16x8xf32> to vector<128x8xf32>
    %c3_116 = arith.constant 3 : index
    %c0_117 = arith.constant 0 : index
    %c0_118 = arith.constant 0 : index
    %116 = vector.load %arg5[%c3_116, %c0_117, %c0_118] : memref<9x8x8xf32, #tpu.memory_space<vmem>>, vector<1x8x8xf32>
    %117 = vector.shape_cast %116 : vector<1x8x8xf32> to vector<8x8xf32>
    %cst_119 = arith.constant dense<0.000000e+00> : vector<128x8xf32>
    %118 = tpu.matmul %115, %117, %cst_119 {dimension_numbers = #tpu.dot_dimension_numbers<[1], [0], [0], [1], [0, 0, 1, 1], [], []>} : vector<128x8xf32>, vector<8x8xf32>, vector<128x8xf32> -> vector<128x8xf32>
    %119 = arith.addf %113, %118 : vector<128x8xf32>
    %c1_120 = arith.constant 1 : index
    %c1_121 = arith.constant 1 : index
    %c0_122 = arith.constant 0 : index
    %120 = vector.load %arg9[%c1_120, %c1_121, %c0_122] : memref<10x18x8xf32, #tpu.memory_space<vmem>>, vector<8x16x8xf32>
    %121 = vector.shape_cast %120 : vector<8x16x8xf32> to vector<128x8xf32>
    %c4_123 = arith.constant 4 : index
    %c0_124 = arith.constant 0 : index
    %c0_125 = arith.constant 0 : index
    %122 = vector.load %arg5[%c4_123, %c0_124, %c0_125] : memref<9x8x8xf32, #tpu.memory_space<vmem>>, vector<1x8x8xf32>
    %123 = vector.shape_cast %122 : vector<1x8x8xf32> to vector<8x8xf32>
    %cst_126 = arith.constant dense<0.000000e+00> : vector<128x8xf32>
    %124 = tpu.matmul %121, %123, %cst_126 {dimension_numbers = #tpu.dot_dimension_numbers<[1], [0], [0], [1], [0, 0, 1, 1], [], []>} : vector<128x8xf32>, vector<8x8xf32>, vector<128x8xf32> -> vector<128x8xf32>
    %125 = arith.addf %119, %124 : vector<128x8xf32>
    %c1_127 = arith.constant 1 : index
    %c2_128 = arith.constant 2 : index
    %c0_129 = arith.constant 0 : index
    %126 = vector.load %arg9[%c1_127, %c2_128, %c0_129] : memref<10x18x8xf32, #tpu.memory_space<vmem>>, vector<8x16x8xf32>
    %127 = vector.shape_cast %126 : vector<8x16x8xf32> to vector<128x8xf32>
    %c5_130 = arith.constant 5 : index
    %c0_131 = arith.constant 0 : index
    %c0_132 = arith.constant 0 : index
    %128 = vector.load %arg5[%c5_130, %c0_131, %c0_132] : memref<9x8x8xf32, #tpu.memory_space<vmem>>, vector<1x8x8xf32>
    %129 = vector.shape_cast %128 : vector<1x8x8xf32> to vector<8x8xf32>
    %cst_133 = arith.constant dense<0.000000e+00> : vector<128x8xf32>
    %130 = tpu.matmul %127, %129, %cst_133 {dimension_numbers = #tpu.dot_dimension_numbers<[1], [0], [0], [1], [0, 0, 1, 1], [], []>} : vector<128x8xf32>, vector<8x8xf32>, vector<128x8xf32> -> vector<128x8xf32>
    %131 = arith.addf %125, %130 : vector<128x8xf32>
    %c2_134 = arith.constant 2 : index
    %c0_135 = arith.constant 0 : index
    %c0_136 = arith.constant 0 : index
    %132 = vector.load %arg9[%c2_134, %c0_135, %c0_136] : memref<10x18x8xf32, #tpu.memory_space<vmem>>, vector<8x16x8xf32>
    %133 = vector.shape_cast %132 : vector<8x16x8xf32> to vector<128x8xf32>
    %c6_137 = arith.constant 6 : index
    %c0_138 = arith.constant 0 : index
    %c0_139 = arith.constant 0 : index
    %134 = vector.load %arg5[%c6_137, %c0_138, %c0_139] : memref<9x8x8xf32, #tpu.memory_space<vmem>>, vector<1x8x8xf32>
    %135 = vector.shape_cast %134 : vector<1x8x8xf32> to vector<8x8xf32>
    %cst_140 = arith.constant dense<0.000000e+00> : vector<128x8xf32>
    %136 = tpu.matmul %133, %135, %cst_140 {dimension_numbers = #tpu.dot_dimension_numbers<[1], [0], [0], [1], [0, 0, 1, 1], [], []>} : vector<128x8xf32>, vector<8x8xf32>, vector<128x8xf32> -> vector<128x8xf32>
    %137 = arith.addf %131, %136 : vector<128x8xf32>
    %c2_141 = arith.constant 2 : index
    %c1_142 = arith.constant 1 : index
    %c0_143 = arith.constant 0 : index
    %138 = vector.load %arg9[%c2_141, %c1_142, %c0_143] : memref<10x18x8xf32, #tpu.memory_space<vmem>>, vector<8x16x8xf32>
    %139 = vector.shape_cast %138 : vector<8x16x8xf32> to vector<128x8xf32>
    %c7_144 = arith.constant 7 : index
    %c0_145 = arith.constant 0 : index
    %c0_146 = arith.constant 0 : index
    %140 = vector.load %arg5[%c7_144, %c0_145, %c0_146] : memref<9x8x8xf32, #tpu.memory_space<vmem>>, vector<1x8x8xf32>
    %141 = vector.shape_cast %140 : vector<1x8x8xf32> to vector<8x8xf32>
    %cst_147 = arith.constant dense<0.000000e+00> : vector<128x8xf32>
    %142 = tpu.matmul %139, %141, %cst_147 {dimension_numbers = #tpu.dot_dimension_numbers<[1], [0], [0], [1], [0, 0, 1, 1], [], []>} : vector<128x8xf32>, vector<8x8xf32>, vector<128x8xf32> -> vector<128x8xf32>
    %143 = arith.addf %137, %142 : vector<128x8xf32>
    %c2_148 = arith.constant 2 : index
    %c2_149 = arith.constant 2 : index
    %c0_150 = arith.constant 0 : index
    %144 = vector.load %arg9[%c2_148, %c2_149, %c0_150] : memref<10x18x8xf32, #tpu.memory_space<vmem>>, vector<8x16x8xf32>
    %145 = vector.shape_cast %144 : vector<8x16x8xf32> to vector<128x8xf32>
    %c8_151 = arith.constant 8 : index
    %c0_152 = arith.constant 0 : index
    %c0_153 = arith.constant 0 : index
    %146 = vector.load %arg5[%c8_151, %c0_152, %c0_153] : memref<9x8x8xf32, #tpu.memory_space<vmem>>, vector<1x8x8xf32>
    %147 = vector.shape_cast %146 : vector<1x8x8xf32> to vector<8x8xf32>
    %cst_154 = arith.constant dense<0.000000e+00> : vector<128x8xf32>
    %148 = tpu.matmul %145, %147, %cst_154 {dimension_numbers = #tpu.dot_dimension_numbers<[1], [0], [0], [1], [0, 0, 1, 1], [], []>} : vector<128x8xf32>, vector<8x8xf32>, vector<128x8xf32> -> vector<128x8xf32>
    %149 = arith.addf %143, %148 : vector<128x8xf32>
    %cst_155 = arith.constant 0.000000e+00 : f32
    %150 = vector.broadcast %cst_155 : f32 to vector<128x8xf32>
    %151 = arith.maximumf %149, %150 : vector<128x8xf32>
    %152 = vector.shape_cast %151 : vector<128x8xf32> to vector<1x8x16x8xf32>
    %c0_156 = arith.constant 0 : index
    %c0_157 = arith.constant 0 : index
    %c0_158 = arith.constant 0 : index
    %c0_159 = arith.constant 0 : index
    %153 = vector.load %arg7[%c0_156, %c0_157, %c0_158, %c0_159] : memref<1x8x16x8xf32, #tpu.memory_space<vmem>>, vector<1x8x16x8xf32>
    tpu.vector_store %arg7[%c0_156, %c0_157, %c0_158, %c0_159], %152 {strides = array<i32>} : memref<1x8x16x8xf32, #tpu.memory_space<vmem>>, vector<1x8x16x8xf32>,
    return
  }
  func.func @transform_0(%arg0: i32, %arg1: i32) -> (i32, i32, i32, i32) {
    %c0_i32 = arith.constant 0 : i32
    %c0_i32_0 = arith.constant 0 : i32
    %c0_i32_1 = arith.constant 0 : i32
    %c0_i32_2 = arith.constant 0 : i32
    return %arg0, %c0_i32, %c0_i32_0, %c0_i32_1 : i32, i32, i32, i32
  }
  func.func @transform_1(%arg0: i32, %arg1: i32) -> (i32, i32, i32) {
    %c0_i32 = arith.constant 0 : i32
    %c0_i32_0 = arith.constant 0 : i32
    %c0_i32_1 = arith.constant 0 : i32
    %c0_i32_2 = arith.constant 0 : i32
    return %c0_i32, %c0_i32_0, %c0_i32_1 : i32, i32, i32
  }
  func.func @transform_2(%arg0: i32, %arg1: i32) -> (i32, i32) {
    %c0_i32 = arith.constant 0 : i32
    %c0_i32_0 = arith.constant 0 : i32
    %c0_i32_1 = arith.constant 0 : i32
    return %c0_i32, %c0_i32_0 : i32, i32
  }
  func.func @transform_3(%arg0: i32, %arg1: i32) -> (i32, i32, i32) {
    %c0_i32 = arith.constant 0 : i32
    %c0_i32_0 = arith.constant 0 : i32
    %c0_i32_1 = arith.constant 0 : i32
    %c0_i32_2 = arith.constant 0 : i32
    return %c0_i32, %c0_i32_0, %c0_i32_1 : i32, i32, i32
  }
  func.func @transform_4(%arg0: i32, %arg1: i32) -> (i32, i32) {
    %c0_i32 = arith.constant 0 : i32
    %c0_i32_0 = arith.constant 0 : i32
    %c0_i32_1 = arith.constant 0 : i32
    return %c0_i32, %c0_i32_0 : i32, i32
  }
  func.func @transform_5(%arg0: i32, %arg1: i32) -> (i32, i32, i32, i32) {
    %c0_i32 = arith.constant 0 : i32
    %c0_i32_0 = arith.constant 0 : i32
    %c0_i32_1 = arith.constant 0 : i32
    return %arg0, %arg1, %c0_i32, %c0_i32_0 : i32, i32, i32, i32
  }
}

</mosaic_0001>

<bundles_post_ra>
// kernel: unet_conv_forward_nchw.1
= control target key start
LH: loop header
LB: loop body
LE: loop exit
PB: predicated region body
PF: predicated region fallthrough
CT: control target
= control target key end

     0   :  { %s4050_s18 = smov 0   ;;  %s4052_s19 = smov 0   ;;  %s5629_s0 = inlined_call_operand.vmem [shape: f32[2,16,16,4], index: 0, kind: input, shape index: {}]   ;;  %s5630_s1 = inlined_call_operand.vmem [shape: f32[9,4,8], index: 1, kind: input, shape index: {}]   ;;  %s5631_s2 = inlined_call_operand.vmem [shape: f32[1,8], index: 2, kind: input, shape index: {}]   ;;  %s5632_s3 = inlined_call_operand.vmem [shape: f32[9,8,8], index: 3, kind: input, shape index: {}]   ;;  %s5633_s4 = inlined_call_operand.vmem [shape: f32[1,8], index: 4, kind: input, shape index: {}]   ;;  %s5634_s5 = inlined_call_operand.vmem [shape: f32[2,16,16,8], index: 5, kind: output, shape index: {}]  }
   0x1   :  { %s4054_s20 = smov 0   ;;  %s4056_s21 = smov 0  }
   0x2   :  { %s4058_s22 = smov 0  }
   0x3 LB: > { %s24_s23 = sadd.s32 1, %s4005_s20  ;;  %s27_s24 = sadd.s32 1, %s4009_s21  ;;  %s4013_s22 = sphi %s4058_s22, %s15_s22   ;;  %s4009_s21 = sphi %s4056_s21, %s5715_s21   ;;  %s4005_s20 = sphi %s4054_s20, %s5714_s20   ;;  %s4001_s19 = sphi %s4052_s19, %s5713_s19   ;;  %s3997_s18 = sphi %s4050_s18, %s5712_s18  }
   0x4   : > { %p25_p0 = scmp.ge.s32.totalorder %s24_s23, 2  ;;  %p3548_p1 = scmp.ge.s32.totalorder %s4013_s22, 1 }
   0x5   : > { %p201_p2 = scmp.lt.s32.totalorder %s4013_s22, 5 }
   0x6   : > { %s5717_s23 = smov (%p25_p0, %s24_s23), 0  ;;  %s5719_s24 = smov (!%p25_p0, %s27_s24), %s4009_s21 }
   0x7   : > { %p202_p3 = pnand %p3548_p1, %p201_p2  ;;  %p29_p4 = scmp.ge.s32.totalorder %s5719_s24, 2 }
   0x9   : > { %s5721_s24 = smov (%p29_p4, %s5719_s24), 0  ;;  %205 = sbr.rel (%p202_p3) target bundleno = 1274 (0x4fa), region = 40 }
   0xe   : > { %p234_p5 = scmp.lt.s32.totalorder %s4001_s19, 1  ;;  %s4083_s25 = sshll.u32 %s3997_s18, 3  ;;  %vm287_vm0 = vcmask 24576   ;;  %v5635_v0 = vmov 0.0   ;;  %vm270_vm1 = vcmask 31744  }
   0xf   : > { %p242_p6 = scmp.lt.s32.totalorder %s4083_s25, 15  ;;  %s3923_s26 = sshll.u32 %s3997_s18, 7  ;;  %288 = vst.msk [vmem:[#allocation2] sm:$0x1] %vm287_vm0, %v5635_v0 }
  0x10   : > { %s5723_s19 = smov (!%p234_p5, %s4001_s19), 1  ;;  %289 = vst.msk [vmem:[#allocation2 + $0x18] sm:$0x1] %vm287_vm0, %v5635_v0  ;;  %p3557_p7 = scmp.le.s32.totalorder %s3997_s18, 0 }
  0x11   : > { %s243_s27 = scalar_select %p242_p6, %s4083_s25, 15  ;;  %290 = vst.msk [vmem:[#allocation2 + $0x30] sm:$0x1] %vm287_vm0, %v5635_v0 }
  0x12   : > { %s3922_s28 = sshll.u32 %s5723_s19, 8  ;;  %s3553_s29 = sshll.u32 %s5723_s19, 5  ;;  %291 = vst.msk [vmem:[#allocation2 + $0x48] sm:$0x1] %vm287_vm0, %v5635_v0 }
  0x13   : > { %s4099_s7 = scalar_lea.vmem %s5629_s0, %s3922_s28  ;;  %s3552_s8 = sshll.u32 %s243_s27, 1  ;;  %292 = vst.msk [vmem:[#allocation2 + $0x60] sm:$0x1] %vm287_vm0, %v5635_v0 }
  0x14   : > { %s246_s9 = sadd.s32 %s3553_s29, %s3552_s8  ;;  %s4104_s10 = scalar_lea.vmem %s4099_s7, %s3923_s26  ;;  %293 = vst.msk [vmem:[#allocation2 + $0x78] sm:$0x1] %vm287_vm0, %v5635_v0 }
  0x15   : > { %s3554_s11 = sshll.u32 %s246_s9, 3  ;;  %v253_v1 = vld [vmem:[%s4104_s10] sm:$0xff]  ;;  %v254_v2 = vld [vmem:[%s4104_s10 + $0x8] sm:$0xff]  ;;  %v255_v3 = vld [vmem:[%s4104_s10 + $0x10] sm:$0xff]  ;;  %294 = vst.msk [vmem:[#allocation2 + $0x90] sm:$0x1] %vm287_vm0, %v5635_v0 }
  0x16   : > { %s4116_s14 = scalar_lea.vmem %s5634_s5, %s3554_s11  ;;  %271 = vst.msk [vmem:[#allocation2 + $0x31] sm:$0xff] %vm270_vm1, %v253_v1  ;;  %v256_v4 = vld [vmem:[%s4104_s10 + $0x18] sm:$0xff]  ;;  %v257_v5 = vld [vmem:[%s4104_s10 + $0x20] sm:$0xff]  ;;  %v258_v6 = vld [vmem:[%s4104_s10 + $0x28] sm:$0xff]  ;;  %s3558_s15 = sadd.s32 (!%p3557_p7), 4294967294, %s4083_s25 }
  0x17   : > { %272 = vst.msk [vmem:[#allocation2 + $0x39] sm:$0xff] %vm270_vm1, %v254_v2  ;;  %v259_v7 = vld [vmem:[%s4104_s10 + $0x30] sm:$0xff]  ;;  %v260_v8 = vld [vmem:[%s4104_s10 + $0x38] sm:$0xff]  ;;  %v261_v9 = vld [vmem:[%s4104_s10 + $0x40] sm:$0xff]  ;;  %s3559_s16 = sshll.u32 (!%p3557_p7), %s3558_s15, 4 }
  0x18   : > { %273 = vst.msk [vmem:[#allocation2 + $0x49] sm:$0xff] %vm270_vm1, %v255_v3  ;;  %v262_v10 = vld [vmem:[%s4104_s10 + $0x48] sm:$0xff]  ;;  %v263_v11 = vld [vmem:[%s4104_s10 + $0x50] sm:$0xff]  ;;  %v264_v12 = vld [vmem:[%s4104_s10 + $0x58] sm:$0xff]  ;;  %s318_s17 = scalar_lea.vmem (!%p3557_p7), %s4099_s7, %s3559_s16 }
  0x19   : > { %274 = vst.msk [vmem:[#allocation2 + $0x51] sm:$0xff] %vm270_vm1, %v256_v4  ;;  %v265_v13 = vld [vmem:[%s4104_s10 + $0x60] sm:$0xff]  ;;  %v266_v14 = vld [vmem:[%s4104_s10 + $0x68] sm:$0xff]  ;;  %v267_v15 = vld [vmem:[%s4104_s10 + $0x70] sm:$0xff] }
  0x1a   : > { %275 = vst.msk [vmem:[#allocation2 + $0x61] sm:$0xff] %vm270_vm1, %v257_v5  ;;  %v268_v16 = vld [vmem:[%s4104_s10 + $0x78] sm:$0xff] }
  0x1b   : > { %276 = vst.msk [vmem:[#allocation2 + $0x69] sm:$0xff] %vm270_vm1, %v258_v6 }
  0x1c   : > { %277 = vst.msk [vmem:[#allocation2 + $0x79] sm:$0xff] %vm270_vm1, %v259_v7 }
  0x1d   : > { %278 = vst.msk [vmem:[#allocation2 + $0x81] sm:$0xff] %vm270_vm1, %v260_v8 }
  0x1e   : > { %279 = vst.msk [vmem:[#allocation2 + $0x91] sm:$0xff] %vm270_vm1, %v261_v9 }
  0x1f   : > { %280 = vst.msk [vmem:[#allocation2 + $0x99] sm:$0xff] %vm270_vm1, %v262_v10 }
  0x20   : > { %281 = vst.msk [vmem:[#allocation2 + $0xa9] sm:$0xff] %vm270_vm1, %v263_v11 }
  0x21   : > { %282 = vst.msk [vmem:[#allocation2 + $0xb1] sm:$0xff] %vm270_vm1, %v264_v12 }
  0x22   : > { %283 = vst.msk [vmem:[#allocation2 + $0xc1] sm:$0xff] %vm270_vm1, %v265_v13 }
  0x23   : > { %284 = vst.msk [vmem:[#allocation2 + $0xc9] sm:$0xff] %vm270_vm1, %v266_v14 }
  0x24   : > { %285 = vst.msk [vmem:[#allocation2 + $0xd9] sm:$0xff] %vm270_vm1, %v267_v15 }
  0x25   : > { %286 = vst.msk [vmem:[#allocation2 + $0xe1] sm:$0xff] %vm270_vm1, %v268_v16 }
  0x26   : > { %295 = vst.msk [vmem:[#allocation2 + $0xa8] sm:$0x1] %vm287_vm0, %v5635_v0 }
  0x27   : > { %296 = vst.msk [vmem:[#allocation2 + $0xc0] sm:$0x1] %vm287_vm0, %v5635_v0 }
  0x28   : > { %297 = vst.msk [vmem:[#allocation2 + $0xd8] sm:$0x1] %vm287_vm0, %v5635_v0 }
  0x29   : > { %298 = vst.msk [vmem:[#allocation2 + $0xf0] sm:$0x1] %vm287_vm0, %v5635_v0 }
  0x2a   : > { %299 = vst.msk [vmem:[#allocation2 + $0x108] sm:$0x1] %vm287_vm0, %v5635_v0 }
  0x2b   : > { %300 = vst.msk [vmem:[#allocation2 + $0x11] sm:$0x1] %vm287_vm0, %v5635_v0 }
  0x2c   : > { %301 = vst.msk [vmem:[#allocation2 + $0x29] sm:$0x1] %vm287_vm0, %v5635_v0 }
  0x2d   : > { %302 = vst.msk [vmem:[#allocation2 + $0x41] sm:$0x1] %vm287_vm0, %v5635_v0 }
  0x2e   : > { %303 = vst.msk [vmem:[#allocation2 + $0x59] sm:$0x1] %vm287_vm0, %v5635_v0 }
  0x2f   : > { %304 = vst.msk [vmem:[#allocation2 + $0x71] sm:$0x1] %vm287_vm0, %v5635_v0 }
  0x30   : > { %305 = vst.msk [vmem:[#allocation2 + $0x89] sm:$0x1] %vm287_vm0, %v5635_v0 }
  0x31   : > { %306 = vst.msk [vmem:[#allocation2 + $0xa1] sm:$0x1] %vm287_vm0, %v5635_v0 }
  0x32   : > { %307 = vst.msk [vmem:[#allocation2 + $0xb9] sm:$0x1] %vm287_vm0, %v5635_v0  ;;  %315 = sbr.rel (%p3557_p7) target bundleno = 60 (0x3c), region = 44 }
  0x33   : > { %308 = vst.msk [vmem:[#allocation2 + $0xd1] sm:$0x1] %vm287_vm0, %v5635_v0 }
  0x34   : > { %309 = vst.msk [vmem:[#allocation2 + $0xe9] sm:$0x1] %vm287_vm0, %v5635_v0 }
  0x35   : > { %310 = vst.msk [vmem:[#allocation2 + $0x101] sm:$0x1] %vm287_vm0, %v5635_v0 }
  0x36   : > { %311 = vst.msk [vmem:[#allocation2 + $0x119] sm:$0x1] %vm287_vm0, %v5635_v0 }
  0x37   : > { %v319_v17 = vld [vmem:[%s318_s17] sm:$0xff]  ;;  %v320_v18 = vld [vmem:[%s318_s17 + $0x8] sm:$0xff]  ;;  %v321_v19 = vld [vmem:[%s318_s17 + $0x10] sm:$0xff] }
  0x38   : > { %323 = vst.msk [vmem:[#allocation2 + $0x1] sm:$0xff] %vm270_vm1, %v319_v17  ;;  %v322_v20 = vld [vmem:[%s318_s17 + $0x18] sm:$0xff] }
  0x39   : > { %324 = vst.msk [vmem:[#allocation2 + $0x9] sm:$0xff] %vm270_vm1, %v320_v18 }
  0x3a   : > { %325 = vst.msk [vmem:[#allocation2 + $0x19] sm:$0xff] %vm270_vm1, %v321_v19 }
  0x3b   : > { %326 = vst.msk [vmem:[#allocation2 + $0x21] sm:$0xff] %vm270_vm1, %v322_v20 }
  0x3c PF: > { %p3560_p8 = scmp.ne.s32.totalorder %s3997_s18, 0 }
  0x3e   : > { %330 = sbr.rel (%p3560_p8) target bundleno = 74 (0x4a), region = 48 }
  0x43   : > { %v4016_v21 = vmov 0.0   ;;  %vm333_vm2 = vcmask 25600  }
  0x44   : > { %331 = vst.msk [vmem:[#allocation2] sm:$0xff] %vm270_vm1, %v4016_v21 }
  0x45   : > { %332 = vst.msk [vmem:[#allocation2 + $0x8] sm:$0xff] %vm270_vm1, %v4016_v21 }
  0x46   : > { %335 = vst.msk [vmem:[#allocation2 + $0x18] sm:$0xff] %vm270_vm1, %v4016_v21 }
  0x47   : > { %336 = vst.msk [vmem:[#allocation2 + $0x20] sm:$0xff] %vm270_vm1, %v4016_v21 }
  0x48   : > { %334 = vst.msk [vmem:[#allocation2 + $0x10] sm:$0x3] %vm333_vm2, %v4016_v21 }
  0x49   : > { %337 = vst.msk [vmem:[#allocation2 + $0x28] sm:$0x3] %vm333_vm2, %v4016_v21 }
  0x4a PF: > { %p3561_p9 = scmp.ge.s32.totalorder %s3997_s18, 1 }
  0x4c   : > { %341 = sbr.rel (%p3561_p9) target bundleno = 86 (0x56), region = 52 }
  0x51   : > { %v3564_v22 = vld [vmem:[%s4104_s10 + $0x80] sm:$0xff]  ;;  %v3565_v23 = vld [vmem:[%s4104_s10 + $0x88] sm:$0xff]  ;;  %v3566_v24 = vld [vmem:[%s4104_s10 + $0x90] sm:$0xff] }
  0x52   : > { %350 = vst.msk [vmem:[#allocation2 + $0xf1] sm:$0xff] %vm270_vm1, %v3564_v22  ;;  %v3567_v25 = vld [vmem:[%s4104_s10 + $0x98] sm:$0xff] }
  0x53   : > { %351 = vst.msk [vmem:[#allocation2 + $0xf9] sm:$0xff] %vm270_vm1, %v3565_v23 }
  0x54   : > { %352 = vst.msk [vmem:[#allocation2 + $0x109] sm:$0xff] %vm270_vm1, %v3566_v24 }
  0x55   : > { %353 = vst.msk [vmem:[#allocation2 + $0x111] sm:$0xff] %vm270_vm1, %v3567_v25 }
  0x56 PF: > { %p3568_p10 = scmp.ne.s32.totalorder %s3997_s18, 1 }
  0x58   : > { %357 = sbr.rel (%p3568_p10) target bundleno = 100 (0x64), region = 56 }
  0x5d   : > { %v4017_v26 = vmov 0.0   ;;  %vm361_vm3 = vcmask 25600  }
  0x5e   : > { %359 = vst.msk [vmem:[#allocation2 + $0xf0] sm:$0xff] %vm270_vm1, %v4017_v26 }
  0x5f   : > { %360 = vst.msk [vmem:[#allocation2 + $0xf8] sm:$0xff] %vm270_vm1, %v4017_v26 }
  0x60   : > { %363 = vst.msk [vmem:[#allocation2 + $0x108] sm:$0xff] %vm270_vm1, %v4017_v26 }
  0x61   : > { %364 = vst.msk [vmem:[#allocation2 + $0x110] sm:$0xff] %vm270_vm1, %v4017_v26 }
  0x62   : > { %362 = vst.msk [vmem:[#allocation2 + $0x100] sm:$0x3] %vm361_vm3, %v4017_v26 }
  0x63   : > { %365 = vst.msk [vmem:[#allocation2 + $0x118] sm:$0x3] %vm361_vm3, %v4017_v26 }
  0x64 PF: > { %v390_v27 = vld [vmem:[%s5630_s1] sm:$0xf]  ;;  %vm451_vm4 = vcmask 1043456   ;;  %v4214_v29 = vld [vmem:[#allocation2 + $0xd8] sm:$0xff]  ;;  %v3590_v30 = vld [vmem:[%s5630_s1 + $0x4] sm:$0xf] }
  0x65   : > { %v370_v28 = vld [vmem:[#allocation2] sm:$0xff]  ;;  %3569 = vmatpush.msk.msra.mxu0 %vm451_vm4, %v390_v27  ;;  %3925 = vmatpush.msk.msra.mxu3 %vm451_vm4, %v390_v27  ;;  %v3612_v32 = vld [vmem:[%s5630_s1 + $0x8] sm:$0xf]  ;;  %v4232_v33 = vld [vmem:[#allocation2 + $0x52] sm:$0xff]  ;;  %vm2029_vm5 = vcmask 64512   ;;  %vm2050_vm6 = vcmask 57344  }
  0x66   : > { %v552_v31 = vld [vmem:[#allocation2 + $0x1] sm:$0xff]  ;;  %3570 = vmatmul.msk.f32.vlgmr.msra.gmra.mxu0 %vm270_vm1, %v370_v28  ;;  %3588 = vmatmul.msk.f32.vlgmr.msra.gmra.mxu3 %vm270_vm1, %v4214_v29  ;;  %v553_v36 = vld [vmem:[#allocation2 + $0x9] sm:$0xff]  ;;  %v372_v38 = vld [vmem:[#allocation2 + $0x18] sm:$0xff] }
  0x67   : > { %3613 = vmatpush.msk.msrb.mxu0 %vm451_vm4, %v3612_v32  ;;  %3591 = vmatpush.msk.msra.mxu1 %vm451_vm4, %v3590_v30  ;;  %v371_v34 = vld [vmem:[#allocation2 + $0x8] sm:$0xff]  ;;  %v4234_v35 = vld [vmem:[#allocation2 + $0xe0] sm:$0xff]  ;;  %v4270_v46 = vld [vmem:[#allocation2 + $0x30] sm:$0xff] }
  0x68   : > { %3592 = vmatmul.msk.f32.vlgmr.msra.gmra.mxu1 %vm270_vm1, %v552_v31  ;;  %3926 = vmatpush.msk.msrb.mxu3 %vm451_vm4, %v3590_v30  ;;  %v4242_v37 = vld [vmem:[#allocation2 + $0x62] sm:$0xff]  ;;  %v4244_v39 = vld [vmem:[#allocation2 + $0x99] sm:$0xff]  ;;  %v4255_v41 = vld [vmem:[#allocation2 + $0x6a] sm:$0xff] }
  0x69   : > { %3927 = vmatpush.msk.msra.mxu2 %vm451_vm4, %v3612_v32  ;;  %v4248_v40 = vld [vmem:[#allocation2 + $0x19] sm:$0xff]  ;;  %v4257_v43 = vld [vmem:[#allocation2 + $0xa9] sm:$0xff]  ;;  %v4261_v44 = vld [vmem:[#allocation2 + $0x21] sm:$0xff] }
  0x6a   : > { %3621 = vmatmul.msk.f32.vlgmr.msra.gmra.mxu2 %vm270_vm1, %v4232_v33  ;;  %v373_v42 = vld [vmem:[#allocation2 + $0x20] sm:$0xff]  ;;  %v4272_v47 = vld [vmem:[#allocation2 + $0xb1] sm:$0xff]  ;;  %v3634_v50 = vld [vmem:[%s5630_s1 + $0xc] sm:$0xf] }
  0x6b   : > { %v4268_v45 = vld [vmem:[#allocation2 + $0x7a] sm:$0xff]  ;;  %v4276_v48 = vld [vmem:[#allocation2 + $0x31] sm:$0xff]  ;;  %v4284_v49 = vld [vmem:[#allocation2 + $0x82] sm:$0xff]  ;;  %3635 = vmatpush.msk.msra.mxu3 %vm451_vm4, %v3634_v50 }
  0x6c   : > { %v4290_v51 = vld [vmem:[#allocation2 + $0x38] sm:$0xff]  ;;  %v4292_v52 = vld [vmem:[#allocation2 + $0xc1] sm:$0xff]  ;;  %v4308_v56 = vld [vmem:[#allocation2 + $0xc9] sm:$0xff] }
  0x6d   : > { %v4296_v53 = vld [vmem:[#allocation2 + $0x39] sm:$0xff]  ;;  %v4306_v55 = vld [vmem:[#allocation2 + $0x48] sm:$0xff]  ;;  %v4322_v59 = vld [vmem:[#allocation2 + $0x50] sm:$0xff] }
  0x6e   : > { %3571 = vmatmul.msk.f32.gmra.mxu0 %vm270_vm1, %v371_v34  ;;  %3589 = vmatmul.msk.f32.gmra.mxu3 %vm270_vm1, %v4234_v35  ;;  %v4304_v54 = vld [vmem:[#allocation2 + $0x92] sm:$0xff]  ;;  %v4312_v57 = vld [vmem:[#allocation2 + $0x49] sm:$0xff]  ;;  %v4320_v58 = vld [vmem:[#allocation2 + $0x9a] sm:$0xff] }
  0x6f   : > { %v4324_v60 = vld [vmem:[#allocation2 + $0xd9] sm:$0xff]  ;;  %v4328_v61 = vld [vmem:[#allocation2 + $0x51] sm:$0xff]  ;;  %v4340_v1 = vld [vmem:[#allocation2 + $0xe1] sm:$0xff] }
  0x70   : > { %3593 = vmatmul.msk.f32.gmra.mxu1 %vm270_vm1, %v553_v36  ;;  %v4336_v62 = vld [vmem:[#allocation2 + $0xaa] sm:$0xff]  ;;  %v4338_v63 = vld [vmem:[#allocation2 + $0x60] sm:$0xff]  ;;  %v4352_v3 = vld [vmem:[#allocation2 + $0xb2] sm:$0xff] }
  0x71   : > { %v4344_v2 = vld [vmem:[#allocation2 + $0x61] sm:$0xff]  ;;  %v4358_v5 = vld [vmem:[#allocation2 + $0x69] sm:$0xff]  ;;  %v4367_v7 = vld [vmem:[#allocation2 + $0x78] sm:$0xff] }
  0x72   : > { %3622 = vmatmul.msk.f32.gmra.mxu2 %vm270_vm1, %v4242_v37  ;;  %v4354_v4 = vld [vmem:[#allocation2 + $0x68] sm:$0xff]  ;;  %v4371_v8 = vld [vmem:[#allocation2 + $0x79] sm:$0xff]  ;;  %v4394_v13 = vld [vmem:[#allocation2 + $0x90] sm:$0xff] }
  0x73   : > { %v4365_v6 = vld [vmem:[#allocation2 + $0xc2] sm:$0xff]  ;;  %v4378_v9 = vld [vmem:[#allocation2 + $0xca] sm:$0xff]  ;;  %v4392_v12 = vld [vmem:[#allocation2 + $0xda] sm:$0xff] }
  0x74   : > { %v4380_v10 = vld [vmem:[#allocation2 + $0x80] sm:$0xff]  ;;  %v4398_v14 = vld [vmem:[#allocation2 + $0x91] sm:$0xff]  ;;  %v4416_v17 = vld [vmem:[#allocation2 + $0xa8] sm:$0xff] }
  0x75   : > { %v4384_v11 = vld [vmem:[#allocation2 + $0x81] sm:$0xff]  ;;  %v4408_v16 = vld [vmem:[#allocation2 + $0x98] sm:$0xff]  ;;  %v3656_v18 = vld [vmem:[%s5630_s1 + $0x10] sm:$0xf] }
  0x76   : > { %3572 = vmatmul.msk.f32.gmra.mxu0 %vm270_vm1, %v372_v38  ;;  %3605 = vmatmul.msk.f32.vlgmr.msrb.gmra.mxu3 %vm270_vm1, %v4244_v39  ;;  %v4406_v15 = vld [vmem:[#allocation2 + $0xe2] sm:$0xff]  ;;  %v4426_v19 = vld [vmem:[#allocation2 + $0xb0] sm:$0xff]  ;;  %v736_v50 = vld [vmem:[#allocation2 + $0x1a] sm:$0xff] }
  0x77   : > { %3657 = vmatpush.msk.msra.mxu0 %vm451_vm4, %v3656_v18  ;;  %v4434_v21 = vld [vmem:[#allocation2 + $0xc0] sm:$0xff]  ;;  %v4442_v24 = vld [vmem:[#allocation2 + $0xc8] sm:$0xff]  ;;  %v3700_v0 = vld [vmem:[%s5630_s1 + $0x18] sm:$0xf] }
  0x78   : > { %3594 = vmatmul.msk.f32.gmra.mxu1 %vm270_vm1, %v4248_v40  ;;  %v734_v28 = vld [vmem:[#allocation2 + $0x2] sm:$0xff]  ;;  %v735_v34 = vld [vmem:[#allocation2 + $0xa] sm:$0xff]  ;;  %3701 = vmatpush.msk.msrb.mxu2 %vm451_vm4, %v3700_v0 }
  0x79   : > { %v3744_v0 = vld [vmem:[%s5630_s1 + $0x20] sm:$0xf] }
  0x7a   : > { %3623 = vmatmul.msk.f32.gmra.mxu2 %vm270_vm1, %v4255_v41 }
  0x7e   : > { %3573 = vmatmul.msk.f32.gmra.mxu0 %vm270_vm1, %v373_v42  ;;  %3606 = vmatmul.msk.f32.gmra.mxu3 %vm270_vm1, %v4257_v43 }
  0x80   : > { %3595 = vmatmul.msk.f32.gmra.mxu1 %vm270_vm1, %v4261_v44 }
  0x82   : > { %3624 = vmatmul.msk.f32.gmra.mxu2 %vm270_vm1, %v4268_v45 }
  0x86   : > { %3574 = vmatmul.msk.f32.gmra.mxu0 %vm270_vm1, %v4270_v46  ;;  %3607 = vmatmul.msk.f32.gmra.mxu3 %vm270_vm1, %v4272_v47 }
  0x88   : > { %3596 = vmatmul.msk.f32.gmra.mxu1 %vm270_vm1, %v4276_v48 }
  0x8a   : > { %3625 = vmatmul.msk.f32.gmra.mxu2 %vm270_vm1, %v4284_v49 }
  0x8e   : > { %3575 = vmatmul.msk.f32.gmra.mxu0 %vm270_vm1, %v4290_v51  ;;  %3608 = vmatmul.msk.f32.gmra.mxu3 %vm270_vm1, %v4292_v52 }
  0x90   : > { %3597 = vmatmul.msk.f32.gmra.mxu1 %vm270_vm1, %v4296_v53 }
  0x92   : > { %3626 = vmatmul.msk.f32.gmra.mxu2 %vm270_vm1, %v4304_v54 }
  0x96   : > { %3576 = vmatmul.msk.f32.gmra.mxu0 %vm270_vm1, %v4306_v55  ;;  %3609 = vmatmul.msk.f32.gmra.mxu3 %vm270_vm1, %v4308_v56 }
  0x98   : > { %3598 = vmatmul.msk.f32.gmra.mxu1 %vm270_vm1, %v4312_v57 }
  0x9a   : > { %3627 = vmatmul.msk.f32.gmra.mxu2 %vm270_vm1, %v4320_v58 }
  0x9e   : > { %3577 = vmatmul.msk.f32.gmra.mxu0 %vm270_vm1, %v4322_v59  ;;  %3610 = vmatmul.msk.f32.gmra.mxu3 %vm270_vm1, %v4324_v60 }
  0xa0   : > { %3599 = vmatmul.msk.f32.gmra.mxu1 %vm270_vm1, %v4328_v61 }
  0xa2   : > { %3628 = vmatmul.msk.f32.gmra.mxu2 %vm270_vm1, %v4336_v62 }
  0xa6   : > { %3578 = vmatmul.msk.f32.gmra.mxu0 %vm270_vm1, %v4338_v63  ;;  %3611 = vmatmul.msk.f32.gmra.mxu3 %vm270_vm1, %v4340_v1 }
  0xa8   : > { %3600 = vmatmul.msk.f32.gmra.mxu1 %vm270_vm1, %v4344_v2 }
  0xaa   : > { %3629 = vmatmul.msk.f32.gmra.mxu2 %vm270_vm1, %v4352_v3 }
  0xae   : > { %3579 = vmatmul.msk.f32.gmra.mxu0 %vm270_vm1, %v4354_v4  ;;  %3636 = vmatmul.msk.f32.vlgmr.msra.gmra.mxu3 %vm270_vm1, %v372_v38 }
  0xb0   : > { %3601 = vmatmul.msk.f32.gmra.mxu1 %vm270_vm1, %v4358_v5 }
  0xb2   : > { %3630 = vmatmul.msk.f32.gmra.mxu2 %vm270_vm1, %v4365_v6 }
  0xb6   : > { %3580 = vmatmul.msk.f32.gmra.mxu0 %vm270_vm1, %v4367_v7  ;;  %3637 = vmatmul.msk.f32.gmra.mxu3 %vm270_vm1, %v373_v42 }
  0xb8   : > { %3602 = vmatmul.msk.f32.gmra.mxu1 %vm270_vm1, %v4371_v8 }
  0xba   : > { %3631 = vmatmul.msk.f32.gmra.mxu2 %vm270_vm1, %v4378_v9 }
  0xbe   : > { %3581 = vmatmul.msk.f32.gmra.mxu0 %vm270_vm1, %v4380_v10  ;;  %3638 = vmatmul.msk.f32.gmra.mxu3 %vm270_vm1, %v4270_v46 }
  0xc0   : > { %3603 = vmatmul.msk.f32.gmra.mxu1 %vm270_vm1, %v4384_v11 }
  0xc2   : > { %3632 = vmatmul.msk.f32.gmra.mxu2 %vm270_vm1, %v4392_v12 }
  0xc6   : > { %3582 = vmatmul.msk.f32.gmra.mxu0 %vm270_vm1, %v4394_v13  ;;  %3639 = vmatmul.msk.f32.gmra.mxu3 %vm270_vm1, %v4290_v51 }
  0xc8   : > { %3604 = vmatmul.msk.f32.gmra.mxu1 %vm270_vm1, %v4398_v14 }
  0xca   : > { %3633 = vmatmul.msk.f32.gmra.mxu2 %vm270_vm1, %v4406_v15 }
  0xce   : > { %3583 = vmatmul.msk.f32.gmra.mxu0 %vm270_vm1, %v4408_v16  ;;  %3640 = vmatmul.msk.f32.gmra.mxu3 %vm270_vm1, %v4306_v55 }
  0xd2   : > { %3702 = vmatmul.msk.f32.vlgmr.msrb.gmra.mxu2 %vm270_vm1, %v4270_v46 }
  0xd6   : > { %3584 = vmatmul.msk.f32.gmra.mxu0 %vm270_vm1, %v4416_v17  ;;  %3641 = vmatmul.msk.f32.gmra.mxu3 %vm270_vm1, %v4322_v59 }
  0xda   : > { %3703 = vmatmul.msk.f32.gmra.mxu2 %vm270_vm1, %v4290_v51  ;;  %v4529_v51 = vld [vmem:[%s5631_s2] ss:$0 sm:$0xff] }
  0xde   : > { %3585 = vmatmul.msk.f32.gmra.mxu0 %vm270_vm1, %v4426_v19  ;;  %3642 = vmatmul.msk.f32.gmra.mxu3 %vm270_vm1, %v4338_v63 }
  0xe2   : > { %3704 = vmatmul.msk.f32.gmra.mxu2 %vm270_vm1, %v4306_v55  ;;  %v4546_v55 = vld [vmem:[#allocation2 + $0x4a] sm:$0xff] }
  0xe3   : > { %v4432_v20 = vpop.f32.mrf.mxu0 }
  0xe6   : > { %3586 = vmatmul.msk.f32.gmra.mxu0 %vm270_vm1, %v4434_v21  ;;  %3643 = vmatmul.msk.f32.gmra.mxu3 %vm270_vm1, %v4354_v4 }
  0xe9   : > { %v526_v22 = vpop.f32.mrf.mxu3 }
  0xea   : > { %3705 = vmatmul.msk.f32.gmra.mxu2 %vm270_vm1, %v4322_v59 }
  0xeb   : > { %v4440_v23 = vpop.f32.mrf.mxu0 }
  0xed   : > { %v4448_v25 = vpop.f32.mrf.mxu2 }
  0xee   : > { %3587 = vmatmul.msk.f32.gmra.mxu0 %vm270_vm1, %v4442_v24  ;;  %3644 = vmatmul.msk.f32.gmra.mxu3 %vm270_vm1, %v4367_v7  ;;  %5637 = vst [vmem:[#allocation4_spill] sm:$0xff] %v4448_v25 }
  0xf1   : > { %v529_v26 = vpop.f32.mrf.mxu3 }
  0xf2   : > { %3706 = vmatmul.msk.f32.gmra.mxu2 %vm270_vm1, %v4338_v63 }
  0xf3   : > { %v4450_v27 = vpop.f32.mrf.mxu0 }
  0xf4   : > { %5638 = vst [vmem:[#allocation5_spill] sm:$0xff] %v4450_v27 }
  0xf5   : > { %v4455_v30 = vpop.f32.mrf.mxu2 }
  0xf6   : > { %3614 = vmatmul.msk.f32.vlgmr.msrb.gmra.mxu0 %vm270_vm1, %v734_v28  ;;  %3645 = vmatmul.msk.f32.gmra.mxu3 %vm270_vm1, %v4380_v10  ;;  %5639 = vst [vmem:[#allocation6_spill] sm:$0xff] %v4455_v30  ;;  %v3722_v28 = vld [vmem:[%s5630_s1 + $0x1c] sm:$0xf]  ;;  %v4505_v30 = vpop.f32.mrf.mxu1 }
  0xf7   : > { %3723 = vmatpush.msk.msrb.mxu3 %vm451_vm4, %v3722_v28  ;;  %3745 = vmatpush.msk.msrb.mxu0 %vm451_vm4, %v3744_v0 }
  0xf9   : > { %v4457_v31 = vpop.f32.mrf.mxu3 }
  0xfa   : > { %5640 = vst [vmem:[#allocation7_spill] sm:$0xff] %v4457_v31  ;;  %v737_v31 = vld [vmem:[#allocation2 + $0x22] sm:$0xff]  ;;  %3707 = vmatmul.msk.f32.gmra.mxu2 %vm270_vm1, %v4354_v4 }
  0xfb   : > { %v4459_v32 = vpop.f32.mrf.mxu0 }
  0xfc   : > { %5641 = vst [vmem:[#allocation8_spill] sm:$0xff] %v4459_v32 }
  0xfd   : > { %v4464_v36 = vpop.f32.mrf.mxu2 }
  0xfe   : > { %3615 = vmatmul.msk.f32.gmra.mxu0 %vm270_vm1, %v735_v34  ;;  %3646 = vmatmul.msk.f32.gmra.mxu3 %vm270_vm1, %v4394_v13 }
 0x101   : > { %v4466_v38 = vpop.f32.mrf.mxu3 }
 0x102   : > { %5642 = vst [vmem:[#allocation9_spill] sm:$0xff] %v4466_v38  ;;  %3708 = vmatmul.msk.f32.gmra.mxu2 %vm270_vm1, %v4367_v7 }
 0x103   : > { %v4468_v42 = vpop.f32.mrf.mxu0 }
 0x104   : > { %5643 = vst [vmem:[#allocation10_spill] sm:$0xff] %v4468_v42  ;;  %v4533_v42 = vpop.f32.mrf.mxu1 }
 0x105   : > { %v4473_v18 = vpop.f32.mrf.mxu2  ;;  %5649 = vst [vmem:[#allocation16_spill] sm:$0xff] %v4533_v42 }
 0x106   : > { %3616 = vmatmul.msk.f32.gmra.mxu0 %vm270_vm1, %v736_v50  ;;  %3647 = vmatmul.msk.f32.gmra.mxu3 %vm270_vm1, %v4408_v16 }
 0x109   : > { %v4479_v34 = vpop.f32.mrf.mxu3 }
 0x10a   : > { %5644 = vst [vmem:[#allocation11_spill] sm:$0xff] %v4479_v34  ;;  %v3678_v34 = vld [vmem:[%s5630_s1 + $0x14] sm:$0xf]  ;;  %3709 = vmatmul.msk.f32.gmra.mxu2 %vm270_vm1, %v4380_v10 }
 0x10b   : > { %v4484_v38 = vpop.f32.mrf.mxu0  ;;  %3679 = vmatpush.msk.msrb.mxu1 %vm451_vm4, %v3678_v34 }
 0x10c   : > { %5645 = vst [vmem:[#allocation12_spill] sm:$0xff] %v4484_v38  ;;  %3680 = vmatmul.msk.f32.vlgmr.msrb.gmra.mxu1 %vm270_vm1, %v736_v50  ;;  %v4509_v38 = vld [vmem:[#allocation2 + $0x32] sm:$0xff]  ;;  %v4557_v42 = vpop.f32.mrf.mxu1 }
 0x10d   : > { %v4492_v28 = vpop.f32.mrf.mxu2  ;;  %5653 = vst [vmem:[#allocation20_spill] sm:$0xff] %v4557_v42 }
 0x10e   : > { %3617 = vmatmul.msk.f32.gmra.mxu0 %vm270_vm1, %v737_v31  ;;  %3648 = vmatmul.msk.f32.gmra.mxu3 %vm270_vm1, %v4416_v17 }
 0x111   : > { %v4502_v46 = vpop.f32.mrf.mxu3 }
 0x112   : > { %3710 = vmatmul.msk.f32.gmra.mxu2 %vm270_vm1, %v4394_v13 }
 0x113   : > { %v4507_v25 = vpop.f32.mrf.mxu0 }
 0x114   : > { %5646 = vst [vmem:[#allocation13_spill] sm:$0xff] %v4507_v25  ;;  %3681 = vmatmul.msk.f32.gmra.mxu1 %vm270_vm1, %v737_v31  ;;  %v4524_v25 = vld [vmem:[#allocation2 + $0x3a] sm:$0xff] }
 0x115   : > { %v4517_v50 = vpop.f32.mrf.mxu2 }
 0x116   : > { %3618 = vmatmul.msk.f32.gmra.mxu0 %vm270_vm1, %v4509_v38  ;;  %3649 = vmatmul.msk.f32.gmra.mxu3 %vm270_vm1, %v4426_v19  ;;  %5647 = vst [vmem:[#allocation14_spill] sm:$0xff] %v4517_v50  ;;  %v550_v50 = vadd.f32 %v4529_v51, %v526_v22  ;;  %v551_v22 = vadd.f32 %v4529_v51, %v529_v26  ;;  %v4573_v26 = vpop.f32.mrf.mxu1 }
 0x117   : > { %5655 = vst [vmem:[#allocation22_spill] sm:$0xff] %v4573_v26  ;;  %v4595_v26 = vld [vmem:[#allocation2 + $0xf0] sm:$0xff] }
 0x119   : > { %v4520_v34 = vpop.f32.mrf.mxu3 }
 0x11a   : > { %3711 = vmatmul.msk.f32.gmra.mxu2 %vm270_vm1, %v4408_v16 }
 0x11b   : > { %v4522_v0 = vpop.f32.mrf.mxu0 }
 0x11c   : > { %5648 = vst [vmem:[#allocation15_spill] sm:$0xff] %v4522_v0  ;;  %3682 = vmatmul.msk.f32.gmra.mxu1 %vm270_vm1, %v4509_v38 }
 0x11d   : > { %v4540_v31 = vpop.f32.mrf.mxu2 }
 0x11e   : > { %3619 = vmatmul.msk.f32.gmra.mxu0 %vm270_vm1, %v4524_v25  ;;  %3650 = vmatmul.msk.f32.gmra.mxu3 %vm270_vm1, %v4434_v21  ;;  %5650 = vst [vmem:[#allocation17_spill] sm:$0xff] %v4540_v31 }
 0x121   : > { %v708_v0 = vpop.f32.mrf.mxu3 }
 0x122   : > { %v732_v32 = vadd.f32 %v708_v0, %v550_v50  ;;  %3712 = vmatmul.msk.f32.gmra.mxu2 %vm270_vm1, %v4416_v17 }
 0x123   : > { %v4544_v27 = vpop.f32.mrf.mxu0 }
 0x124   : > { %5651 = vst [vmem:[#allocation18_spill] sm:$0xff] %v4544_v27  ;;  %3683 = vmatmul.msk.f32.gmra.mxu1 %vm270_vm1, %v4524_v25 }
 0x125   : > { %v4555_v31 = vpop.f32.mrf.mxu2 }
 0x126   : > { %3620 = vmatmul.msk.f32.gmra.mxu0 %vm270_vm1, %v4546_v55  ;;  %3651 = vmatmul.msk.f32.gmra.mxu3 %vm270_vm1, %v4442_v24  ;;  %5652 = vst [vmem:[#allocation19_spill] sm:$0xff] %v4555_v31 }
 0x129   : > { %v711_v50 = vpop.f32.mrf.mxu3 }
 0x12a   : > { %v733_v0 = vadd.f32 %v711_v50, %v551_v22  ;;  %v4591_v50 = vpop.f32.mrf.mxu1  ;;  %3713 = vmatmul.msk.f32.gmra.mxu2 %vm270_vm1, %v4426_v19 }
 0x12b   : > { %v4561_v27 = vpop.f32.mrf.mxu0  ;;  %5657 = vst [vmem:[#allocation24_spill] sm:$0xff] %v4591_v50  ;;  %v4611_v50 = vld [vmem:[#allocation2 + $0xf8] sm:$0xff] }
 0x12c   : > { %3684 = vmatmul.msk.f32.gmra.mxu1 %vm270_vm1, %v4546_v55 }
 0x12d   : > { %v4569_v59 = vpop.f32.mrf.mxu2 }
 0x12e   : > { %3652 = vmatmul.msk.f32.gmra.mxu3 %vm270_vm1, %v4214_v29  ;;  %3658 = vmatmul.msk.f32.vlgmr.msra.gmra.mxu0 %vm270_vm1, %v4248_v40  ;;  %5654 = vst [vmem:[#allocation21_spill] sm:$0xff] %v4569_v59 }
 0x131   : > { %v4575_v31 = vpop.f32.mrf.mxu3 }
 0x132   : > { %v4615_v7 = vpop.f32.mrf.mxu1  ;;  %3714 = vmatmul.msk.f32.gmra.mxu2 %vm270_vm1, %v4434_v21 }
 0x133   : > { %v4577_v22 = vpop.f32.mrf.mxu0  ;;  %5659 = vst [vmem:[#allocation26_spill] sm:$0xff] %v4615_v7 }
 0x134   : > { %3685 = vmatmul.msk.f32.gmra.mxu1 %vm270_vm1, %v4232_v33 }
 0x135   : > { %v4585_v40 = vpop.f32.mrf.mxu2 }
 0x136   : > { %3653 = vmatmul.msk.f32.gmra.mxu3 %vm270_vm1, %v4234_v35  ;;  %3659 = vmatmul.msk.f32.gmra.mxu0 %vm270_vm1, %v4261_v44 }
 0x139   : > { %v4589_v63 = vpop.f32.mrf.mxu3 }
 0x13a   : > { %5656 = vst [vmem:[#allocation23_spill] sm:$0xff] %v4589_v63  ;;  %v4635_v7 = vpop.f32.mrf.mxu1  ;;  %3715 = vmatmul.msk.f32.gmra.mxu2 %vm270_vm1, %v4442_v24 }
 0x13b   : > { %v4593_v59 = vpop.f32.mrf.mxu0 }
 0x13c   : > { %3686 = vmatmul.msk.f32.gmra.mxu1 %vm270_vm1, %v4242_v37 }
 0x13d   : > { %v4603_v44 = vpop.f32.mrf.mxu2 }
 0x13e   : > { %3654 = vmatmul.msk.f32.gmra.mxu3 %vm270_vm1, %v4595_v26  ;;  %3660 = vmatmul.msk.f32.gmra.mxu0 %vm270_vm1, %v4276_v48 }
 0x141   : > { %v4607_v33 = vpop.f32.mrf.mxu3 }
 0x142   : > { %3716 = vmatmul.msk.f32.gmra.mxu2 %vm270_vm1, %v4214_v29 }
 0x143   : > { %v4609_v4 = vpop.f32.mrf.mxu0 }
 0x144   : > { %5658 = vst [vmem:[#allocation25_spill] sm:$0xff] %v4609_v4  ;;  %3687 = vmatmul.msk.f32.gmra.mxu1 %vm270_vm1, %v4255_v41 }
 0x145   : > { %v890_v42 = vpop.f32.mrf.mxu2 }
 0x146   : > { %3655 = vmatmul.msk.f32.gmra.mxu3 %vm270_vm1, %v4611_v50  ;;  %3661 = vmatmul.msk.f32.gmra.mxu0 %vm270_vm1, %v4296_v53  ;;  %v4621_v63 = vadd.f32 %v890_v42, %v732_v32 }
 0x149   : > { %v4625_v37 = vpop.f32.mrf.mxu3 }
 0x14a   : > { %3717 = vmatmul.msk.f32.gmra.mxu2 %vm270_vm1, %v4234_v35 }
 0x14b   : > { %v4627_v4 = vpop.f32.mrf.mxu0 }
 0x14c   : > { %5660 = vst [vmem:[#allocation27_spill] sm:$0xff] %v4627_v4  ;;  %3688 = vmatmul.msk.f32.gmra.mxu1 %vm270_vm1, %v4268_v45 }
 0x14d   : > { %v893_v10 = vpop.f32.mrf.mxu2 }
 0x14e   : > { %3662 = vmatmul.msk.f32.gmra.mxu0 %vm270_vm1, %v4312_v57  ;;  %3724 = vmatmul.msk.f32.vlgmr.msrb.gmra.mxu3 %vm270_vm1, %v4276_v48  ;;  %v4637_v32 = vadd.f32 %v893_v10, %v733_v0  ;;  %v4653_v48 = vpop.f32.mrf.mxu1 }
 0x151   : > { %v4641_v41 = vpop.f32.mrf.mxu3 }
 0x152   : > { %3718 = vmatmul.msk.f32.gmra.mxu2 %vm270_vm1, %v4595_v26  ;;  %v1482_v26 = vld [vmem:[#allocation2 + $0x110] sm:$0xff] }
 0x153   : > { %v4643_v42 = vpop.f32.mrf.mxu0 }
 0x154   : > { %5661 = vst [vmem:[#allocation28_spill] sm:$0xff] %v4643_v42  ;;  %3689 = vmatmul.msk.f32.gmra.mxu1 %vm270_vm1, %v4284_v49 }
 0x156   : > { %3663 = vmatmul.msk.f32.gmra.mxu0 %vm270_vm1, %v4328_v61  ;;  %3725 = vmatmul.msk.f32.gmra.mxu3 %vm270_vm1, %v4296_v53  ;;  %v4669_v49 = vpop.f32.mrf.mxu1 }
 0x159   : > { %v4655_v13 = vpop.f32.mrf.mxu3 }
 0x15a   : > { %3719 = vmatmul.msk.f32.gmra.mxu2 %vm270_vm1, %v4611_v50  ;;  %v4784_v50 = vld [vmem:[#allocation2 + $0xfa] sm:$0xff] }
 0x15b   : > { %v4657_v45 = vpop.f32.mrf.mxu0 }
 0x15c   : > { %5662 = vst [vmem:[#allocation29_spill] sm:$0xff] %v4657_v45  ;;  %3690 = vmatmul.msk.f32.gmra.mxu1 %vm270_vm1, %v4304_v54 }
 0x15e   : > { %3664 = vmatmul.msk.f32.gmra.mxu0 %vm270_vm1, %v4344_v2  ;;  %3726 = vmatmul.msk.f32.gmra.mxu3 %vm270_vm1, %v4312_v57  ;;  %v681_v17 = vpop.f32.mrf.mxu1 }
 0x161   : > { %v4667_v53 = vpop.f32.mrf.mxu3 }
 0x163   : > { %v4671_v16 = vpop.f32.mrf.mxu0 }
 0x164   : > { %3691 = vmatmul.msk.f32.gmra.mxu1 %vm270_vm1, %v4320_v58 }
 0x166   : > { %3665 = vmatmul.msk.f32.gmra.mxu0 %vm270_vm1, %v4358_v5  ;;  %3727 = vmatmul.msk.f32.gmra.mxu3 %vm270_vm1, %v4328_v61  ;;  %v541_v61 = vadd.f32 %v4529_v51, %v4561_v27 }
 0x168   : > { %v723_v0 = vadd.f32 %v681_v17, %v541_v61 }
 0x169   : > { %v4681_v57 = vpop.f32.mrf.mxu3 }
 0x16a   : > { %v905_v21 = vadd.f32 %v4464_v36, %v723_v0 }
 0x16b   : > { %v4683_v54 = vpop.f32.mrf.mxu0 }
 0x16c   : > { %3692 = vmatmul.msk.f32.gmra.mxu1 %vm270_vm1, %v4336_v62  ;;  %v542_v62 = vadd.f32 %v4529_v51, %v4577_v22 }
 0x16e   : > { %3666 = vmatmul.msk.f32.gmra.mxu0 %vm270_vm1, %v4371_v8  ;;  %3728 = vmatmul.msk.f32.gmra.mxu3 %vm270_vm1, %v4344_v2  ;;  %v684_v2 = vpop.f32.mrf.mxu1 }
 0x16f   : > { %v724_v24 = vadd.f32 %v684_v2, %v542_v62 }
 0x171   : > { %v4695_v58 = vpop.f32.mrf.mxu3 }
 0x173   : > { %v4697_v19 = vpop.f32.mrf.mxu0 }
 0x174   : > { %3693 = vmatmul.msk.f32.gmra.mxu1 %vm270_vm1, %v4352_v3  ;;  %v543_v3 = vadd.f32 %v4529_v51, %v4593_v59 }
 0x176   : > { %3667 = vmatmul.msk.f32.gmra.mxu0 %vm270_vm1, %v4384_v11  ;;  %3729 = vmatmul.msk.f32.gmra.mxu3 %vm270_vm1, %v4358_v5  ;;  %v906_v5 = vadd.f32 %v4473_v18, %v724_v24  ;;  %v687_v36 = vpop.f32.mrf.mxu1 }
 0x177   : > { %v725_v29 = vadd.f32 %v687_v36, %v543_v3 }
 0x179   : > { %v1046_v27 = vpop.f32.mrf.mxu3 }
 0x17a   : > { %v4710_v10 = vadd.f32 %v1046_v27, %v905_v21 }
 0x17b   : > { %v4712_v17 = vpop.f32.mrf.mxu0 }
 0x17c   : > { %3694 = vmatmul.msk.f32.gmra.mxu1 %vm270_vm1, %v4365_v6 }
 0x17e   : > { %3668 = vmatmul.msk.f32.gmra.mxu0 %vm270_vm1, %v4398_v14  ;;  %3730 = vmatmul.msk.f32.gmra.mxu3 %vm270_vm1, %v4371_v8  ;;  %v907_v8 = vadd.f32 %v4492_v28, %v725_v29  ;;  %v4771_v28 = vld [vmem:[#allocation2 + $0xf2] sm:$0xff] }
 0x181   : > { %v1049_v22 = vpop.f32.mrf.mxu3 }
 0x182   : > { %v4725_v61 = vadd.f32 %v1049_v22, %v906_v5 }
 0x183   : > { %v4727_v0 = vpop.f32.mrf.mxu0 }
 0x184   : > { %3695 = vmatmul.msk.f32.gmra.mxu1 %vm270_vm1, %v4378_v9 }
 0x186   : > { %3669 = vmatmul.msk.f32.gmra.mxu0 %vm270_vm1, %v4244_v39  ;;  %3731 = vmatmul.msk.f32.gmra.mxu3 %vm270_vm1, %v4384_v11 }
 0x189   : > { %v1052_v6 = vpop.f32.mrf.mxu3 }
 0x18a   : > { %v4738_v18 = vadd.f32 %v1052_v6, %v907_v8 }
 0x18b   : > { %v4740_v59 = vpop.f32.mrf.mxu0 }
 0x18c   : > { %3696 = vmatmul.msk.f32.gmra.mxu1 %vm270_vm1, %v4392_v12  ;;  %v1481_v12 = vld [vmem:[#allocation2 + $0x108] sm:$0xff] }
 0x18d   : > { %3720 = vmatmul.msk.f32.gmra.mxu2 %vm270_vm1, %v1481_v12  ;;  %v1664_v12 = vld [vmem:[#allocation2 + $0x111] sm:$0xff] }
 0x18e   : > { %3670 = vmatmul.msk.f32.gmra.mxu0 %vm270_vm1, %v4257_v43  ;;  %3732 = vmatmul.msk.f32.gmra.mxu3 %vm270_vm1, %v4398_v14 }
 0x191   : > { %v4750_v35 = vpop.f32.mrf.mxu3 }
 0x192   : > { %5663 = vst [vmem:[#allocation30_spill] sm:$0xff] %v4750_v35 }
 0x193   : > { %v4752_v9 = vpop.f32.mrf.mxu0 }
 0x194   : > { %3697 = vmatmul.msk.f32.gmra.mxu1 %vm270_vm1, %v4406_v15 }
 0x195   : > { %3721 = vmatmul.msk.f32.gmra.mxu2 %vm270_vm1, %v1482_v26  ;;  %v1830_v26 = vld [vmem:[#allocation2 + $0x52] sm:$0xff] }
 0x196   : > { %3671 = vmatmul.msk.f32.gmra.mxu0 %vm270_vm1, %v4272_v47  ;;  %3733 = vmatmul.msk.f32.gmra.mxu3 %vm270_vm1, %v4244_v39 }
 0x199   : > { %v4762_v11 = vpop.f32.mrf.mxu3 }
 0x19a   : > { %5664 = vst [vmem:[#allocation31_spill] sm:$0xff] %v4762_v11 }
 0x19b   : > { %v4764_v14 = vpop.f32.mrf.mxu0 }
 0x19c   : > { %3698 = vmatmul.msk.f32.gmra.mxu1 %vm270_vm1, %v4771_v28 }
 0x19e   : > { %3672 = vmatmul.msk.f32.gmra.mxu0 %vm270_vm1, %v4292_v52  ;;  %3734 = vmatmul.msk.f32.gmra.mxu3 %vm270_vm1, %v4257_v43  ;;  %v548_v43 = vadd.f32 %v4529_v51, %v4671_v16 }
 0x1a0   : > { %v730_v62 = vadd.f32 %v4502_v46, %v548_v43  ;;  %v1831_v43 = vld [vmem:[#allocation2 + $0x62] sm:$0xff] }
 0x1a1   : > { %v4775_v39 = vpop.f32.mrf.mxu3 }
 0x1a2   : > { %5665 = vst [vmem:[#allocation32_spill] sm:$0xff] %v4775_v39  ;;  %v912_v16 = vadd.f32 %v4585_v40, %v730_v62  ;;  %v1117_v40 = vld [vmem:[#allocation2 + $0xf1] sm:$0xff]  ;;  %v1839_v39 = vld [vmem:[#allocation2 + $0xc2] sm:$0xff] }
 0x1a3   : > { %v4777_v15 = vpop.f32.mrf.mxu0  ;;  %v1832_v62 = vld [vmem:[#allocation2 + $0x6a] sm:$0xff] }
 0x1a4   : > { %3699 = vmatmul.msk.f32.gmra.mxu1 %vm270_vm1, %v4784_v50 }
 0x1a6   : > { %3673 = vmatmul.msk.f32.gmra.mxu0 %vm270_vm1, %v4308_v56  ;;  %3735 = vmatmul.msk.f32.gmra.mxu3 %vm270_vm1, %v4272_v47  ;;  %v549_v47 = vadd.f32 %v4529_v51, %v4683_v54 }
 0x1a8   : > { %v731_v3 = vadd.f32 %v4520_v34, %v549_v47 }
 0x1a9   : > { %v4790_v2 = vpop.f32.mrf.mxu3 }
 0x1aa   : > { %5666 = vst [vmem:[#allocation33_spill] sm:$0xff] %v4790_v2 }
 0x1ab   : > { %v4792_v21 = vpop.f32.mrf.mxu0 }
 0x1ae   : > { %3674 = vmatmul.msk.f32.gmra.mxu0 %vm270_vm1, %v4324_v60  ;;  %3736 = vmatmul.msk.f32.gmra.mxu3 %vm270_vm1, %v4292_v52  ;;  %v913_v52 = vadd.f32 %v4603_v44, %v731_v3 }
 0x1b1   : > { %v1067_v27 = vpop.f32.mrf.mxu3 }
 0x1b2   : > { %v4802_v24 = vadd.f32 %v1067_v27, %v912_v16  ;;  %v1834_v27 = vld [vmem:[#allocation2 + $0x82] sm:$0xff] }
 0x1b3   : > { %v4804_v5 = vpop.f32.mrf.mxu0 }
 0x1b6   : > { %3675 = vmatmul.msk.f32.gmra.mxu0 %vm270_vm1, %v4340_v1  ;;  %3737 = vmatmul.msk.f32.gmra.mxu3 %vm270_vm1, %v4308_v56  ;;  %v1118_v56 = vld [vmem:[#allocation2 + $0xf9] sm:$0xff] }
 0x1b9   : > { %v1070_v46 = vpop.f32.mrf.mxu3 }
 0x1ba   : > { %v4812_v36 = vadd.f32 %v1070_v46, %v913_v52  ;;  %v1835_v52 = vld [vmem:[#allocation2 + $0x92] sm:$0xff]  ;;  %v4864_v46 = vpop.f32.mrf.mxu1 }
 0x1bb   : > { %v4814_v54 = vpop.f32.mrf.mxu0 }
 0x1be   : > { %3676 = vmatmul.msk.f32.gmra.mxu0 %vm270_vm1, %v1117_v40  ;;  %3738 = vmatmul.msk.f32.gmra.mxu3 %vm270_vm1, %v4324_v60 }
 0x1c1   : > { %v1073_v34 = vpop.f32.mrf.mxu3 }
 0x1c2   : > { %v4820_v22 = vadd.f32 %v1073_v34, %v4621_v63  ;;  %v1836_v34 = vld [vmem:[#allocation2 + $0x9a] sm:$0xff] }
 0x1c3   : > { %v4822_v29 = vpop.f32.mrf.mxu0 }
 0x1c6   : > { %3677 = vmatmul.msk.f32.gmra.mxu0 %vm270_vm1, %v1118_v56  ;;  %3739 = vmatmul.msk.f32.gmra.mxu3 %vm270_vm1, %v4340_v1  ;;  %v1663_v1 = vld [vmem:[#allocation2 + $0x109] sm:$0xff] }
 0x1c9   : > { %v1076_v44 = vpop.f32.mrf.mxu3 }
 0x1ca   : > { %v4828_v8 = vadd.f32 %v1076_v44, %v4637_v32 }
 0x1cb   : > { %v4830_v6 = vpop.f32.mrf.mxu0 }
 0x1ce   : > { %3740 = vmatmul.msk.f32.gmra.mxu3 %vm270_vm1, %v1117_v40  ;;  %3746 = vmatmul.msk.f32.vlgmr.msrb.gmra.mxu0 %vm270_vm1, %v4509_v38 }
 0x1d3   : > { %v4835_v60 = vpop.f32.mrf.mxu0 }
 0x1d6   : > { %3741 = vmatmul.msk.f32.gmra.mxu3 %vm270_vm1, %v1118_v56  ;;  %3747 = vmatmul.msk.f32.gmra.mxu0 %vm270_vm1, %v4524_v25  ;;  %v1383_v56 = vpop.f32.mrf.mxu1 }
 0x1db   : > { %v4840_v63 = vpop.f32.mrf.mxu0 }
 0x1de   : > { %3742 = vmatmul.msk.f32.gmra.mxu3 %vm270_vm1, %v1663_v1  ;;  %3748 = vmatmul.msk.f32.gmra.mxu0 %vm270_vm1, %v4546_v55  ;;  %v1833_v55 = vld [vmem:[#allocation2 + $0x7a] sm:$0xff]  ;;  %v1837_v1 = vld [vmem:[#allocation2 + $0xaa] sm:$0xff] }
 0x1e3   : > { %v4845_v32 = vpop.f32.mrf.mxu0 }
 0x1e6   : > { %3743 = vmatmul.msk.f32.gmra.mxu3 %vm270_vm1, %v1664_v12  ;;  %3749 = vmatmul.msk.f32.gmra.mxu0 %vm270_vm1, %v1830_v26  ;;  %v1565_v12 = vpop.f32.mrf.mxu2  ;;  %v1747_v26 = vpop.f32.mrf.mxu3 }
 0x1eb   : > { %v4849_v38 = vpop.f32.mrf.mxu0 }
 0x1ee   : > { %3750 = vmatmul.msk.f32.gmra.mxu0 %vm270_vm1, %v1831_v43 }
 0x1f3   : > { %v4852_v25 = vpop.f32.mrf.mxu0 }
 0x1f6   : > { %3751 = vmatmul.msk.f32.gmra.mxu0 %vm270_vm1, %v1832_v62  ;;  %v1838_v62 = vld [vmem:[#allocation2 + $0xb2] sm:$0xff] }
 0x1fb   : > { %v4855_v47 = vpop.f32.mrf.mxu0 }
 0x1fe   : > { %3752 = vmatmul.msk.f32.gmra.mxu0 %vm270_vm1, %v1833_v55  ;;  %v1386_v55 = vpop.f32.mrf.mxu1 }
 0x203   : > { %v4858_v16 = vpop.f32.mrf.mxu0 }
 0x206   : > { %3753 = vmatmul.msk.f32.gmra.mxu0 %vm270_vm1, %v1834_v27  ;;  %v1568_v27 = vpop.f32.mrf.mxu2 }
 0x20b   : > { %v4861_v3 = vpop.f32.mrf.mxu0 }
 0x20c   : > { %5667 = vst [vmem:[#allocation34_spill] sm:$0xff] %v4861_v3 }
 0x20e   : > { %3754 = vmatmul.msk.f32.gmra.mxu0 %vm270_vm1, %v1835_v52  ;;  %v1750_v52 = vpop.f32.mrf.mxu3  ;;  %v1571_v45 = vpop.f32.mrf.mxu2 }
 0x213   : > { %v4866_v40 = vpop.f32.mrf.mxu0 }
 0x214   : > { %5668 = vst [vmem:[#allocation35_spill] sm:$0xff] %v4866_v40  ;;  %v1840_v40 = vld [vmem:[#allocation2 + $0xca] sm:$0xff] }
 0x216   : > { %3755 = vmatmul.msk.f32.gmra.mxu0 %vm270_vm1, %v1836_v34 }
 0x21b   : > { %v4869_v44 = vpop.f32.mrf.mxu0 }
 0x21c   : > { %5669 = vst [vmem:[#allocation36_spill] sm:$0xff] %v4869_v44  ;;  %v1389_v44 = vpop.f32.mrf.mxu1 }
 0x21e   : > { %3756 = vmatmul.msk.f32.gmra.mxu0 %vm270_vm1, %v1837_v1 }
 0x223   : > { %v4872_v43 = vpop.f32.mrf.mxu0 }
 0x224   : > { %5670 = vst [vmem:[#allocation37_spill] sm:$0xff] %v4872_v43  ;;  %v532_v43 = vadd.f32 %v4529_v51, %v4432_v20  ;;  %v4886_v3 = vpop.f32.mrf.mxu1  ;;  %v4894_v20 = vpop.f32.mrf.mxu2 }
 0x226   : > { %3757 = vmatmul.msk.f32.gmra.mxu0 %vm270_vm1, %v1838_v62  ;;  %v1753_v62 = vpop.f32.mrf.mxu3  ;;  %v714_v42 = vadd.f32 %v4505_v30, %v532_v43  ;;  %v5674_v30 = vld [vmem:[#allocation16_spill] sm:$0xff] }
 0x22b   : > { %v1249_v2 = vpop.f32.mrf.mxu0 }
 0x22c   : > { %v4876_v34 = vadd.f32 %v1249_v2, %v4802_v24  ;;  %v896_v2 = vadd.f32 %v4697_v19, %v714_v42  ;;  %v1841_v24 = vld [vmem:[#allocation2 + $0xda] sm:$0xff] }
 0x22e   : > { %5671 = vst [vmem:[#allocation38_spill] sm:$0xff] %v4876_v34  ;;  %3758 = vmatmul.msk.f32.gmra.mxu0 %vm270_vm1, %v1839_v39  ;;  %v533_v34 = vadd.f32 %v4529_v51, %v4440_v23 }
 0x230   : > { %v715_v43 = vadd.f32 %v5674_v30, %v533_v34  ;;  %v4912_v34 = vpop.f32.mrf.mxu2 }
 0x232   : > { %v897_v19 = vadd.f32 %v4712_v17, %v715_v43 }
 0x233   : > { %v1252_v1 = vpop.f32.mrf.mxu0 }
 0x234   : > { %v4882_v11 = vadd.f32 %v1252_v1, %v4812_v36  ;;  %v1079_v36 = vadd.f32 %v4575_v31, %v896_v2  ;;  %v4903_v1 = vpop.f32.mrf.mxu1  ;;  %v5676_v2 = vld [vmem:[#allocation23_spill] sm:$0xff] }
 0x236   : > { %5672 = vst [vmem:[#allocation39_spill] sm:$0xff] %v4882_v11  ;;  %3759 = vmatmul.msk.f32.gmra.mxu0 %vm270_vm1, %v1840_v40  ;;  %v4898_v40 = vpop.f32.mrf.mxu3  ;;  %v1261_v42 = vadd.f32 %v4792_v21, %v1079_v36  ;;  %v1842_v11 = vld [vmem:[#allocation2 + $0xe2] sm:$0xff]  ;;  %v5677_v21 = vld [vmem:[#allocation20_spill] sm:$0xff] }
 0x23b   : > { %v1255_v39 = vpop.f32.mrf.mxu0 }
 0x23c   : > { %v4892_v35 = vadd.f32 %v1255_v39, %v4820_v22  ;;  %v5675_v22 = vld [vmem:[#allocation5_spill] sm:$0xff] }
 0x23d   : > { %v534_v39 = vadd.f32 %v4529_v51, %v5675_v22 }
 0x23e   : > { %5673 = vst [vmem:[#allocation40_spill] sm:$0xff] %v4892_v35  ;;  %3760 = vmatmul.msk.f32.gmra.mxu0 %vm270_vm1, %v1841_v24  ;;  %v1443_v35 = vadd.f32 %v1383_v56, %v1261_v42  ;;  %v1080_v24 = vadd.f32 %v5676_v2, %v897_v19  ;;  %v4916_v43 = vpop.f32.mrf.mxu3  ;;  %v5678_v42 = vld [vmem:[#allocation8_spill] sm:$0xff]  ;;  %v4921_v2 = vpop.f32.mrf.mxu1 }
 0x23f   : > { %v716_v36 = vadd.f32 %v5677_v21, %v534_v39 }
 0x240   : > { %v1625_v17 = vadd.f32 %v1565_v12, %v1443_v35  ;;  %v1262_v30 = vadd.f32 %v4804_v5, %v1080_v24  ;;  %v5679_v35 = vld [vmem:[#allocation22_spill] sm:$0xff] }
 0x241   : > { %v898_v4 = vadd.f32 %v4727_v0, %v716_v36 }
 0x242   : > { %v1807_v22 = vadd.f32 %v1747_v26, %v1625_v17  ;;  %v1580_v26 = vpop.f32.mrf.mxu2  ;;  %v5680_v17 = vld [vmem:[#allocation10_spill] sm:$0xff] }
 0x243   : > { %v1258_v23 = vpop.f32.mrf.mxu0 }
 0x244   : > { %v4908_v31 = vadd.f32 %v1258_v23, %v4828_v8  ;;  %v535_v8 = vadd.f32 %v4529_v51, %v5678_v42  ;;  %v1444_v23 = vadd.f32 %v1386_v55, %v1262_v30 }
 0x246   : > { %3761 = vmatmul.msk.f32.gmra.mxu0 %vm270_vm1, %v1842_v11  ;;  %v1081_v11 = vadd.f32 %v4607_v33, %v898_v4  ;;  %v717_v5 = vadd.f32 %v5679_v35, %v535_v8  ;;  %v1626_v12 = vadd.f32 %v1568_v27, %v1444_v23  ;;  %v1762_v21 = vpop.f32.mrf.mxu3  ;;  %v536_v33 = vadd.f32 %v4529_v51, %v5680_v17  ;;  %v5681_v27 = vld [vmem:[#allocation24_spill] sm:$0xff]  ;;  %v5684_v17 = vld [vmem:[#allocation13_spill] sm:$0xff] }
 0x248   : > { %v1263_v0 = vadd.f32 %v4814_v54, %v1081_v11  ;;  %v899_v55 = vadd.f32 %v4740_v59, %v717_v5  ;;  %v1808_v24 = vadd.f32 %v1750_v52, %v1626_v12  ;;  %v1401_v54 = vpop.f32.mrf.mxu1  ;;  %v5682_v11 = vld [vmem:[#allocation12_spill] sm:$0xff] }
 0x24a   : > { %v1445_v4 = vadd.f32 %v1389_v44, %v1263_v0  ;;  %v1583_v23 = vpop.f32.mrf.mxu2 }
 0x24b   : > { %v1929_v56 = vpop.f32.mrf.mxu0 }
 0x24c   : > { %v1989_v19 = vadd.f32 %v1929_v56, %v1807_v22  ;;  %v718_v56 = vadd.f32 %v5681_v27, %v536_v33  ;;  %v1627_v42 = vadd.f32 %v1571_v45, %v1445_v4 }
 0x24e   : > { %v2009_v39 = vmax.f32 %v1989_v19, 0.0  ;;  %3762 = vmatmul.msk.f32.gmra.mxu0 %vm270_vm1, %v4771_v28  ;;  %v1082_v28 = vadd.f32 %v4625_v37, %v899_v55  ;;  %v900_v52 = vadd.f32 %v4752_v9, %v718_v56  ;;  %v1809_v8 = vadd.f32 %v1753_v62, %v1627_v42  ;;  %v1845_v19 = vld [vmem:[#allocation2 + $0x10a] sm:$0xff]  ;;  %v1765_v35 = vpop.f32.mrf.mxu3 }
 0x24f   : > { %v537_v37 = vadd.f32 %v4529_v51, %v5682_v11 }
 0x250   : > { %2030 = vst.msk [vmem:[#allocation3 + $0x1] sm:$0xff] %vm2029_vm5, %v2009_v39  ;;  %v1264_v59 = vadd.f32 %v4822_v29, %v1082_v28  ;;  %v1083_v5 = vadd.f32 %v4641_v41, %v900_v52  ;;  %v5683_v29 = vld [vmem:[#allocation26_spill] sm:$0xff]  ;;  %v1404_v0 = vpop.f32.mrf.mxu1  ;;  %v538_v41 = vadd.f32 %v4529_v51, %v5684_v17 }
 0x251   : > { %v719_v12 = vadd.f32 %v5683_v29, %v537_v37 }
 0x252   : > { %v1446_v39 = vadd.f32 %v4886_v3, %v1264_v59  ;;  %v1265_v62 = vadd.f32 %v4830_v6, %v1083_v5  ;;  %v5685_v59 = vld [vmem:[#allocation15_spill] sm:$0xff]  ;;  %v5687_v5 = vld [vmem:[#allocation4_spill] sm:$0xff] }
 0x253   : > { %v1932_v36 = vpop.f32.mrf.mxu0  ;;  %v901_v55 = vadd.f32 %v4764_v14, %v719_v12 }
 0x254   : > { %v1990_v30 = vadd.f32 %v1932_v36, %v1808_v24  ;;  %v1628_v9 = vadd.f32 %v4894_v20, %v1446_v39  ;;  %v1846_v36 = vld [vmem:[#allocation2 + $0x112] sm:$0xff]  ;;  %v1447_v33 = vadd.f32 %v4903_v1, %v1265_v62  ;;  %v5686_v39 = vld [vmem:[#allocation18_spill] sm:$0xff] }
 0x255   : > { %v1084_v20 = vadd.f32 %v4655_v13, %v901_v55  ;;  %v539_v13 = vadd.f32 %v4529_v51, %v5685_v59 }
 0x256   : > { %v2010_v22 = vmax.f32 %v1990_v30, 0.0  ;;  %3763 = vmatmul.msk.f32.gmra.mxu0 %vm270_vm1, %v4784_v50  ;;  %v1810_v3 = vadd.f32 %v4898_v40, %v1628_v9  ;;  %v1586_v30 = vpop.f32.mrf.mxu2  ;;  %v1768_v6 = vpop.f32.mrf.mxu3  ;;  %v1629_v14 = vadd.f32 %v4912_v34, %v1447_v33 }
 0x257   : > { %v1266_v40 = vadd.f32 %v4835_v60, %v1084_v20  ;;  %v721_v60 = vadd.f32 %v4653_v48, %v539_v13 }
 0x258   : > { %2031 = vst.msk [vmem:[#allocation3 + $0x9] sm:$0xff] %vm2029_vm5, %v2010_v22  ;;  %v720_v22 = vadd.f32 %v4635_v7, %v538_v41  ;;  %v1811_v1 = vadd.f32 %v4916_v43, %v1629_v14  ;;  %v1407_v56 = vpop.f32.mrf.mxu1 }
 0x259   : > { %v1448_v52 = vadd.f32 %v4921_v2, %v1266_v40  ;;  %v903_v2 = vadd.f32 %v5687_v5, %v721_v60  ;;  %v5691_v5 = vld [vmem:[#allocation27_spill] sm:$0xff] }
 0x25a   : > { %v902_v27 = vadd.f32 %v4777_v15, %v720_v22 }
 0x25b   : > { %v1935_v44 = vpop.f32.mrf.mxu0  ;;  %v1086_v12 = vadd.f32 %v4681_v57, %v903_v2  ;;  %v545_v2 = vadd.f32 %v4529_v51, %v5691_v5  ;;  %v5707_v5 = vld [vmem:[#allocation37_spill] sm:$0xff] }
 0x25c   : > { %v1991_v50 = vadd.f32 %v1935_v44, %v1809_v8  ;;  %v1085_v7 = vadd.f32 %v4667_v53, %v902_v27 }
 0x25e   : > { %v2011_v45 = vmax.f32 %v1991_v50, 0.0  ;;  %3764 = vmatmul.msk.f32.gmra.mxu0 %vm270_vm1, %v1845_v19  ;;  %v1589_v34 = vpop.f32.mrf.mxu2  ;;  %v1630_v19 = vadd.f32 %v1580_v26, %v1448_v52  ;;  %v1267_v11 = vadd.f32 %v4840_v63, %v1085_v7  ;;  %v1771_v15 = vpop.f32.mrf.mxu3  ;;  %v540_v50 = vadd.f32 %v4529_v51, %v5686_v39  ;;  %v5690_v39 = vld [vmem:[#allocation14_spill] sm:$0xff] }
 0x25f   : > { %v1268_v63 = vadd.f32 %v4845_v32, %v1086_v12  ;;  %v5692_v12 = vld [vmem:[#allocation30_spill] sm:$0xff] }
 0x260   : > { %2032 = vst.msk [vmem:[#allocation3 + $0x19] sm:$0xff] %vm2029_vm5, %v2011_v45  ;;  %v1812_v43 = vadd.f32 %v1762_v21, %v1630_v19  ;;  %v1449_v45 = vadd.f32 %v1401_v54, %v1267_v11  ;;  %v1410_v53 = vpop.f32.mrf.mxu1  ;;  %v722_v48 = vadd.f32 %v4669_v49, %v540_v50 }
 0x261   : > { %v1450_v17 = vadd.f32 %v1404_v0, %v1268_v63  ;;  %v1270_v0 = vadd.f32 %v4852_v25, %v4710_v10  ;;  %v5689_v10 = vld [vmem:[#allocation25_spill] sm:$0xff] }
 0x262   : > { %v1631_v26 = vadd.f32 %v1583_v23, %v1449_v45  ;;  %v544_v25 = vadd.f32 %v4529_v51, %v5689_v10  ;;  %v5704_v10 = vld [vmem:[#allocation36_spill] sm:$0xff] }
 0x263   : > { %v1938_v24 = vpop.f32.mrf.mxu0 }
 0x264   : > { %v1992_v4 = vadd.f32 %v1938_v24, %v1810_v3  ;;  %v1813_v62 = vadd.f32 %v1765_v35, %v1631_v26  ;;  %v5688_v24 = vld [vmem:[#allocation6_spill] sm:$0xff]  ;;  %v726_v11 = vadd.f32 %v4864_v46, %v544_v25 }
 0x266   : > { %v2012_v28 = vmax.f32 %v1992_v4, 0.0  ;;  %3765 = vmatmul.msk.f32.gmra.mxu0 %vm270_vm1, %v1846_v36  ;;  %v1592_v21 = vpop.f32.mrf.mxu2  ;;  %v1774_v55 = vpop.f32.mrf.mxu3  ;;  %v904_v36 = vadd.f32 %v5688_v24, %v722_v48  ;;  %v1632_v4 = vadd.f32 %v1586_v30, %v1450_v17  ;;  %v908_v50 = vadd.f32 %v5690_v39, %v726_v11  ;;  %v5693_v48 = vld [vmem:[#allocation7_spill] sm:$0xff]  ;;  %v5695_v24 = vld [vmem:[#allocation28_spill] sm:$0xff]  ;;  %v5696_v17 = vld [vmem:[#allocation17_spill] sm:$0xff] }
 0x267   : > { %v727_v26 = vadd.f32 %v5693_v48, %v545_v2 }
 0x268   : > { %2033 = vst.msk [vmem:[#allocation3 + $0x21] sm:$0xff] %vm2029_vm5, %v2012_v28  ;;  %v1087_v41 = vadd.f32 %v4695_v58, %v904_v36  ;;  %v1413_v57 = vpop.f32.mrf.mxu1  ;;  %v1814_v32 = vadd.f32 %v1768_v6, %v1632_v4  ;;  %v546_v36 = vadd.f32 %v4529_v51, %v5695_v24 }
 0x26a   : > { %v1269_v49 = vadd.f32 %v4849_v38, %v1087_v41 }
 0x26b   : > { %v1941_v42 = vpop.f32.mrf.mxu0 }
 0x26c   : > { %v1993_v8 = vadd.f32 %v1941_v42, %v1811_v1  ;;  %v1451_v28 = vadd.f32 %v1407_v56, %v1269_v49  ;;  %v1452_v1 = vadd.f32 %v1410_v53, %v1270_v0  ;;  %v1271_v56 = vadd.f32 %v4855_v47, %v4725_v61 }
 0x26e   : > { %v2013_v44 = vmax.f32 %v1993_v8, 0.0  ;;  %v1595_v23 = vpop.f32.mrf.mxu2  ;;  %v1777_v22 = vpop.f32.mrf.mxu3  ;;  %v1633_v40 = vadd.f32 %v1589_v34, %v1451_v28  ;;  %v1634_v13 = vadd.f32 %v1592_v21, %v1452_v1 }
 0x270   : > { %2034 = vst.msk [vmem:[#allocation3 + $0x31] sm:$0xff] %vm2029_vm5, %v2013_v44  ;;  %v1416_v58 = vpop.f32.mrf.mxu1  ;;  %v1815_v27 = vadd.f32 %v1771_v15, %v1633_v40  ;;  %v1816_v52 = vadd.f32 %v1774_v55, %v1634_v13  ;;  %v1453_v44 = vadd.f32 %v1413_v57, %v1271_v56  ;;  %v5697_v57 = vld [vmem:[#allocation31_spill] sm:$0xff] }
 0x272   : > { %v1635_v15 = vadd.f32 %v1595_v23, %v1453_v44  ;;  %v5698_v23 = vld [vmem:[#allocation9_spill] sm:$0xff] }
 0x273   : > { %v1944_v37 = vpop.f32.mrf.mxu0 }
 0x274   : > { %v1994_v29 = vadd.f32 %v1944_v37, %v1812_v43  ;;  %v1272_v43 = vadd.f32 %v4858_v16, %v4738_v18  ;;  %v1817_v47 = vadd.f32 %v1777_v22, %v1635_v15  ;;  %v5694_v18 = vld [vmem:[#allocation34_spill] sm:$0xff] }
 0x276   : > { %v2014_v9 = vmax.f32 %v1994_v29, 0.0  ;;  %v1598_v42 = vpop.f32.mrf.mxu2  ;;  %v1780_v6 = vpop.f32.mrf.mxu3  ;;  %v1454_v45 = vadd.f32 %v1416_v58, %v1272_v43  ;;  %v5700_v58 = vld [vmem:[#allocation29_spill] sm:$0xff] }
 0x278   : > { %2035 = vst.msk [vmem:[#allocation3 + $0x39] sm:$0xff] %vm2029_vm5, %v2014_v9  ;;  %v1419_v8 = vpop.f32.mrf.mxu1  ;;  %v1091_v9 = vadd.f32 %v5692_v12, %v908_v50  ;;  %v1636_v63 = vadd.f32 %v1598_v42, %v1454_v45 }
 0x27a   : > { %v1273_v16 = vadd.f32 %v5694_v18, %v1091_v9 }
 0x27b   : > { %v1947_v3 = vpop.f32.mrf.mxu0 }
 0x27c   : > { %v1995_v54 = vadd.f32 %v1947_v3, %v1813_v62  ;;  %v1818_v62 = vadd.f32 %v1780_v6, %v1636_v63  ;;  %v1455_v41 = vadd.f32 %v1419_v8, %v1273_v16  ;;  %v5702_v6 = vld [vmem:[#allocation32_spill] sm:$0xff] }
 0x27e   : > { %v2015_v33 = vmax.f32 %v1995_v54, 0.0  ;;  %v1601_v19 = vpop.f32.mrf.mxu2  ;;  %v1783_v61 = vpop.f32.mrf.mxu3  ;;  %v909_v54 = vadd.f32 %v5696_v17, %v727_v26 }
 0x27f   : > { %v1637_v28 = vadd.f32 %v1601_v19, %v1455_v41  ;;  %v5705_v19 = vld [vmem:[#allocation21_spill] sm:$0xff] }
 0x280   : > { %2036 = vst.msk [vmem:[#allocation3 + $0x49] sm:$0xff] %vm2029_vm5, %v2015_v33  ;;  %v1422_v53 = vpop.f32.mrf.mxu1  ;;  %v1092_v4 = vadd.f32 %v5697_v57, %v909_v54  ;;  %v5709_v54 = vmov 0.0  }
 0x281   : > { %2051 = vst.msk [vmem:[#allocation3] sm:$0x1] %vm2050_vm6, %v5709_v54 }
 0x282   : > { %2052 = vst.msk [vmem:[#allocation3 + $0x18] sm:$0x1] %vm2050_vm6, %v5709_v54 }
 0x283   : > { %v1950_v20 = vpop.f32.mrf.mxu0  ;;  %2053 = vst.msk [vmem:[#allocation3 + $0x30] sm:$0x1] %vm2050_vm6, %v5709_v54 }
 0x284   : > { %v1996_v35 = vadd.f32 %v1950_v20, %v1814_v32  ;;  %v728_v20 = vadd.f32 %v5698_v23, %v546_v36  ;;  %2054 = vst.msk [vmem:[#allocation3 + $0x48] sm:$0x1] %vm2050_vm6, %v5709_v54 }
 0x285   : > { %2055 = vst.msk [vmem:[#allocation3 + $0x60] sm:$0x1] %vm2050_vm6, %v5709_v54 }
 0x286   : > { %v2016_v14 = vmax.f32 %v1996_v35, 0.0  ;;  %v1604_v21 = vpop.f32.mrf.mxu2  ;;  %v1786_v55 = vpop.f32.mrf.mxu3  ;;  %v5699_v35 = vld [vmem:[#allocation35_spill] sm:$0xff]  ;;  %2056 = vst.msk [vmem:[#allocation3 + $0x78] sm:$0x1] %vm2050_vm6, %v5709_v54 }
 0x287   : > { %v1274_v22 = vadd.f32 %v5699_v35, %v1092_v4  ;;  %v5710_v4 = vld [vmem:[#allocation39_spill] sm:$0xff]  ;;  %2057 = vst.msk [vmem:[#allocation3 + $0x90] sm:$0x1] %vm2050_vm6, %v5709_v54 }
 0x288   : > { %2037 = vst.msk [vmem:[#allocation3 + $0x51] sm:$0xff] %vm2029_vm5, %v2016_v14  ;;  %v1425_v32 = vpop.f32.mrf.mxu1  ;;  %v1819_v14 = vadd.f32 %v1783_v61, %v1637_v28  ;;  %v5706_v61 = vld [vmem:[#allocation33_spill] sm:$0xff] }
 0x289   : > { %2058 = vst.msk [vmem:[#allocation3 + $0xa8] sm:$0x1] %vm2050_vm6, %v5709_v54 }
 0x28a   : > { %2059 = vst.msk [vmem:[#allocation3 + $0xc0] sm:$0x1] %vm2050_vm6, %v5709_v54 }
 0x28b   : > { %v1953_v30 = vpop.f32.mrf.mxu0  ;;  %2060 = vst.msk [vmem:[#allocation3 + $0xd8] sm:$0x1] %vm2050_vm6, %v5709_v54 }
 0x28c   : > { %v1997_v38 = vadd.f32 %v1953_v30, %v1815_v27  ;;  %v547_v27 = vadd.f32 %v4529_v51, %v5700_v58  ;;  %v5701_v30 = vld [vmem:[#allocation19_spill] sm:$0xff]  ;;  %2061 = vst.msk [vmem:[#allocation3 + $0x11] sm:$0x1] %vm2050_vm6, %v5709_v54 }
 0x28d   : > { %v910_v1 = vadd.f32 %v5701_v30, %v728_v20  ;;  %2062 = vst.msk [vmem:[#allocation3 + $0x29] sm:$0x1] %vm2050_vm6, %v5709_v54 }
 0x28e   : > { %v2017_v59 = vmax.f32 %v1997_v38, 0.0  ;;  %v1607_v40 = vpop.f32.mrf.mxu2  ;;  %v1456_v38 = vadd.f32 %v1422_v53, %v1274_v22  ;;  %2063 = vst.msk [vmem:[#allocation3 + $0x41] sm:$0x1] %vm2050_vm6, %v5709_v54 }
 0x28f   : > { %v1093_v13 = vadd.f32 %v5702_v6, %v910_v1  ;;  %2064 = vst.msk [vmem:[#allocation3 + $0x59] sm:$0x1] %vm2050_vm6, %v5709_v54 }
 0x290   : > { %2038 = vst.msk [vmem:[#allocation3 + $0x61] sm:$0xff] %vm2029_vm5, %v2017_v59  ;;  %v1789_v59 = vpop.f32.mrf.mxu3  ;;  %v1428_v44 = vpop.f32.mrf.mxu1 }
 0x291   : > { %v1275_v25 = vadd.f32 %v5704_v10, %v1093_v13  ;;  %2065 = vst.msk [vmem:[#allocation3 + $0x71] sm:$0x1] %vm2050_vm6, %v5709_v54 }
 0x292   : > { %2066 = vst.msk [vmem:[#allocation3 + $0x89] sm:$0x1] %vm2050_vm6, %v5709_v54 }
 0x293   : > { %v1956_v7 = vpop.f32.mrf.mxu0  ;;  %v1457_v11 = vadd.f32 %v1425_v32, %v1275_v25  ;;  %2067 = vst.msk [vmem:[#allocation3 + $0xa1] sm:$0x1] %vm2050_vm6, %v5709_v54 }
 0x294   : > { %v1998_v34 = vadd.f32 %v1956_v7, %v1816_v52  ;;  %v5703_v52 = vld [vmem:[#allocation11_spill] sm:$0xff]  ;;  %v1638_v7 = vadd.f32 %v1604_v21, %v1456_v38  ;;  %v5708_v21 = vld [vmem:[#allocation38_spill] sm:$0xff]  ;;  %2068 = vst.msk [vmem:[#allocation3 + $0xb9] sm:$0x1] %vm2050_vm6, %v5709_v54 }
 0x295   : > { %v729_v8 = vadd.f32 %v5703_v52, %v547_v27  ;;  %v1639_v50 = vadd.f32 %v1607_v40, %v1457_v11  ;;  %v5711_v40 = vld [vmem:[#allocation40_spill] sm:$0xff]  ;;  %2069 = vst.msk [vmem:[#allocation3 + $0xd1] sm:$0x1] %vm2050_vm6, %v5709_v54 }
 0x296   : > { %v2018_v60 = vmax.f32 %v1998_v34, 0.0  ;;  %v1820_v34 = vadd.f32 %v1786_v55, %v1638_v7  ;;  %v1610_v43 = vpop.f32.mrf.mxu2  ;;  %2070 = vst.msk [vmem:[#allocation3 + $0xe9] sm:$0x1] %vm2050_vm6, %v5709_v54 }
 0x297   : > { %v911_v51 = vadd.f32 %v5705_v19, %v729_v8  ;;  %v1821_v45 = vadd.f32 %v1789_v59, %v1639_v50 }
 0x298   : > { %2039 = vst.msk [vmem:[#allocation3 + $0x69] sm:$0xff] %vm2029_vm5, %v2018_v60  ;;  %v1792_v39 = vpop.f32.mrf.mxu3 }
 0x29b   : > { %v1959_v37 = vpop.f32.mrf.mxu0 }
 0x29c   : > { %v1999_v29 = vadd.f32 %v1959_v37, %v1817_v47  ;;  %v1094_v47 = vadd.f32 %v5706_v61, %v911_v51 }
 0x29e   : > { %v2019_v46 = vmax.f32 %v1999_v29, 0.0  ;;  %v1276_v2 = vadd.f32 %v5707_v5, %v1094_v47  ;;  %v1431_v29 = vpop.f32.mrf.mxu1  ;;  %v1613_v48 = vpop.f32.mrf.mxu2 }
 0x2a0   : > { %2040 = vst.msk [vmem:[#allocation3 + $0x79] sm:$0xff] %vm2029_vm5, %v2019_v46  ;;  %v1458_v12 = vadd.f32 %v1428_v44, %v1276_v2  ;;  %v1795_v63 = vpop.f32.mrf.mxu3 }
 0x2a2   : > { %v1640_v26 = vadd.f32 %v1610_v43, %v1458_v12 }
 0x2a3   : > { %v1962_v3 = vpop.f32.mrf.mxu0 }
 0x2a4   : > { %v2000_v33 = vadd.f32 %v1962_v3, %v1818_v62  ;;  %v1822_v18 = vadd.f32 %v1792_v39, %v1640_v26  ;;  %v1459_v62 = vadd.f32 %v1431_v29, %v5708_v21 }
 0x2a6   : > { %v2020_v49 = vmax.f32 %v2000_v33, 0.0  ;;  %v1434_v3 = vpop.f32.mrf.mxu1  ;;  %v1641_v36 = vadd.f32 %v1613_v48, %v1459_v62  ;;  %v1616_v17 = vpop.f32.mrf.mxu2 }
 0x2a8   : > { %2041 = vst.msk [vmem:[#allocation3 + $0x81] sm:$0xff] %vm2029_vm5, %v2020_v49  ;;  %v1823_v41 = vadd.f32 %v1795_v63, %v1641_v36  ;;  %v1798_v33 = vpop.f32.mrf.mxu3  ;;  %v1460_v49 = vadd.f32 %v1434_v3, %v5710_v4 }
 0x2aa   : > { %v1642_v28 = vadd.f32 %v1616_v17, %v1460_v49 }
 0x2ab   : > { %v1965_v0 = vpop.f32.mrf.mxu0 }
 0x2ac   : > { %v2001_v42 = vadd.f32 %v1965_v0, %v1819_v14  ;;  %v1824_v35 = vadd.f32 %v1798_v33, %v1642_v28 }
 0x2ae   : > { %v2021_v56 = vmax.f32 %v2001_v42, 0.0  ;;  %v1437_v20 = vpop.f32.mrf.mxu1  ;;  %v1619_v22 = vpop.f32.mrf.mxu2 }
 0x2af   : > { %v1461_v0 = vadd.f32 %v1437_v20, %v5711_v40 }
 0x2b0   : > { %2042 = vst.msk [vmem:[#allocation3 + $0x91] sm:$0xff] %vm2029_vm5, %v2021_v56  ;;  %v1801_v27 = vpop.f32.mrf.mxu3 }
 0x2b1   : > { %v1643_v1 = vadd.f32 %v1619_v22, %v1461_v0 }
 0x2b3   : > { %v1968_v60 = vpop.f32.mrf.mxu0  ;;  %v1825_v42 = vadd.f32 %v1801_v27, %v1643_v1 }
 0x2b4   : > { %v2002_v15 = vadd.f32 %v1968_v60, %v1820_v34 }
 0x2b6   : > { %v2022_v37 = vmax.f32 %v2002_v15, 0.0  ;;  %v1440_v38 = vpop.f32.mrf.mxu1  ;;  %v1622_v56 = vpop.f32.mrf.mxu2 }
 0x2b7   : > { %v1462_v6 = vadd.f32 %v1440_v38, %v4908_v31 }
 0x2b8   : > { %2043 = vst.msk [vmem:[#allocation3 + $0x99] sm:$0xff] %vm2029_vm5, %v2022_v37  ;;  %v1804_v8 = vpop.f32.mrf.mxu3 }
 0x2b9   : > { %v1644_v7 = vadd.f32 %v1622_v56, %v1462_v6 }
 0x2bb   : > { %v1971_v53 = vpop.f32.mrf.mxu0  ;;  %v1826_v10 = vadd.f32 %v1804_v8, %v1644_v7 }
 0x2bc   : > { %v2003_v9 = vadd.f32 %v1971_v53, %v1821_v45 }
 0x2be   : > { %v2023_v46 = vmax.f32 %v2003_v9, 0.0 }
 0x2c0   : > { %2044 = vst.msk [vmem:[#allocation3 + $0xa9] sm:$0xff] %vm2029_vm5, %v2023_v46 }
 0x2c3   : > { %v1974_v16 = vpop.f32.mrf.mxu0 }
 0x2c4   : > { %v2004_v55 = vadd.f32 %v1974_v16, %v1822_v18 }
 0x2c6   : > { %v2024_v24 = vmax.f32 %v2004_v55, 0.0 }
 0x2c8   : > { %2045 = vst.msk [vmem:[#allocation3 + $0xb1] sm:$0xff] %vm2029_vm5, %v2024_v24 }
 0x2cb   : > { %v1977_v57 = vpop.f32.mrf.mxu0 }
 0x2cc   : > { %v2005_v32 = vadd.f32 %v1977_v57, %v1823_v41 }
 0x2ce   : > { %v2025_v23 = vmax.f32 %v2005_v32, 0.0 }
 0x2d0   : > { %2046 = vst.msk [vmem:[#allocation3 + $0xc1] sm:$0xff] %vm2029_vm5, %v2025_v23 }
 0x2d3   : > { %v1980_v14 = vpop.f32.mrf.mxu0 }
 0x2d4   : > { %v2006_v58 = vadd.f32 %v1980_v14, %v1824_v35 }
 0x2d6   : > { %v2026_v30 = vmax.f32 %v2006_v58, 0.0 }
 0x2d8   : > { %2047 = vst.msk [vmem:[#allocation3 + $0xc9] sm:$0xff] %vm2029_vm5, %v2026_v30 }
 0x2db   : > { %v1983_v59 = vpop.f32.mrf.mxu0 }
 0x2dc   : > { %v2007_v13 = vadd.f32 %v1983_v59, %v1825_v42 }
 0x2de   : > { %v2027_v52 = vmax.f32 %v2007_v13, 0.0 }
 0x2e0   : > { %2048 = vst.msk [vmem:[#allocation3 + $0xd9] sm:$0xff] %vm2029_vm5, %v2027_v52 }
 0x2e3   : > { %v1986_v25 = vpop.f32.mrf.mxu0 }
 0x2e4   : > { %v2008_v44 = vadd.f32 %v1986_v25, %v1826_v10  ;;  %2073 = sbr.rel (%p3560_p8) target bundleno = 749 (0x2ed), region = 60 }
 0x2e6   : > { %v2028_v31 = vmax.f32 %v2008_v44, 0.0 }
 0x2e8   : > { %2049 = vst.msk [vmem:[#allocation3 + $0xe1] sm:$0xff] %vm2029_vm5, %v2028_v31 }
 0x2e9   : > { %vm2076_vm7 = vcmask 58368   ;;  %v4018_v34 = vmov 0.0  }
 0x2ea   : > { %2074 = vst.msk [vmem:[#allocation3] sm:$0xff] %vm2029_vm5, %v4018_v34 }
 0x2eb   : > { %2075 = vst.msk [vmem:[#allocation3 + $0x8] sm:$0xff] %vm2029_vm5, %v4018_v34 }
 0x2ec   : > { %2077 = vst.msk [vmem:[#allocation3 + $0x10] sm:$0x3] %vm2076_vm7, %v4018_v34 }
 0x2ed PF: > { %2080 = sbr.rel (%p3568_p10) target bundleno = 758 (0x2f6), region = 64 }
 0x2f2   : > { %vm2084_vm8 = vcmask 58368   ;;  %v4019_v60 = vmov 0.0  }
 0x2f3   : > { %2082 = vst.msk [vmem:[#allocation3 + $0xd8] sm:$0xff] %vm2029_vm5, %v4019_v60 }
 0x2f4   : > { %2083 = vst.msk [vmem:[#allocation3 + $0xe0] sm:$0xff] %vm2029_vm5, %v4019_v60 }
 0x2f5   : > { %2085 = vst.msk [vmem:[#allocation3 + $0xe8] sm:$0x3] %vm2084_vm8, %v4019_v60 }
 0x2f6 PF: > { %v2106_v19 = vld [vmem:[%s5632_s3] sm:$0xff]  ;;  %v3784_v51 = vld [vmem:[%s5632_s3 + $0x8] sm:$0xff]  ;;  %v3801_v61 = vld [vmem:[%s5632_s3 + $0x10] sm:$0xff] }
 0x2f7   : > { %v2090_v11 = vld [vmem:[#allocation3] sm:$0xff]  ;;  %2170 = vmatpush.msra.mxu1 %v2106_v19  ;;  %2317 = vmatpush.msra.mxu2 %v3784_v51  ;;  %v3818_v37 = vld [vmem:[%s5632_s3 + $0x18] sm:$0xff]  ;;  %v2091_v39 = vld [vmem:[#allocation3 + $0x8] sm:$0xff] }
 0x2f8   : > { %v2236_v15 = vld [vmem:[#allocation3 + $0x1] sm:$0xff]  ;;  %3768 = vmatmul.msk.f32.vlgmr.msra.gmra.mxu1 %vm2029_vm5, %v2090_v11  ;;  %2464 = vmatpush.msra.mxu3 %v3801_v61  ;;  %v2237_v50 = vld [vmem:[#allocation3 + $0x9] sm:$0xff]  ;;  %v5095_v2 = vld [vmem:[#allocation3 + $0x18] sm:$0xff] }
 0x2f9   : > { %v3835_v43 = vld [vmem:[%s5632_s3 + $0x20] sm:$0xff]  ;;  %3785 = vmatmul.msk.f32.vlgmr.msra.gmra.mxu2 %vm2029_vm5, %v2236_v15  ;;  %2612 = vmatpush.msrb.mxu1 %v3818_v37  ;;  %v2384_v5 = vld [vmem:[#allocation3 + $0xa] sm:$0xff]  ;;  %v5123_v26 = vld [vmem:[#allocation3 + $0x32] sm:$0xff] }
 0x2fa   : > { %v2383_v47 = vld [vmem:[#allocation3 + $0x2] sm:$0xff]  ;;  %2759 = vmatpush.msrb.mxu2 %v3835_v43  ;;  %v5097_v45 = vld [vmem:[#allocation3 + $0x19] sm:$0xff]  ;;  %v5119_v46 = vld [vmem:[#allocation3 + $0x30] sm:$0xff] }
 0x2fb   : > { %3802 = vmatmul.msk.f32.vlgmr.msra.gmra.mxu3 %vm2029_vm5, %v2383_v47  ;;  %v5099_v29 = vld [vmem:[#allocation3 + $0x1a] sm:$0xff]  ;;  %v5111_v9 = vld [vmem:[#allocation3 + $0x22] sm:$0xff]  ;;  %v5121_v48 = vld [vmem:[#allocation3 + $0x31] sm:$0xff] }
 0x2fc   : > { %v5107_v53 = vld [vmem:[#allocation3 + $0x20] sm:$0xff]  ;;  %v5131_v63 = vld [vmem:[#allocation3 + $0x38] sm:$0xff]  ;;  %v5143_v21 = vld [vmem:[#allocation3 + $0x48] sm:$0xff] }
 0x2fd   : > { %v5109_v12 = vld [vmem:[#allocation3 + $0x21] sm:$0xff]  ;;  %v5133_v18 = vld [vmem:[#allocation3 + $0x39] sm:$0xff]  ;;  %v5145_v62 = vld [vmem:[#allocation3 + $0x49] sm:$0xff] }
 0x2fe   : > { %v5135_v16 = vld [vmem:[#allocation3 + $0x3a] sm:$0xff]  ;;  %v5147_v55 = vld [vmem:[#allocation3 + $0x4a] sm:$0xff]  ;;  %v5159_v36 = vld [vmem:[#allocation3 + $0x52] sm:$0xff] }
 0x2ff   : > { %v5155_v3 = vld [vmem:[#allocation3 + $0x50] sm:$0xff]  ;;  %v5167_v17 = vld [vmem:[#allocation3 + $0x60] sm:$0xff]  ;;  %v5179_v33 = vld [vmem:[#allocation3 + $0x68] sm:$0xff] }
 0x300   : > { %3769 = vmatmul.msk.f32.gmra.mxu1 %vm2029_vm5, %v2091_v39  ;;  %v5157_v24 = vld [vmem:[#allocation3 + $0x51] sm:$0xff]  ;;  %v5169_v54 = vld [vmem:[#allocation3 + $0x61] sm:$0xff]  ;;  %v5181_v57 = vld [vmem:[#allocation3 + $0x69] sm:$0xff] }
 0x301   : > { %3786 = vmatmul.msk.f32.gmra.mxu2 %vm2029_vm5, %v2237_v50  ;;  %v5171_v41 = vld [vmem:[#allocation3 + $0x62] sm:$0xff]  ;;  %v5183_v4 = vld [vmem:[#allocation3 + $0x6a] sm:$0xff]  ;;  %v5191_v49 = vld [vmem:[#allocation3 + $0x78] sm:$0xff] }
 0x302   : > { %v5193_v32 = vld [vmem:[#allocation3 + $0x79] sm:$0xff]  ;;  %v5205_v28 = vld [vmem:[#allocation3 + $0x81] sm:$0xff]  ;;  %v5218_v14 = vld [vmem:[#allocation3 + $0x90] sm:$0xff] }
 0x303   : > { %3803 = vmatmul.msk.f32.gmra.mxu3 %vm2029_vm5, %v2384_v5  ;;  %v5195_v23 = vld [vmem:[#allocation3 + $0x7a] sm:$0xff]  ;;  %v5207_v35 = vld [vmem:[#allocation3 + $0x82] sm:$0xff]  ;;  %v5220_v40 = vld [vmem:[#allocation3 + $0x91] sm:$0xff] }
 0x304   : > { %v5203_v20 = vld [vmem:[#allocation3 + $0x80] sm:$0xff]  ;;  %v3852_v22 = vld [vmem:[%s5632_s3 + $0x28] sm:$0xff]  ;;  %v5222_v0 = vld [vmem:[#allocation3 + $0x92] sm:$0xff] }
 0x305   : > { %2906 = vmatpush.msrb.mxu3 %v3852_v22  ;;  %v3903_v58 = vld [vmem:[%s5632_s3 + $0x40] sm:$0xff]  ;;  %v3886_v27 = vld [vmem:[%s5632_s3 + $0x38] sm:$0xff]  ;;  %v3869_v42 = vld [vmem:[%s5632_s3 + $0x30] sm:$0xff] }
 0x306   : > { %3348 = vmatpush.msra.mxu2 %v3903_v58  ;;  %v5236_v30 = vld [vmem:[#allocation3 + $0x98] sm:$0xff]  ;;  %3201 = vmatpush.msra.mxu1 %v3886_v27  ;;  %v5253_v59 = vld [vmem:[#allocation3 + $0xa8] sm:$0xff]  ;;  %v5267_v56 = vld [vmem:[#allocation3 + $0xb0] sm:$0xff] }
 0x307   : > { %v5238_v1 = vld [vmem:[#allocation3 + $0x99] sm:$0xff]  ;;  %3054 = vmatpush.msra.mxu0 %v3869_v42  ;;  %v5255_v6 = vld [vmem:[#allocation3 + $0xa9] sm:$0xff]  ;;  %v5269_v52 = vld [vmem:[#allocation3 + $0xb1] sm:$0xff] }
 0x308   : > { %3770 = vmatmul.msk.f32.gmra.mxu1 %vm2029_vm5, %v5095_v2  ;;  %v5240_v38 = vld [vmem:[#allocation3 + $0x9a] sm:$0xff]  ;;  %3870 = vmatmul.msk.f32.vlgmr.msra.gmra.mxu0 %vm2029_vm5, %v5119_v46  ;;  %v5257_v13 = vld [vmem:[#allocation3 + $0xaa] sm:$0xff]  ;;  %v5271_v8 = vld [vmem:[#allocation3 + $0xb2] sm:$0xff] }
 0x309   : > { %3787 = vmatmul.msk.f32.gmra.mxu2 %vm2029_vm5, %v5097_v45  ;;  %v5284_v7 = vld [vmem:[%s5633_s4] ss:$0 sm:$0xff] }
 0x30b   : > { %3804 = vmatmul.msk.f32.gmra.mxu3 %vm2029_vm5, %v5099_v29 }
 0x310   : > { %3771 = vmatmul.msk.f32.gmra.mxu1 %vm2029_vm5, %v5107_v53  ;;  %3871 = vmatmul.msk.f32.gmra.mxu0 %vm2029_vm5, %v5131_v63 }
 0x311   : > { %3788 = vmatmul.msk.f32.gmra.mxu2 %vm2029_vm5, %v5109_v12 }
 0x313   : > { %3805 = vmatmul.msk.f32.gmra.mxu3 %vm2029_vm5, %v5111_v9 }
 0x318   : > { %3772 = vmatmul.msk.f32.gmra.mxu1 %vm2029_vm5, %v5119_v46  ;;  %3872 = vmatmul.msk.f32.gmra.mxu0 %vm2029_vm5, %v5143_v21 }
 0x319   : > { %3789 = vmatmul.msk.f32.gmra.mxu2 %vm2029_vm5, %v5121_v48 }
 0x31b   : > { %3806 = vmatmul.msk.f32.gmra.mxu3 %vm2029_vm5, %v5123_v26 }
 0x320   : > { %3773 = vmatmul.msk.f32.gmra.mxu1 %vm2029_vm5, %v5131_v63  ;;  %3873 = vmatmul.msk.f32.gmra.mxu0 %vm2029_vm5, %v5155_v3 }
 0x321   : > { %3790 = vmatmul.msk.f32.gmra.mxu2 %vm2029_vm5, %v5133_v18 }
 0x323   : > { %3807 = vmatmul.msk.f32.gmra.mxu3 %vm2029_vm5, %v5135_v16 }
 0x328   : > { %3774 = vmatmul.msk.f32.gmra.mxu1 %vm2029_vm5, %v5143_v21  ;;  %3874 = vmatmul.msk.f32.gmra.mxu0 %vm2029_vm5, %v5167_v17 }
 0x329   : > { %3791 = vmatmul.msk.f32.gmra.mxu2 %vm2029_vm5, %v5145_v62 }
 0x32b   : > { %3808 = vmatmul.msk.f32.gmra.mxu3 %vm2029_vm5, %v5147_v55 }
 0x330   : > { %3775 = vmatmul.msk.f32.gmra.mxu1 %vm2029_vm5, %v5155_v3  ;;  %3875 = vmatmul.msk.f32.gmra.mxu0 %vm2029_vm5, %v5179_v33 }
 0x331   : > { %3792 = vmatmul.msk.f32.gmra.mxu2 %vm2029_vm5, %v5157_v24 }
 0x333   : > { %3809 = vmatmul.msk.f32.gmra.mxu3 %vm2029_vm5, %v5159_v36 }
 0x338   : > { %3776 = vmatmul.msk.f32.gmra.mxu1 %vm2029_vm5, %v5167_v17  ;;  %3876 = vmatmul.msk.f32.gmra.mxu0 %vm2029_vm5, %v5191_v49 }
 0x339   : > { %3793 = vmatmul.msk.f32.gmra.mxu2 %vm2029_vm5, %v5169_v54 }
 0x33b   : > { %3810 = vmatmul.msk.f32.gmra.mxu3 %vm2029_vm5, %v5171_v41 }
 0x340   : > { %3777 = vmatmul.msk.f32.gmra.mxu1 %vm2029_vm5, %v5179_v33  ;;  %3877 = vmatmul.msk.f32.gmra.mxu0 %vm2029_vm5, %v5203_v20 }
 0x341   : > { %3794 = vmatmul.msk.f32.gmra.mxu2 %vm2029_vm5, %v5181_v57 }
 0x343   : > { %3811 = vmatmul.msk.f32.gmra.mxu3 %vm2029_vm5, %v5183_v4 }
 0x348   : > { %3778 = vmatmul.msk.f32.gmra.mxu1 %vm2029_vm5, %v5191_v49  ;;  %3878 = vmatmul.msk.f32.gmra.mxu0 %vm2029_vm5, %v5218_v14 }
 0x349   : > { %3795 = vmatmul.msk.f32.gmra.mxu2 %vm2029_vm5, %v5193_v32 }
 0x34b   : > { %3812 = vmatmul.msk.f32.gmra.mxu3 %vm2029_vm5, %v5195_v23 }
 0x350   : > { %3779 = vmatmul.msk.f32.gmra.mxu1 %vm2029_vm5, %v5203_v20  ;;  %3879 = vmatmul.msk.f32.gmra.mxu0 %vm2029_vm5, %v5236_v30 }
 0x351   : > { %3796 = vmatmul.msk.f32.gmra.mxu2 %vm2029_vm5, %v5205_v28 }
 0x353   : > { %3813 = vmatmul.msk.f32.gmra.mxu3 %vm2029_vm5, %v5207_v35 }
 0x358   : > { %3780 = vmatmul.msk.f32.gmra.mxu1 %vm2029_vm5, %v5218_v14  ;;  %3880 = vmatmul.msk.f32.gmra.mxu0 %vm2029_vm5, %v5253_v59 }
 0x359   : > { %3797 = vmatmul.msk.f32.gmra.mxu2 %vm2029_vm5, %v5220_v40 }
 0x35b   : > { %3814 = vmatmul.msk.f32.gmra.mxu3 %vm2029_vm5, %v5222_v0 }
 0x360   : > { %3781 = vmatmul.msk.f32.gmra.mxu1 %vm2029_vm5, %v5236_v30  ;;  %3881 = vmatmul.msk.f32.gmra.mxu0 %vm2029_vm5, %v5267_v56 }
 0x361   : > { %3798 = vmatmul.msk.f32.gmra.mxu2 %vm2029_vm5, %v5238_v1 }
 0x363   : > { %3815 = vmatmul.msk.f32.gmra.mxu3 %vm2029_vm5, %v5240_v38 }
 0x368   : > { %3782 = vmatmul.msk.f32.gmra.mxu1 %vm2029_vm5, %v5253_v59 }
 0x369   : > { %3799 = vmatmul.msk.f32.gmra.mxu2 %vm2029_vm5, %v5255_v6 }
 0x36b   : > { %3816 = vmatmul.msk.f32.gmra.mxu3 %vm2029_vm5, %v5257_v13 }
 0x370   : > { %3783 = vmatmul.msk.f32.gmra.mxu1 %vm2029_vm5, %v5267_v56 }
 0x371   : > { %3800 = vmatmul.msk.f32.gmra.mxu2 %vm2029_vm5, %v5269_v52 }
 0x373   : > { %3817 = vmatmul.msk.f32.gmra.mxu3 %vm2029_vm5, %v5271_v8 }
 0x375   : > { %v2172_v10 = vpop.f32.mrf.mxu1 }
 0x376   : > { %v2220_v25 = vadd.f32 %v5284_v7, %v2172_v10 }
 0x378   : > { %3819 = vmatmul.msk.f32.vlgmr.msrb.gmra.mxu1 %vm2029_vm5, %v5095_v2 }
 0x379   : > { %3836 = vmatmul.msk.f32.vlgmr.msrb.gmra.mxu2 %vm2029_vm5, %v5097_v45 }
 0x37b   : > { %3853 = vmatmul.msk.f32.vlgmr.msrb.gmra.mxu3 %vm2029_vm5, %v5099_v29 }
 0x37c   : > { %v2319_v44 = vpop.f32.mrf.mxu2 }
 0x37d   : > { %v2367_v31 = vadd.f32 %v2319_v44, %v2220_v25  ;;  %v2175_v34 = vpop.f32.mrf.mxu1 }
 0x37e   : > { %v2466_v60 = vpop.f32.mrf.mxu3  ;;  %v2221_v51 = vadd.f32 %v5284_v7, %v2175_v34 }
 0x37f   : > { %v5295_v19 = vadd.f32 %v2466_v60, %v2367_v31 }
 0x380   : > { %3820 = vmatmul.msk.f32.gmra.mxu1 %vm2029_vm5, %v5107_v53 }
 0x381   : > { %3837 = vmatmul.msk.f32.gmra.mxu2 %vm2029_vm5, %v5109_v12 }
 0x383   : > { %3854 = vmatmul.msk.f32.gmra.mxu3 %vm2029_vm5, %v5111_v9 }
 0x384   : > { %v2322_v11 = vpop.f32.mrf.mxu2 }
 0x385   : > { %v2368_v15 = vadd.f32 %v2322_v11, %v2221_v51  ;;  %v2178_v43 = vpop.f32.mrf.mxu1 }
 0x386   : > { %v2469_v61 = vpop.f32.mrf.mxu3  ;;  %v2222_v37 = vadd.f32 %v5284_v7, %v2178_v43 }
 0x387   : > { %v5306_v47 = vadd.f32 %v2469_v61, %v2368_v15 }
 0x388   : > { %3821 = vmatmul.msk.f32.gmra.mxu1 %vm2029_vm5, %v5119_v46 }
 0x389   : > { %3838 = vmatmul.msk.f32.gmra.mxu2 %vm2029_vm5, %v5121_v48 }
 0x38b   : > { %3855 = vmatmul.msk.f32.gmra.mxu3 %vm2029_vm5, %v5123_v26 }
 0x38c   : > { %v2325_v39 = vpop.f32.mrf.mxu2 }
 0x38d   : > { %v2369_v50 = vadd.f32 %v2325_v39, %v2222_v37  ;;  %v2181_v5 = vpop.f32.mrf.mxu1 }
 0x38e   : > { %v2472_v2 = vpop.f32.mrf.mxu3  ;;  %v2223_v29 = vadd.f32 %v5284_v7, %v2181_v5 }
 0x38f   : > { %v5317_v45 = vadd.f32 %v2472_v2, %v2369_v50 }
 0x390   : > { %3822 = vmatmul.msk.f32.gmra.mxu1 %vm2029_vm5, %v5131_v63 }
 0x391   : > { %3839 = vmatmul.msk.f32.gmra.mxu2 %vm2029_vm5, %v5133_v18 }
 0x393   : > { %3856 = vmatmul.msk.f32.gmra.mxu3 %vm2029_vm5, %v5135_v16 }
 0x394   : > { %v2328_v53 = vpop.f32.mrf.mxu2 }
 0x395   : > { %v2370_v12 = vadd.f32 %v2328_v53, %v2223_v29  ;;  %v2184_v9 = vpop.f32.mrf.mxu1 }
 0x396   : > { %v2475_v46 = vpop.f32.mrf.mxu3  ;;  %v2224_v58 = vadd.f32 %v5284_v7, %v2184_v9 }
 0x397   : > { %v5328_v22 = vadd.f32 %v2475_v46, %v2370_v12 }
 0x398   : > { %3823 = vmatmul.msk.f32.gmra.mxu1 %vm2029_vm5, %v5143_v21 }
 0x399   : > { %3840 = vmatmul.msk.f32.gmra.mxu2 %vm2029_vm5, %v5145_v62 }
 0x39b   : > { %3857 = vmatmul.msk.f32.gmra.mxu3 %vm2029_vm5, %v5147_v55 }
 0x39c   : > { %v2331_v63 = vpop.f32.mrf.mxu2 }
 0x39d   : > { %v2371_v27 = vadd.f32 %v2331_v63, %v2224_v58  ;;  %v2187_v42 = vpop.f32.mrf.mxu1 }
 0x39e   : > { %v2478_v10 = vpop.f32.mrf.mxu3  ;;  %v2225_v44 = vadd.f32 %v5284_v7, %v2187_v42 }
 0x39f   : > { %v5339_v25 = vadd.f32 %v2478_v10, %v2371_v27 }
 0x3a0   : > { %3824 = vmatmul.msk.f32.gmra.mxu1 %vm2029_vm5, %v5155_v3 }
 0x3a1   : > { %3841 = vmatmul.msk.f32.gmra.mxu2 %vm2029_vm5, %v5157_v24 }
 0x3a3   : > { %3858 = vmatmul.msk.f32.gmra.mxu3 %vm2029_vm5, %v5159_v36 }
 0x3a4   : > { %v2334_v21 = vpop.f32.mrf.mxu2 }
 0x3a5   : > { %v2372_v31 = vadd.f32 %v2334_v21, %v2225_v44  ;;  %v2190_v34 = vpop.f32.mrf.mxu1 }
 0x3a6   : > { %v2481_v60 = vpop.f32.mrf.mxu3  ;;  %v2226_v11 = vadd.f32 %v5284_v7, %v2190_v34 }
 0x3a7   : > { %v5350_v51 = vadd.f32 %v2481_v60, %v2372_v31 }
 0x3a8   : > { %3825 = vmatmul.msk.f32.gmra.mxu1 %vm2029_vm5, %v5167_v17 }
 0x3a9   : > { %3842 = vmatmul.msk.f32.gmra.mxu2 %vm2029_vm5, %v5169_v54 }
 0x3ab   : > { %3859 = vmatmul.msk.f32.gmra.mxu3 %vm2029_vm5, %v5171_v41 }
 0x3ac   : > { %v2337_v3 = vpop.f32.mrf.mxu2 }
 0x3ad   : > { %v2373_v15 = vadd.f32 %v2337_v3, %v2226_v11  ;;  %v2193_v43 = vpop.f32.mrf.mxu1 }
 0x3ae   : > { %v2484_v61 = vpop.f32.mrf.mxu3  ;;  %v2227_v39 = vadd.f32 %v5284_v7, %v2193_v43 }
 0x3af   : > { %v5361_v37 = vadd.f32 %v2484_v61, %v2373_v15 }
 0x3b0   : > { %3826 = vmatmul.msk.f32.gmra.mxu1 %vm2029_vm5, %v5179_v33 }
 0x3b1   : > { %3843 = vmatmul.msk.f32.gmra.mxu2 %vm2029_vm5, %v5181_v57 }
 0x3b3   : > { %3860 = vmatmul.msk.f32.gmra.mxu3 %vm2029_vm5, %v5183_v4 }
 0x3b4   : > { %v2340_v17 = vpop.f32.mrf.mxu2 }
 0x3b5   : > { %v2374_v50 = vadd.f32 %v2340_v17, %v2227_v39  ;;  %v2196_v5 = vpop.f32.mrf.mxu1 }
 0x3b6   : > { %v2487_v2 = vpop.f32.mrf.mxu3  ;;  %v2228_v53 = vadd.f32 %v5284_v7, %v2196_v5 }
 0x3b7   : > { %v5372_v29 = vadd.f32 %v2487_v2, %v2374_v50 }
 0x3b8   : > { %3827 = vmatmul.msk.f32.gmra.mxu1 %vm2029_vm5, %v5191_v49  ;;  %v2985_v49 = vld [vmem:[#allocation3 + $0xc0] sm:$0xff] }
 0x3b9   : > { %3844 = vmatmul.msk.f32.gmra.mxu2 %vm2029_vm5, %v5193_v32  ;;  %3882 = vmatmul.msk.f32.gmra.mxu0 %vm2029_vm5, %v2985_v49 }
 0x3bb   : > { %3861 = vmatmul.msk.f32.gmra.mxu3 %vm2029_vm5, %v5195_v23 }
 0x3bc   : > { %v2343_v33 = vpop.f32.mrf.mxu2 }
 0x3bd   : > { %v2375_v12 = vadd.f32 %v2343_v33, %v2228_v53  ;;  %v2199_v9 = vpop.f32.mrf.mxu1 }
 0x3be   : > { %v2490_v46 = vpop.f32.mrf.mxu3  ;;  %v2229_v63 = vadd.f32 %v5284_v7, %v2199_v9 }
 0x3bf   : > { %v5383_v58 = vadd.f32 %v2490_v46, %v2375_v12 }
 0x3c0   : > { %3828 = vmatmul.msk.f32.gmra.mxu1 %vm2029_vm5, %v5203_v20  ;;  %v2986_v20 = vld [vmem:[#allocation3 + $0xc8] sm:$0xff] }
 0x3c1   : > { %3845 = vmatmul.msk.f32.gmra.mxu2 %vm2029_vm5, %v5205_v28  ;;  %3883 = vmatmul.msk.f32.gmra.mxu0 %vm2029_vm5, %v2986_v20 }
 0x3c3   : > { %3862 = vmatmul.msk.f32.gmra.mxu3 %vm2029_vm5, %v5207_v35 }
 0x3c4   : > { %v2346_v27 = vpop.f32.mrf.mxu2 }
 0x3c5   : > { %v2376_v42 = vadd.f32 %v2346_v27, %v2229_v63  ;;  %v2202_v10 = vpop.f32.mrf.mxu1 }
 0x3c6   : > { %v2493_v44 = vpop.f32.mrf.mxu3  ;;  %v2230_v31 = vadd.f32 %v5284_v7, %v2202_v10 }
 0x3c7   : > { %v5393_v21 = vadd.f32 %v2493_v44, %v2376_v42  ;;  %v5432_v44 = vld [vmem:[#allocation3 + $0xc1] sm:$0xff] }
 0x3c8   : > { %3829 = vmatmul.msk.f32.gmra.mxu1 %vm2029_vm5, %v5218_v14  ;;  %v2987_v14 = vld [vmem:[#allocation3 + $0xd8] sm:$0xff] }
 0x3c9   : > { %3846 = vmatmul.msk.f32.gmra.mxu2 %vm2029_vm5, %v5220_v40  ;;  %3884 = vmatmul.msk.f32.gmra.mxu0 %vm2029_vm5, %v2987_v14  ;;  %v5444_v14 = vld [vmem:[#allocation3 + $0xc9] sm:$0xff] }
 0x3cb   : > { %3863 = vmatmul.msk.f32.gmra.mxu3 %vm2029_vm5, %v5222_v0 }
 0x3cc   : > { %v2349_v34 = vpop.f32.mrf.mxu2 }
 0x3cd   : > { %v2377_v60 = vadd.f32 %v2349_v34, %v2230_v31  ;;  %v2205_v11 = vpop.f32.mrf.mxu1  ;;  %v5436_v34 = vld [vmem:[#allocation3 + $0xc2] sm:$0xff] }
 0x3ce   : > { %v2496_v3 = vpop.f32.mrf.mxu3  ;;  %v2231_v43 = vadd.f32 %v5284_v7, %v2205_v11 }
 0x3cf   : > { %v5403_v15 = vadd.f32 %v2496_v3, %v2377_v60 }
 0x3d0   : > { %3830 = vmatmul.msk.f32.gmra.mxu1 %vm2029_vm5, %v5236_v30  ;;  %v2988_v30 = vld [vmem:[#allocation3 + $0xe0] sm:$0xff] }
 0x3d1   : > { %3847 = vmatmul.msk.f32.gmra.mxu2 %vm2029_vm5, %v5238_v1  ;;  %3885 = vmatmul.msk.f32.gmra.mxu0 %vm2029_vm5, %v2988_v30 }
 0x3d3   : > { %3864 = vmatmul.msk.f32.gmra.mxu3 %vm2029_vm5, %v5240_v38 }
 0x3d4   : > { %v2352_v61 = vpop.f32.mrf.mxu2 }
 0x3d5   : > { %v2378_v39 = vadd.f32 %v2352_v61, %v2231_v43  ;;  %v2208_v17 = vpop.f32.mrf.mxu1 }
 0x3d6   : > { %v2499_v50 = vpop.f32.mrf.mxu3  ;;  %v2232_v2 = vadd.f32 %v5284_v7, %v2208_v17 }
 0x3d7   : > { %v5413_v5 = vadd.f32 %v2499_v50, %v2378_v39  ;;  %v5448_v39 = vld [vmem:[#allocation3 + $0xca] sm:$0xff] }
 0x3d8   : > { %3831 = vmatmul.msk.f32.gmra.mxu1 %vm2029_vm5, %v5253_v59 }
 0x3d9   : > { %3848 = vmatmul.msk.f32.gmra.mxu2 %vm2029_vm5, %v5255_v6 }
 0x3db   : > { %3865 = vmatmul.msk.f32.gmra.mxu3 %vm2029_vm5, %v5257_v13 }
 0x3dc   : > { %v2355_v53 = vpop.f32.mrf.mxu2 }
 0x3dd   : > { %v2379_v33 = vadd.f32 %v2355_v53, %v2232_v2  ;;  %v2211_v12 = vpop.f32.mrf.mxu1 }
 0x3de   : > { %v2502_v9 = vpop.f32.mrf.mxu3  ;;  %v2233_v63 = vadd.f32 %v5284_v7, %v2211_v12 }
 0x3df   : > { %v5423_v46 = vadd.f32 %v2502_v9, %v2379_v33 }
 0x3e0   : > { %3832 = vmatmul.msk.f32.gmra.mxu1 %vm2029_vm5, %v5267_v56 }
 0x3e1   : > { %3849 = vmatmul.msk.f32.gmra.mxu2 %vm2029_vm5, %v5269_v52 }
 0x3e3   : > { %3866 = vmatmul.msk.f32.gmra.mxu3 %vm2029_vm5, %v5271_v8 }
 0x3e4   : > { %v2358_v59 = vpop.f32.mrf.mxu2 }
 0x3e5   : > { %v2380_v27 = vadd.f32 %v2358_v59, %v2233_v63  ;;  %v2214_v42 = vpop.f32.mrf.mxu1 }
 0x3e6   : > { %v2505_v10 = vpop.f32.mrf.mxu3  ;;  %v2234_v60 = vadd.f32 %v5284_v7, %v2214_v42 }
 0x3e7   : > { %v5434_v31 = vadd.f32 %v2505_v10, %v2380_v27 }
 0x3e8   : > { %3833 = vmatmul.msk.f32.gmra.mxu1 %vm2029_vm5, %v2985_v49 }
 0x3e9   : > { %3850 = vmatmul.msk.f32.gmra.mxu2 %vm2029_vm5, %v5432_v44 }
 0x3eb   : > { %3867 = vmatmul.msk.f32.gmra.mxu3 %vm2029_vm5, %v5436_v34 }
 0x3ec   : > { %v2361_v56 = vpop.f32.mrf.mxu2 }
 0x3ed   : > { %v2381_v11 = vadd.f32 %v2361_v56, %v2234_v60  ;;  %v2217_v3 = vpop.f32.mrf.mxu1 }
 0x3ee   : > { %v2508_v43 = vpop.f32.mrf.mxu3  ;;  %v2235_v17 = vadd.f32 %v5284_v7, %v2217_v3 }
 0x3ef   : > { %v5446_v61 = vadd.f32 %v2508_v43, %v2381_v11 }
 0x3f0   : > { %3834 = vmatmul.msk.f32.gmra.mxu1 %vm2029_vm5, %v2986_v20 }
 0x3f1   : > { %3851 = vmatmul.msk.f32.gmra.mxu2 %vm2029_vm5, %v5444_v14 }
 0x3f3   : > { %3868 = vmatmul.msk.f32.gmra.mxu3 %vm2029_vm5, %v5448_v39 }
 0x3f4   : > { %v2364_v49 = vpop.f32.mrf.mxu2 }
 0x3f5   : > { %v2382_v50 = vadd.f32 %v2364_v49, %v2235_v17  ;;  %v2614_v30 = vpop.f32.mrf.mxu1 }
 0x3f6   : > { %v2511_v2 = vpop.f32.mrf.mxu3  ;;  %v2662_v7 = vadd.f32 %v2614_v30, %v5295_v19 }
 0x3f7   : > { %v5456_v53 = vadd.f32 %v2511_v2, %v2382_v50 }
 0x3f8   : > { %3887 = vmatmul.msk.f32.vlgmr.msra.gmra.mxu1 %vm2029_vm5, %v5121_v48 }
 0x3f9   : > { %3904 = vmatmul.msk.f32.vlgmr.msra.gmra.mxu2 %vm2029_vm5, %v5123_v26 }
 0x3fc   : > { %v2761_v20 = vpop.f32.mrf.mxu2 }
 0x3fd   : > { %v5463_v33 = vadd.f32 %v2761_v20, %v2662_v7  ;;  %v2617_v12 = vpop.f32.mrf.mxu1 }
 0x3fe   : > { %v2663_v9 = vadd.f32 %v2617_v12, %v5306_v47  ;;  %v3134_v12 = vld [vmem:[#allocation3 + $0xd9] sm:$0xff] }
 0x400   : > { %3888 = vmatmul.msk.f32.gmra.mxu1 %vm2029_vm5, %v5133_v18 }
 0x401   : > { %3905 = vmatmul.msk.f32.gmra.mxu2 %vm2029_vm5, %v5135_v16 }
 0x404   : > { %v2764_v63 = vpop.f32.mrf.mxu2 }
 0x405   : > { %v5470_v59 = vadd.f32 %v2764_v63, %v2663_v9  ;;  %v2620_v48 = vpop.f32.mrf.mxu1 }
 0x406   : > { %v2664_v26 = vadd.f32 %v2620_v48, %v5317_v45 }
 0x408   : > { %3889 = vmatmul.msk.f32.gmra.mxu1 %vm2029_vm5, %v5145_v62 }
 0x409   : > { %3906 = vmatmul.msk.f32.gmra.mxu2 %vm2029_vm5, %v5147_v55 }
 0x40c   : > { %v2767_v19 = vpop.f32.mrf.mxu2 }
 0x40d   : > { %v5477_v27 = vadd.f32 %v2767_v19, %v2664_v26  ;;  %v2623_v18 = vpop.f32.mrf.mxu1  ;;  %v3282_v19 = vld [vmem:[#allocation3 + $0xe2] sm:$0xff] }
 0x40e   : > { %v2665_v16 = vadd.f32 %v2623_v18, %v5328_v22 }
 0x410   : > { %3890 = vmatmul.msk.f32.gmra.mxu1 %vm2029_vm5, %v5157_v24 }
 0x411   : > { %3907 = vmatmul.msk.f32.gmra.mxu2 %vm2029_vm5, %v5159_v36 }
 0x414   : > { %v2770_v47 = vpop.f32.mrf.mxu2 }
 0x415   : > { %v5484_v42 = vadd.f32 %v2770_v47, %v2665_v16  ;;  %v2626_v62 = vpop.f32.mrf.mxu1 }
 0x416   : > { %v2666_v55 = vadd.f32 %v2626_v62, %v5339_v25 }
 0x418   : > { %3891 = vmatmul.msk.f32.gmra.mxu1 %vm2029_vm5, %v5169_v54 }
 0x419   : > { %3908 = vmatmul.msk.f32.gmra.mxu2 %vm2029_vm5, %v5171_v41 }
 0x41c   : > { %v2773_v45 = vpop.f32.mrf.mxu2 }
 0x41d   : > { %v5491_v10 = vadd.f32 %v2773_v45, %v2666_v55  ;;  %v2629_v24 = vpop.f32.mrf.mxu1 }
 0x41e   : > { %v2667_v36 = vadd.f32 %v2629_v24, %v5350_v51 }
 0x420   : > { %3892 = vmatmul.msk.f32.gmra.mxu1 %vm2029_vm5, %v5181_v57 }
 0x421   : > { %3909 = vmatmul.msk.f32.gmra.mxu2 %vm2029_vm5, %v5183_v4 }
 0x424   : > { %v2776_v22 = vpop.f32.mrf.mxu2 }
 0x425   : > { %v5498_v60 = vadd.f32 %v2776_v22, %v2667_v36  ;;  %v2632_v54 = vpop.f32.mrf.mxu1 }
 0x426   : > { %v2668_v41 = vadd.f32 %v2632_v54, %v5361_v37 }
 0x428   : > { %3893 = vmatmul.msk.f32.gmra.mxu1 %vm2029_vm5, %v5193_v32 }
 0x429   : > { %3910 = vmatmul.msk.f32.gmra.mxu2 %vm2029_vm5, %v5195_v23 }
 0x42c   : > { %v2779_v25 = vpop.f32.mrf.mxu2 }
 0x42d   : > { %v5505_v56 = vadd.f32 %v2779_v25, %v2668_v41  ;;  %v2635_v57 = vpop.f32.mrf.mxu1 }
 0x42e   : > { %v2669_v4 = vadd.f32 %v2635_v57, %v5372_v29 }
 0x430   : > { %3894 = vmatmul.msk.f32.gmra.mxu1 %vm2029_vm5, %v5205_v28 }
 0x431   : > { %3911 = vmatmul.msk.f32.gmra.mxu2 %vm2029_vm5, %v5207_v35 }
 0x434   : > { %v2782_v51 = vpop.f32.mrf.mxu2 }
 0x435   : > { %v5512_v11 = vadd.f32 %v2782_v51, %v2669_v4  ;;  %v2638_v32 = vpop.f32.mrf.mxu1 }
 0x436   : > { %v2670_v23 = vadd.f32 %v2638_v32, %v5383_v58 }
 0x438   : > { %3895 = vmatmul.msk.f32.gmra.mxu1 %vm2029_vm5, %v5220_v40 }
 0x439   : > { %3912 = vmatmul.msk.f32.gmra.mxu2 %vm2029_vm5, %v5222_v0 }
 0x43c   : > { %v2785_v37 = vpop.f32.mrf.mxu2 }
 0x43d   : > { %v5519_v3 = vadd.f32 %v2785_v37, %v2670_v23  ;;  %v2641_v28 = vpop.f32.mrf.mxu1 }
 0x43e   : > { %v2671_v35 = vadd.f32 %v2641_v28, %v5393_v21 }
 0x440   : > { %3896 = vmatmul.msk.f32.gmra.mxu1 %vm2029_vm5, %v5238_v1 }
 0x441   : > { %3913 = vmatmul.msk.f32.gmra.mxu2 %vm2029_vm5, %v5240_v38  ;;  %v2908_v38 = vpop.f32.mrf.mxu3 }
 0x442   : > { %v2956_v47 = vadd.f32 %v2908_v38, %v5463_v33 }
 0x444   : > { %v2788_v29 = vpop.f32.mrf.mxu2 }
 0x445   : > { %v5526_v58 = vadd.f32 %v2788_v29, %v2671_v35  ;;  %v2644_v43 = vpop.f32.mrf.mxu1 }
 0x446   : > { %v2672_v40 = vadd.f32 %v2644_v43, %v5403_v15 }
 0x448   : > { %3897 = vmatmul.msk.f32.gmra.mxu1 %vm2029_vm5, %v5255_v6 }
 0x449   : > { %3914 = vmatmul.msk.f32.gmra.mxu2 %vm2029_vm5, %v5257_v13  ;;  %v3056_v13 = vpop.f32.mrf.mxu0 }
 0x44a   : > { %v3104_v24 = vadd.f32 %v3056_v13, %v2956_v47 }
 0x44c   : > { %v2791_v0 = vpop.f32.mrf.mxu2 }
 0x44d   : > { %v5533_v21 = vadd.f32 %v2791_v0, %v2672_v40  ;;  %v2647_v17 = vpop.f32.mrf.mxu1 }
 0x44e   : > { %v2673_v1 = vadd.f32 %v2647_v17, %v5413_v5 }
 0x450   : > { %3898 = vmatmul.msk.f32.gmra.mxu1 %vm2029_vm5, %v5269_v52  ;;  %v2911_v52 = vpop.f32.mrf.mxu3 }
 0x451   : > { %3915 = vmatmul.msk.f32.gmra.mxu2 %vm2029_vm5, %v5271_v8 }
 0x454   : > { %v2794_v15 = vpop.f32.mrf.mxu2 }
 0x455   : > { %v5540_v49 = vadd.f32 %v2794_v15, %v2673_v1  ;;  %v2650_v6 = vpop.f32.mrf.mxu1 }
 0x456   : > { %v2674_v50 = vadd.f32 %v2650_v6, %v5423_v46  ;;  %v3059_v46 = vpop.f32.mrf.mxu0 }
 0x458   : > { %3899 = vmatmul.msk.f32.gmra.mxu1 %vm2029_vm5, %v5432_v44  ;;  %v2914_v63 = vpop.f32.mrf.mxu3 }
 0x459   : > { %3916 = vmatmul.msk.f32.gmra.mxu2 %vm2029_vm5, %v5436_v34  ;;  %v3281_v34 = vld [vmem:[#allocation3 + $0xda] sm:$0xff]  ;;  %v2958_v23 = vadd.f32 %v2914_v63, %v5477_v27 }
 0x45c   : > { %v2797_v5 = vpop.f32.mrf.mxu2 }
 0x45d   : > { %v5547_v2 = vadd.f32 %v2797_v5, %v2674_v50  ;;  %v2653_v30 = vpop.f32.mrf.mxu1 }
 0x45e   : > { %v2675_v8 = vadd.f32 %v2653_v30, %v5434_v31  ;;  %v3062_v31 = vpop.f32.mrf.mxu0 }
 0x45f   : > { %v3106_v43 = vadd.f32 %v3062_v31, %v2958_v23 }
 0x460   : > { %3900 = vmatmul.msk.f32.gmra.mxu1 %vm2029_vm5, %v5444_v14  ;;  %v2917_v16 = vpop.f32.mrf.mxu3 }
 0x461   : > { %3917 = vmatmul.msk.f32.gmra.mxu2 %vm2029_vm5, %v5448_v39  ;;  %v3135_v39 = vld [vmem:[#allocation3 + $0xe1] sm:$0xff]  ;;  %v2959_v17 = vadd.f32 %v2917_v16, %v5484_v42 }
 0x464   : > { %v2800_v7 = vpop.f32.mrf.mxu2 }
 0x465   : > { %v5554_v20 = vadd.f32 %v2800_v7, %v2675_v8  ;;  %v2656_v44 = vpop.f32.mrf.mxu1 }
 0x466   : > { %v2676_v9 = vadd.f32 %v2656_v44, %v5446_v61  ;;  %v3065_v55 = vpop.f32.mrf.mxu0 }
 0x467   : > { %v3107_v50 = vadd.f32 %v3065_v55, %v2959_v17 }
 0x468   : > { %3901 = vmatmul.msk.f32.gmra.mxu1 %vm2029_vm5, %v3134_v12  ;;  %v2920_v22 = vpop.f32.mrf.mxu3 }
 0x469   : > { %3918 = vmatmul.msk.f32.gmra.mxu2 %vm2029_vm5, %v3281_v34 }
 0x46c   : > { %v2803_v48 = vpop.f32.mrf.mxu2 }
 0x46d   : > { %v5559_v14 = vadd.f32 %v2803_v48, %v2676_v9  ;;  %v2659_v26 = vpop.f32.mrf.mxu1 }
 0x46e   : > { %v2677_v18 = vadd.f32 %v2659_v26, %v5456_v53  ;;  %v2957_v53 = vadd.f32 %v2911_v52, %v5470_v59  ;;  %v3068_v4 = vpop.f32.mrf.mxu0  ;;  %v2960_v52 = vadd.f32 %v2920_v22, %v5491_v10 }
 0x470   : > { %3902 = vmatmul.msk.f32.gmra.mxu1 %vm2029_vm5, %v3135_v39  ;;  %v3105_v51 = vadd.f32 %v3059_v46, %v2957_v53  ;;  %v2923_v28 = vpop.f32.mrf.mxu3  ;;  %v3108_v7 = vadd.f32 %v3068_v4, %v2960_v52 }
 0x471   : > { %3919 = vmatmul.msk.f32.gmra.mxu2 %vm2029_vm5, %v3282_v19  ;;  %v2961_v34 = vadd.f32 %v2923_v28, %v5498_v60 }
 0x474   : > { %v2806_v61 = vpop.f32.mrf.mxu2 }
 0x475   : > { %v5565_v62 = vadd.f32 %v2806_v61, %v2677_v18  ;;  %v3203_v45 = vpop.f32.mrf.mxu1 }
 0x476   : > { %v3251_v36 = vadd.f32 %v3203_v45, %v3104_v24  ;;  %v3071_v59 = vpop.f32.mrf.mxu0 }
 0x477   : > { %v3109_v26 = vadd.f32 %v3071_v59, %v2961_v34 }
 0x478   : > { %v2926_v6 = vpop.f32.mrf.mxu3 }
 0x479   : > { %v2962_v18 = vadd.f32 %v2926_v6, %v5505_v56 }
 0x47c   : > { %v3350_v54 = vpop.f32.mrf.mxu2 }
 0x47d   : > { %v3398_v41 = vadd.f32 %v3350_v54, %v3251_v36  ;;  %v3206_v25 = vpop.f32.mrf.mxu1 }
 0x47e   : > { %v3252_v32 = vadd.f32 %v3206_v25, %v3105_v51  ;;  %v3074_v13 = vpop.f32.mrf.mxu0 }
 0x47f   : > { %v3414_v57 = vmax.f32 %v3398_v41, 0.0  ;;  %v3110_v45 = vadd.f32 %v3074_v13, %v2962_v18 }
 0x480   : > { %v2929_v42 = vpop.f32.mrf.mxu3 }
 0x481   : > { %3430 = vst.msk [vmem:[%s4116_s14] sm:$0xff] %vm2029_vm5, %v3414_v57  ;;  %v2963_v36 = vadd.f32 %v2929_v42, %v5512_v11 }
 0x484   : > { %v3353_v33 = vpop.f32.mrf.mxu2 }
 0x485   : > { %v3399_v37 = vadd.f32 %v3353_v33, %v3252_v32  ;;  %v3209_v35 = vpop.f32.mrf.mxu1 }
 0x486   : > { %v3253_v40 = vadd.f32 %v3209_v35, %v3106_v43  ;;  %v3077_v63 = vpop.f32.mrf.mxu0 }
 0x487   : > { %v3415_v29 = vmax.f32 %v3399_v37, 0.0  ;;  %v3111_v25 = vadd.f32 %v3077_v63, %v2963_v36 }
 0x488   : > { %v2932_v39 = vpop.f32.mrf.mxu3 }
 0x489   : > { %3431 = vst.msk [vmem:[%s4116_s14 + $0x8] sm:$0xff] %vm2029_vm5, %v3415_v29  ;;  %v2964_v51 = vadd.f32 %v2932_v39, %v5519_v3 }
 0x48c   : > { %v3356_v0 = vpop.f32.mrf.mxu2 }
 0x48d   : > { %v3400_v1 = vadd.f32 %v3356_v0, %v3253_v40  ;;  %v3212_v38 = vpop.f32.mrf.mxu1 }
 0x48e   : > { %v3254_v27 = vadd.f32 %v3212_v38, %v3107_v50  ;;  %v3080_v55 = vpop.f32.mrf.mxu0 }
 0x48f   : > { %v3416_v15 = vmax.f32 %v3400_v1, 0.0  ;;  %v3112_v28 = vadd.f32 %v3080_v55, %v2964_v51 }
 0x490   : > { %v2935_v54 = vpop.f32.mrf.mxu3 }
 0x491   : > { %3432 = vst.msk [vmem:[%s4116_s14 + $0x10] sm:$0xff] %vm2029_vm5, %v3416_v15  ;;  %v2965_v43 = vadd.f32 %v2935_v54, %v5526_v58 }
 0x494   : > { %v3359_v5 = vpop.f32.mrf.mxu2 }
 0x495   : > { %v3401_v30 = vadd.f32 %v3359_v5, %v3254_v27  ;;  %v3215_v8 = vpop.f32.mrf.mxu1 }
 0x496   : > { %v3255_v44 = vadd.f32 %v3215_v8, %v3108_v7  ;;  %v3083_v56 = vpop.f32.mrf.mxu0 }
 0x497   : > { %v3417_v46 = vmax.f32 %v3401_v30, 0.0  ;;  %v3113_v17 = vadd.f32 %v3083_v56, %v2965_v43 }
 0x498   : > { %v2938_v37 = vpop.f32.mrf.mxu3 }
 0x499   : > { %3433 = vst.msk [vmem:[%s4116_s14 + $0x18] sm:$0xff] %vm2029_vm5, %v3417_v46  ;;  %v2966_v15 = vadd.f32 %v2938_v37, %v5533_v21 }
 0x49c   : > { %v3362_v12 = vpop.f32.mrf.mxu2 }
 0x49d   : > { %v3402_v9 = vadd.f32 %v3362_v12, %v3255_v44  ;;  %v3218_v31 = vpop.f32.mrf.mxu1 }
 0x49e   : > { %v3256_v10 = vadd.f32 %v3218_v31, %v3109_v26  ;;  %v3086_v35 = vpop.f32.mrf.mxu0 }
 0x49f   : > { %v3418_v48 = vmax.f32 %v3402_v9, 0.0  ;;  %v3114_v5 = vadd.f32 %v3086_v35, %v2966_v15 }
 0x4a0   : > { %v2941_v3 = vpop.f32.mrf.mxu3 }
 0x4a1   : > { %3434 = vst.msk [vmem:[%s4116_s14 + $0x20] sm:$0xff] %vm2029_vm5, %v3418_v48  ;;  %v2967_v8 = vadd.f32 %v2941_v3, %v5540_v49 }
 0x4a4   : > { %v3365_v19 = vpop.f32.mrf.mxu2 }
 0x4a5   : > { %v3403_v16 = vadd.f32 %v3365_v19, %v3256_v10  ;;  %v3221_v61 = vpop.f32.mrf.mxu1 }
 0x4a6   : > { %v3257_v60 = vadd.f32 %v3221_v61, %v3110_v45  ;;  %v3089_v50 = vpop.f32.mrf.mxu0 }
 0x4a7   : > { %v3419_v47 = vmax.f32 %v3403_v16, 0.0  ;;  %v3115_v12 = vadd.f32 %v3089_v50, %v2967_v8 }
 0x4a8   : > { %v2944_v52 = vpop.f32.mrf.mxu3 }
 0x4a9   : > { %3435 = vst.msk [vmem:[%s4116_s14 + $0x28] sm:$0xff] %vm2029_vm5, %v3419_v47  ;;  %v2968_v9 = vadd.f32 %v2944_v52, %v5547_v2 }
 0x4ac   : > { %v3368_v24 = vpop.f32.mrf.mxu2 }
 0x4ad   : > { %v3404_v22 = vadd.f32 %v3368_v24, %v3257_v60  ;;  %v3224_v53 = vpop.f32.mrf.mxu1 }
 0x4ae   : > { %v3258_v57 = vadd.f32 %v3224_v53, %v3111_v25  ;;  %v3092_v44 = vpop.f32.mrf.mxu0 }
 0x4af   : > { %v3420_v41 = vmax.f32 %v3404_v22, 0.0  ;;  %v3116_v10 = vadd.f32 %v3092_v44, %v2968_v9 }
 0x4b0   : > { %v2947_v31 = vpop.f32.mrf.mxu3 }
 0x4b1   : > { %3436 = vst.msk [vmem:[%s4116_s14 + $0x30] sm:$0xff] %vm2029_vm5, %v3420_v41  ;;  %v2969_v18 = vadd.f32 %v2947_v31, %v5554_v20 }
 0x4b4   : > { %v3371_v4 = vpop.f32.mrf.mxu2 }
 0x4b5   : > { %v3405_v32 = vadd.f32 %v3371_v4, %v3258_v57  ;;  %v3227_v33 = vpop.f32.mrf.mxu1 }
 0x4b6   : > { %v3259_v11 = vadd.f32 %v3227_v33, %v3112_v28  ;;  %v3095_v49 = vpop.f32.mrf.mxu0 }
 0x4b7   : > { %v3421_v23 = vmax.f32 %v3405_v32, 0.0  ;;  %v3117_v45 = vadd.f32 %v3095_v49, %v2969_v18 }
 0x4b8   : > { %v2950_v55 = vpop.f32.mrf.mxu3 }
 0x4b9   : > { %3437 = vst.msk [vmem:[%s4116_s14 + $0x38] sm:$0xff] %vm2029_vm5, %v3421_v23  ;;  %v2970_v36 = vadd.f32 %v2950_v55, %v5559_v14 }
 0x4bc   : > { %v3374_v29 = vpop.f32.mrf.mxu2 }
 0x4bd   : > { %v3406_v59 = vadd.f32 %v3374_v29, %v3259_v11  ;;  %v3230_v40 = vpop.f32.mrf.mxu1 }
 0x4be   : > { %v3260_v1 = vadd.f32 %v3230_v40, %v3113_v17  ;;  %v3098_v60 = vpop.f32.mrf.mxu0 }
 0x4bf   : > { %v3422_v0 = vmax.f32 %v3406_v59, 0.0  ;;  %v3118_v41 = vadd.f32 %v3098_v60, %v2970_v36 }
 0x4c0   : > { %v2953_v20 = vpop.f32.mrf.mxu3 }
 0x4c1   : > { %3438 = vst.msk [vmem:[%s4116_s14 + $0x40] sm:$0xff] %vm2029_vm5, %v3422_v0  ;;  %v2971_v57 = vadd.f32 %v2953_v20, %v5565_v62 }
 0x4c4   : > { %v3377_v38 = vpop.f32.mrf.mxu2 }
 0x4c5   : > { %v3407_v6 = vadd.f32 %v3377_v38, %v3260_v1  ;;  %v3233_v27 = vpop.f32.mrf.mxu1 }
 0x4c6   : > { %v3261_v58 = vadd.f32 %v3233_v27, %v3114_v5  ;;  %v3101_v51 = vpop.f32.mrf.mxu0 }
 0x4c7   : > { %v3423_v13 = vmax.f32 %v3407_v6, 0.0  ;;  %v3119_v23 = vadd.f32 %v3101_v51, %v2971_v57 }
 0x4c9   : > { %3439 = vst.msk [vmem:[%s4116_s14 + $0x48] sm:$0xff] %vm2029_vm5, %v3423_v13 }
 0x4cc   : > { %v3380_v30 = vpop.f32.mrf.mxu2 }
 0x4cd   : > { %v3408_v46 = vadd.f32 %v3380_v30, %v3261_v58  ;;  %v3236_v7 = vpop.f32.mrf.mxu1 }
 0x4ce   : > { %v3262_v21 = vadd.f32 %v3236_v7, %v3115_v12 }
 0x4cf   : > { %v3424_v42 = vmax.f32 %v3408_v46, 0.0 }
 0x4d1   : > { %3440 = vst.msk [vmem:[%s4116_s14 + $0x50] sm:$0xff] %vm2029_vm5, %v3424_v42 }
 0x4d4   : > { %v3383_v34 = vpop.f32.mrf.mxu2 }
 0x4d5   : > { %v3409_v63 = vadd.f32 %v3383_v34, %v3262_v21  ;;  %v3239_v48 = vpop.f32.mrf.mxu1 }
 0x4d6   : > { %v3263_v39 = vadd.f32 %v3239_v48, %v3116_v10 }
 0x4d7   : > { %v3425_v26 = vmax.f32 %v3409_v63, 0.0 }
 0x4d9   : > { %3441 = vst.msk [vmem:[%s4116_s14 + $0x58] sm:$0xff] %vm2029_vm5, %v3425_v26 }
 0x4dc   : > { %v3386_v19 = vpop.f32.mrf.mxu2 }
 0x4dd   : > { %v3410_v16 = vadd.f32 %v3386_v19, %v3263_v39  ;;  %v3242_v61 = vpop.f32.mrf.mxu1 }
 0x4de   : > { %v3264_v2 = vadd.f32 %v3242_v61, %v3117_v45 }
 0x4df   : > { %v3426_v47 = vmax.f32 %v3410_v16, 0.0 }
 0x4e1   : > { %3442 = vst.msk [vmem:[%s4116_s14 + $0x60] sm:$0xff] %vm2029_vm5, %v3426_v47 }
 0x4e4   : > { %v3389_v24 = vpop.f32.mrf.mxu2 }
 0x4e5   : > { %v3411_v22 = vadd.f32 %v3389_v24, %v3264_v2  ;;  %v3245_v54 = vpop.f32.mrf.mxu1 }
 0x4e6   : > { %v3265_v25 = vadd.f32 %v3245_v54, %v3118_v41 }
 0x4e7   : > { %v3427_v53 = vmax.f32 %v3411_v22, 0.0 }
 0x4e9   : > { %3443 = vst.msk [vmem:[%s4116_s14 + $0x68] sm:$0xff] %vm2029_vm5, %v3427_v53 }
 0x4ec   : > { %v3392_v56 = vpop.f32.mrf.mxu2 }
 0x4ed   : > { %v3412_v4 = vadd.f32 %v3392_v56, %v3265_v25  ;;  %v3248_v33 = vpop.f32.mrf.mxu1 }
 0x4ee   : > { %v3266_v14 = vadd.f32 %v3248_v33, %v3119_v23 }
 0x4ef   : > { %v3428_v32 = vmax.f32 %v3412_v4, 0.0 }
 0x4f1   : > { %3444 = vst.msk [vmem:[%s4116_s14 + $0x70] sm:$0xff] %vm2029_vm5, %v3428_v32 }
 0x4f4   : > { %v3395_v37 = vpop.f32.mrf.mxu2 }
 0x4f5   : > { %v3413_v28 = vadd.f32 %v3395_v37, %v3266_v14 }
 0x4f7   : > { %v3429_v11 = vmax.f32 %v3413_v28, 0.0 }
 0x4f9   : > { %3445 = vst.msk [vmem:[%s4116_s14 + $0x78] sm:$0xff] %vm2029_vm5, %v3429_v11 }
 0x4fa PF: > { %s15_s22 = sadd.s32 1, %s4013_s22   ;;  %s5712_s18 = smov %s4005_s20 }
 0x4fb   : > { %p12_p11 = scmp.ge.s32.totalorder %s15_s22, 6   ;;  %s5713_s19 = smov %s4009_s21 }
 0x4fc   : > { %s5714_s20 = smov %s5717_s23  ;;  %s5715_s21 = smov %s5721_s24 }
 0x4fd   :  { %14 = sbr.rel (!%p12_p11) target bundleno = 3 (0x3), region = 120 }

</bundles_post_ra>
